<compile_context>
chip_gen: v7x
topology: tpu7x:2x2x1
jax: 0.10.0
libtpu: 0.0.40
codegen_flags: <defaults>
</compile_context>

<pallas_src>
import functools
import math

import jax
import jax.numpy as jnp
import numpy as np
from jax.experimental import pallas as pl
from jax.experimental.pallas import tpu as pltpu


def _cross_attn_kernel(x_ref, ctx_ref, wq_ref, bq_ref, wkv_ref, bkv_ref,
                       wo_ref, bo_ref, g_ref, beta_ref, o_ref,
                       *, heads, H, W, eps, bB):
    # x_ref:   (bB, C, S)   queries in transposed (channel, token) layout
    # ctx_ref: (bB, C, Sc)  key/value tokens in transposed layout
    # wq_ref:  (C, C)   q projection, 1/sqrt(Dh) pre-folded     bq_ref: (C, 1)
    # wkv_ref: (2C, C)  fused [k; v] projection                 bkv_ref: (2C, 1)
    # wo_ref:  (C, C)   output projection                       bo_ref: (C, 1)
    # g_ref / beta_ref: (1, S) LayerNorm gamma/beta tiled over the H groups of S
    # o_ref:   (bB, C, S) normalized output (lane-dense store)
    C = wq_ref.shape[0]
    S = x_ref.shape[2]
    Sc = ctx_ref.shape[2]
    Dh = C // heads
    f32 = jnp.float32

    wq = wq_ref[...]
    bq = bq_ref[...]
    wkv = wkv_ref[...]
    bkv = bkv_ref[...]
    wo = wo_ref[...]
    bo = bo_ref[...]
    g = g_ref[...]
    beta = beta_ref[...]

    # 0/1 pooling (S -> H groups of W) and broadcast (H -> S) matrices for the grouped
    # LayerNorm statistics; built with iota + compares (no integer division) and used with
    # canonical MXU matmuls instead of reshape + sublane-shuffle reductions.
    s_i = jax.lax.broadcasted_iota(jnp.int32, (S, H), 0)
    h_i = jax.lax.broadcasted_iota(jnp.int32, (S, H), 1)
    P = ((s_i >= h_i * W) & (s_i < (h_i + 1) * W)).astype(f32)       # (S, H)
    h_j = jax.lax.broadcasted_iota(jnp.int32, (H, S), 0)
    s_j = jax.lax.broadcasted_iota(jnp.int32, (H, S), 1)
    PT = ((s_j >= h_j * W) & (s_j < (h_j + 1) * W)).astype(f32)      # (H, S)
    inv_W = 1.0 / W

    ones_row = jnp.ones((1, Sc), f32)
    nt_dims = (((1,), (1,)), ((), ()))   # contract last dims of both operands (A @ B^T form)

    for b in range(bB):
        xT = x_ref[b]                    # (C, S)
        cT = ctx_ref[b]                  # (C, Sc)

        # Projections, lane-dense: q^T = Wq_s @ x^T ; [k;v]^T = Wkv @ c^T (no weight transposes).
        qT = jnp.dot(wq, xT, preferred_element_type=f32) + bq        # (C, S), already scaled
        kvT = jnp.dot(wkv, cT, preferred_element_type=f32) + bkv     # (2C, Sc)
        kT = kvT[:C]                                                  # (C, Sc)
        vT = kvT[C:]                                                  # (C, Sc)

        q = qT.T                         # (S, C): single small transpose per batch element

        head_outs = []
        for h in range(heads):
            lo, hi = h * Dh, (h + 1) * Dh
            s = jnp.dot(q[:, lo:hi], kT[lo:hi], preferred_element_type=f32)   # (S, Sc)
            p = jnp.exp(s - jnp.max(s, axis=-1, keepdims=True))               # (S, Sc)
            # Augment V with a row of ones: one NT matmul produces both the unnormalized
            # head output (already transposed) and the softmax denominator row.
            va = jnp.concatenate([vT[lo:hi], ones_row], axis=0)               # (Dh+1, Sc)
            oa = jax.lax.dot_general(va, p, nt_dims,
                                     preferred_element_type=f32)              # (Dh+1, S)
            head_outs.append(oa[:Dh] * (1.0 / oa[Dh:Dh + 1]))                 # (Dh, S)
        attnT = jnp.concatenate(head_outs, axis=0)                            # (C, S)

        outT = jnp.dot(wo, attnT, preferred_element_type=f32) + bo            # (C, S)
        zT = outT + xT                                                        # residual

        # LayerNorm over the W axis of the NCHW tensor (W == dim): group statistics via MXU
        # pooling matmuls, broadcast back with PT, then affine with tiled gamma/beta.
        sums = jnp.dot(zT, P, preferred_element_type=f32)                     # (C, H)
        sumsq = jnp.dot(zT * zT, P, preferred_element_type=f32)               # (C, H)
        mean = sums * inv_W
        var = sumsq * inv_W - mean * mean
        rstd = jax.lax.rsqrt(var + eps)
        mean_b = jnp.dot(mean, PT, preferred_element_type=f32)                # (C, S)
        rstd_b = jnp.dot(rstd, PT, preferred_element_type=f32)                # (C, S)
        o_ref[b] = (zT - mean_b) * rstd_b * g + beta


def _single_tensorcore_chip():
    """True on single-TensorCore chips (v5e/v6e): collapse the batch grid into one step."""
    try:
        kind = jax.devices()[0].device_kind.lower()
    except Exception:
        return False
    return ("lite" in kind) or ("v5e" in kind) or ("v6" in kind)


def cross_attention_block(x, context, params, *, heads=8, eps=1e-5):
    """x, context: NCHW float32; returns NCHW float32 (same shape as x)."""
    B, C, H, W = x.shape
    Bc, Cc, Hc, Wc = context.shape
    assert B == Bc and C == Cc
    assert C % heads == 0
    # nn.LayerNorm(dim) applied to the NCHW tensor normalizes the last (W) axis, so W == dim.
    assert W == C, "LayerNorm(dim) on NCHW requires W == dim (as in the PyTorch module)"
    S, Sc = H * W, Hc * Wc
    Dh = C // heads
    scale = 1.0 / math.sqrt(Dh)

    # Lane-dense (B, C, S) layout: a free reshape of NCHW (no wrapper transposes).
    x_cs = x.reshape(B, C, S)
    ctx_cs = context.reshape(B, C, Sc)

    wqkv = params["in_proj_weight"]                  # (3C, C), PyTorch packing [q; k; v]
    bqkv = params["in_proj_bias"]                    # (3C,)
    w_q = wqkv[:C] * scale                           # fold 1/sqrt(Dh) into Wq / bq
    b_q = (bqkv[:C] * scale).reshape(C, 1)
    w_kv = wqkv[C:]                                  # (2C, C) fused K|V projection
    b_kv = bqkv[C:].reshape(2 * C, 1)
    w_o = params["out_proj_weight"]                  # (C, C)
    b_o = params["out_proj_bias"].reshape(C, 1)
    # gamma/beta indexed by W: tile over the H groups so the kernel applies them as a
    # plain (1, S) lane-aligned broadcast.
    g_t = jnp.tile(params["ln_weight"], H).reshape(1, S)
    b_t = jnp.tile(params["ln_bias"], H).reshape(1, S)

    # Whole batch per step on single-TC chips; one batch element per step ("parallel") on v7x.
    bB = B if (_single_tensorcore_chip() and B <= 8) else 1
    grid_b = B // bB

    kernel = functools.partial(_cross_attn_kernel, heads=heads, H=H, W=W, eps=eps, bB=bB)

    out_cs = pl.pallas_call(
        kernel,
        out_shape=jax.ShapeDtypeStruct((B, C, S), jnp.float32),
        grid_spec=pltpu.PrefetchScalarGridSpec(
            num_scalar_prefetch=0,
            grid=(grid_b,),
            in_specs=[
                pl.BlockSpec((bB, C, S), lambda b: (b, 0, 0)),
                pl.BlockSpec((bB, C, Sc), lambda b: (b, 0, 0)),
                pl.BlockSpec((C, C), lambda b: (0, 0)),
                pl.BlockSpec((C, 1), lambda b: (0, 0)),
                pl.BlockSpec((2 * C, C), lambda b: (0, 0)),
                pl.BlockSpec((2 * C, 1), lambda b: (0, 0)),
                pl.BlockSpec((C, C), lambda b: (0, 0)),
                pl.BlockSpec((C, 1), lambda b: (0, 0)),
                pl.BlockSpec((1, S), lambda b: (0, 0)),
                pl.BlockSpec((1, S), lambda b: (0, 0)),
            ],
            out_specs=pl.BlockSpec((bB, C, S), lambda b: (b, 0, 0)),
        ),
        compiler_params=pltpu.CompilerParams(dimension_semantics=("parallel",)),
    )(x_cs, ctx_cs, w_q, b_q, w_kv, b_kv, w_o, b_o, g_t, b_t)

    # (B, C, S) -> (B, C, H, W): free reshape, no transpose.
    return out_cs.reshape(B, C, H, W)


def reference(x, context, params, *, heads=8, eps=1e-5):
    """Pure-JAX reference matching PyTorch semantics exactly."""
    B, C, H, W = x.shape
    S = H * W
    Sc = context.shape[2] * context.shape[3]
    Dh = C // heads
    xf = jnp.transpose(x, (0, 2, 3, 1)).reshape(B, S, C)
    cf = jnp.transpose(context, (0, 2, 3, 1)).reshape(B, Sc, C)
    wqkv, bqkv = params["in_proj_weight"], params["in_proj_bias"]
    Wq, Wk, Wv = wqkv[:C], wqkv[C:2 * C], wqkv[2 * C:]
    bq, bk, bv = bqkv[:C], bqkv[C:2 * C], bqkv[2 * C:]
    q = xf @ Wq.T + bq
    k = cf @ Wk.T + bk
    v = cf @ Wv.T + bv
    q = q.reshape(B, S, heads, Dh).transpose(0, 2, 1, 3) / math.sqrt(Dh)
    k = k.reshape(B, Sc, heads, Dh).transpose(0, 2, 1, 3)
    v = v.reshape(B, Sc, heads, Dh).transpose(0, 2, 1, 3)
    s = jnp.einsum("bhqd,bhkd->bhqk", q, k)
    p = jax.nn.softmax(s, axis=-1)
    a = jnp.einsum("bhqk,bhkd->bhqd", p, v)
    a = a.transpose(0, 2, 1, 3).reshape(B, S, C)
    out = a @ params["out_proj_weight"].T + params["out_proj_bias"]
    attn_nchw = jnp.transpose(out.reshape(B, H, W, C), (0, 3, 1, 2))
    z = attn_nchw + x
    mean = jnp.mean(z, axis=-1, keepdims=True)
    var = jnp.mean((z - mean) ** 2, axis=-1, keepdims=True)
    return (z - mean) * jax.lax.rsqrt(var + eps) * params["ln_weight"] + params["ln_bias"]


def init_params(key, dim):
    ks = jax.random.split(key, 4)
    a = math.sqrt(6.0 / (dim + dim))  # xavier_uniform-like
    return {
        "in_proj_weight": jax.random.uniform(ks[0], (3 * dim, dim), jnp.float32, -a, a),
        "in_proj_bias": jnp.zeros((3 * dim,), jnp.float32),
        "out_proj_weight": jax.random.uniform(ks[1], (dim, dim), jnp.float32, -a, a),
        "out_proj_bias": jnp.zeros((dim,), jnp.float32),
        "ln_weight": jnp.ones((dim,), jnp.float32) + 0.05 * jax.random.normal(ks[2], (dim,)),
        "ln_bias": 0.05 * jax.random.normal(ks[3], (dim,)),
    }


if __name__ == "__main__":
    # Small shapes consistent with the module: dim == C == W (LayerNorm(dim) over last NCHW axis).
    B, dim, heads = 2, 32, 8
    H, W = 4, dim            # x: (B, dim, H, W), seq = H*W = 128
    Hc, Wc = 4, dim          # context: same channel count; its own spatial extent

    key = jax.random.PRNGKey(0)
    kx, kc, kp = jax.random.split(key, 3)
    x = jax.random.normal(kx, (B, dim, H, W), jnp.float32)
    context = jax.random.normal(kc, (B, dim, Hc, Wc), jnp.float32)
    params = init_params(kp, dim)

    out = cross_attention_block(x, context, params, heads=heads)
    out = jax.block_until_ready(out)

    ref = reference(x, context, params, heads=heads)
    np.testing.assert_allclose(np.asarray(out), np.asarray(ref), rtol=5e-5, atol=5e-5)
    assert out.shape == x.shape and out.dtype == jnp.float32
    print("KERNEL_OK")
</pallas_src>

<mosaic_0001>
module attributes {stable_mosaic.version = 11 : i64} {
  func.func @_cross_attn_kernel(%arg0: i32, %arg1: memref<1x32x128xf32, #tpu.memory_space<vmem>>, %arg2: memref<1x32x128xf32, #tpu.memory_space<vmem>>, %arg3: memref<32x32xf32, #tpu.memory_space<vmem>>, %arg4: memref<32x1xf32, #tpu.memory_space<vmem>>, %arg5: memref<64x32xf32, #tpu.memory_space<vmem>>, %arg6: memref<64x1xf32, #tpu.memory_space<vmem>>, %arg7: memref<32x32xf32, #tpu.memory_space<vmem>>, %arg8: memref<32x1xf32, #tpu.memory_space<vmem>>, %arg9: memref<1x128xf32, #tpu.memory_space<vmem>>, %arg10: memref<1x128xf32, #tpu.memory_space<vmem>>, %arg11: memref<1x32x128xf32, #tpu.memory_space<vmem>>) attributes {dimension_semantics = [#tpu.dimension_semantics<parallel>], iteration_bounds = array<i64: 2>, scalar_prefetch = 0 : i64, scratch_operands = 0 : i64, tpu.core_type = #tpu.core_type<tc>, window_params = [{transform_indices = @transform_0, window_bounds = array<i64: 1, 32, 128>}, {transform_indices = @transform_1, window_bounds = array<i64: 1, 32, 128>}, {pipeline_mode = #tpu.pipeline_mode<synchronous>, transform_indices = @transform_2, window_bounds = array<i64: 32, 32>}, {pipeline_mode = #tpu.pipeline_mode<synchronous>, transform_indices = @transform_3, window_bounds = array<i64: 32, 1>}, {pipeline_mode = #tpu.pipeline_mode<synchronous>, transform_indices = @transform_4, window_bounds = array<i64: 64, 32>}, {pipeline_mode = #tpu.pipeline_mode<synchronous>, transform_indices = @transform_5, window_bounds = array<i64: 64, 1>}, {pipeline_mode = #tpu.pipeline_mode<synchronous>, transform_indices = @transform_6, window_bounds = array<i64: 32, 32>}, {pipeline_mode = #tpu.pipeline_mode<synchronous>, transform_indices = @transform_7, window_bounds = array<i64: 32, 1>}, {pipeline_mode = #tpu.pipeline_mode<synchronous>, transform_indices = @transform_8, window_bounds = array<i64: 1, 128>}, {pipeline_mode = #tpu.pipeline_mode<synchronous>, transform_indices = @transform_9, window_bounds = array<i64: 1, 128>}, {transform_indices = @transform_10, window_bounds = array<i64: 1, 32, 128>}]} {
    %c0 = arith.constant 0 : index
    %c0_0 = arith.constant 0 : index
    %0 = vector.load %arg3[%c0, %c0_0] : memref<32x32xf32, #tpu.memory_space<vmem>>, vector<32x32xf32>
    %c0_1 = arith.constant 0 : index
    %c0_2 = arith.constant 0 : index
    %1 = vector.load %arg4[%c0_1, %c0_2] : memref<32x1xf32, #tpu.memory_space<vmem>>, vector<32x1xf32>
    %c0_3 = arith.constant 0 : index
    %c0_4 = arith.constant 0 : index
    %2 = vector.load %arg5[%c0_3, %c0_4] : memref<64x32xf32, #tpu.memory_space<vmem>>, vector<64x32xf32>
    %c0_5 = arith.constant 0 : index
    %c0_6 = arith.constant 0 : index
    %3 = vector.load %arg6[%c0_5, %c0_6] : memref<64x1xf32, #tpu.memory_space<vmem>>, vector<64x1xf32>
    %c0_7 = arith.constant 0 : index
    %c0_8 = arith.constant 0 : index
    %4 = vector.load %arg7[%c0_7, %c0_8] : memref<32x32xf32, #tpu.memory_space<vmem>>, vector<32x32xf32>
    %c0_9 = arith.constant 0 : index
    %c0_10 = arith.constant 0 : index
    %5 = vector.load %arg8[%c0_9, %c0_10] : memref<32x1xf32, #tpu.memory_space<vmem>>, vector<32x1xf32>
    %c0_11 = arith.constant 0 : index
    %c0_12 = arith.constant 0 : index
    %6 = vector.load %arg9[%c0_11, %c0_12] : memref<1x128xf32, #tpu.memory_space<vmem>>, vector<1x128xf32>
    %c0_13 = arith.constant 0 : index
    %c0_14 = arith.constant 0 : index
    %7 = vector.load %arg10[%c0_13, %c0_14] : memref<1x128xf32, #tpu.memory_space<vmem>>, vector<1x128xf32>
    %8 = tpu.iota {dimensions = array<i32: 0>} : vector<128x4xi32>
    %9 = tpu.iota {dimensions = array<i32: 1>} : vector<128x4xi32>
    %c32_i32 = arith.constant 32 : i32
    %10 = vector.broadcast %c32_i32 : i32 to vector<128x4xi32>
    %11 = arith.muli %9, %10 : vector<128x4xi32>
    %12 = arith.cmpi sge, %8, %11 : vector<128x4xi32>
    %c1_i32 = arith.constant 1 : i32
    %13 = vector.broadcast %c1_i32 : i32 to vector<128x4xi32>
    %14 = arith.addi %9, %13 : vector<128x4xi32>
    %c32_i32_15 = arith.constant 32 : i32
    %15 = vector.broadcast %c32_i32_15 : i32 to vector<128x4xi32>
    %16 = arith.muli %14, %15 : vector<128x4xi32>
    %17 = arith.cmpi slt, %8, %16 : vector<128x4xi32>
    %18 = arith.andi %12, %17 : vector<128x4xi1>
    %19 = arith.extui %18 : vector<128x4xi1> to vector<128x4xi32>
    %20 = arith.sitofp %19 : vector<128x4xi32> to vector<128x4xf32>
    %21 = tpu.iota {dimensions = array<i32: 0>} : vector<4x128xi32>
    %22 = tpu.iota {dimensions = array<i32: 1>} : vector<4x128xi32>
    %c32_i32_16 = arith.constant 32 : i32
    %23 = vector.broadcast %c32_i32_16 : i32 to vector<4x128xi32>
    %24 = arith.muli %21, %23 : vector<4x128xi32>
    %25 = arith.cmpi sge, %22, %24 : vector<4x128xi32>
    %c1_i32_17 = arith.constant 1 : i32
    %26 = vector.broadcast %c1_i32_17 : i32 to vector<4x128xi32>
    %27 = arith.addi %21, %26 : vector<4x128xi32>
    %c32_i32_18 = arith.constant 32 : i32
    %28 = vector.broadcast %c32_i32_18 : i32 to vector<4x128xi32>
    %29 = arith.muli %27, %28 : vector<4x128xi32>
    %30 = arith.cmpi slt, %22, %29 : vector<4x128xi32>
    %31 = arith.andi %25, %30 : vector<4x128xi1>
    %32 = arith.extui %31 : vector<4x128xi1> to vector<4x128xi32>
    %33 = arith.sitofp %32 : vector<4x128xi32> to vector<4x128xf32>
    %cst = arith.constant 1.000000e+00 : f32
    %34 = vector.broadcast %cst : f32 to vector<1x128xf32>
    %c0_19 = arith.constant 0 : index
    %c0_20 = arith.constant 0 : index
    %c0_21 = arith.constant 0 : index
    %35 = vector.load %arg1[%c0_19, %c0_20, %c0_21] : memref<1x32x128xf32, #tpu.memory_space<vmem>>, vector<1x32x128xf32>
    %36 = vector.shape_cast %35 : vector<1x32x128xf32> to vector<32x128xf32>
    %c0_22 = arith.constant 0 : index
    %c0_23 = arith.constant 0 : index
    %c0_24 = arith.constant 0 : index
    %37 = vector.load %arg2[%c0_22, %c0_23, %c0_24] : memref<1x32x128xf32, #tpu.memory_space<vmem>>, vector<1x32x128xf32>
    %38 = vector.shape_cast %37 : vector<1x32x128xf32> to vector<32x128xf32>
    %cst_25 = arith.constant dense<0.000000e+00> : vector<32x128xf32>
    %39 = tpu.matmul %0, %36, %cst_25 {dimension_numbers = #tpu.dot_dimension_numbers<[1], [0], [0], [1], [0, 0, 1, 1], [], []>} : vector<32x32xf32>, vector<32x128xf32>, vector<32x128xf32> -> vector<32x128xf32>
    %40 = vector.broadcast %1 : vector<32x1xf32> to vector<32x128xf32>
    %41 = arith.addf %39, %40 : vector<32x128xf32>
    %cst_26 = arith.constant dense<0.000000e+00> : vector<64x128xf32>
    %42 = tpu.matmul %2, %38, %cst_26 {dimension_numbers = #tpu.dot_dimension_numbers<[1], [0], [0], [1], [0, 0, 1, 1], [], []>} : vector<64x32xf32>, vector<32x128xf32>, vector<64x128xf32> -> vector<64x128xf32>
    %43 = vector.broadcast %3 : vector<64x1xf32> to vector<64x128xf32>
    %44 = arith.addf %42, %43 : vector<64x128xf32>
    %45 = vector.extract_strided_slice %44 {offsets = [0, 0], sizes = [32, 128], strides = [1, 1]} : vector<64x128xf32> to vector<32x128xf32>
    %46 = vector.extract_strided_slice %44 {offsets = [32, 0], sizes = [32, 128], strides = [1, 1]} : vector<64x128xf32> to vector<32x128xf32>
    %47 = tpu.transpose %41, [1, 0] : vector<32x128xf32> -> vector<128x32xf32>
    %48 = vector.extract_strided_slice %47 {offsets = [0, 0], sizes = [128, 4], strides = [1, 1]} : vector<128x32xf32> to vector<128x4xf32>
    %49 = vector.extract_strided_slice %45 {offsets = [0, 0], sizes = [4, 128], strides = [1, 1]} : vector<32x128xf32> to vector<4x128xf32>
    %cst_27 = arith.constant dense<0.000000e+00> : vector<128x128xf32>
    %50 = tpu.matmul %48, %49, %cst_27 {dimension_numbers = #tpu.dot_dimension_numbers<[1], [0], [0], [1], [0, 0, 1, 1], [], []>} : vector<128x4xf32>, vector<4x128xf32>, vector<128x128xf32> -> vector<128x128xf32>
    %cst_28 = arith.constant dense<0xFF800000> : vector<128xf32>
    %51 = vector.multi_reduction <maximumf>, %50, %cst_28 [1] : vector<128x128xf32> to vector<128xf32>
    %52 = vector.shape_cast %51 : vector<128xf32> to vector<128x1xf32>
    %53 = vector.broadcast %52 : vector<128x1xf32> to vector<128x128xf32>
    %54 = arith.subf %50, %53 : vector<128x128xf32>
    %55 = math.exp %54 : vector<128x128xf32>
    %56 = vector.extract_strided_slice %46 {offsets = [0, 0], sizes = [4, 128], strides = [1, 1]} : vector<32x128xf32> to vector<4x128xf32>
    %57 = tpu.concatenate %56, %34 in 0 : vector<4x128xf32>, vector<1x128xf32> -> vector<5x128xf32>
    %cst_29 = arith.constant dense<0.000000e+00> : vector<5x128xf32>
    %58 = tpu.matmul %57, %55, %cst_29 {dimension_numbers = #tpu.dot_dimension_numbers<[1], [1], [0], [0], [0, 0, 1, 0], [], []>} : vector<5x128xf32>, vector<128x128xf32>, vector<5x128xf32> -> vector<5x128xf32>
    %59 = vector.extract_strided_slice %58 {offsets = [0, 0], sizes = [4, 128], strides = [1, 1]} : vector<5x128xf32> to vector<4x128xf32>
    %60 = vector.extract_strided_slice %58 {offsets = [4, 0], sizes = [1, 128], strides = [1, 1]} : vector<5x128xf32> to vector<1x128xf32>
    %cst_30 = arith.constant 1.000000e+00 : f32
    %61 = vector.broadcast %cst_30 : f32 to vector<1x128xf32>
    %62 = arith.divf %61, %60 : vector<1x128xf32>
    %63 = vector.broadcast %62 : vector<1x128xf32> to vector<4x128xf32>
    %64 = arith.mulf %59, %63 : vector<4x128xf32>
    %65 = vector.extract_strided_slice %47 {offsets = [0, 4], sizes = [128, 4], strides = [1, 1]} : vector<128x32xf32> to vector<128x4xf32>
    %66 = vector.extract_strided_slice %45 {offsets = [4, 0], sizes = [4, 128], strides = [1, 1]} : vector<32x128xf32> to vector<4x128xf32>
    %cst_31 = arith.constant dense<0.000000e+00> : vector<128x128xf32>
    %67 = tpu.matmul %65, %66, %cst_31 {dimension_numbers = #tpu.dot_dimension_numbers<[1], [0], [0], [1], [0, 0, 1, 1], [], []>} : vector<128x4xf32>, vector<4x128xf32>, vector<128x128xf32> -> vector<128x128xf32>
    %cst_32 = arith.constant dense<0xFF800000> : vector<128xf32>
    %68 = vector.multi_reduction <maximumf>, %67, %cst_32 [1] : vector<128x128xf32> to vector<128xf32>
    %69 = vector.shape_cast %68 : vector<128xf32> to vector<128x1xf32>
    %70 = vector.broadcast %69 : vector<128x1xf32> to vector<128x128xf32>
    %71 = arith.subf %67, %70 : vector<128x128xf32>
    %72 = math.exp %71 : vector<128x128xf32>
    %73 = vector.extract_strided_slice %46 {offsets = [4, 0], sizes = [4, 128], strides = [1, 1]} : vector<32x128xf32> to vector<4x128xf32>
    %74 = tpu.concatenate %73, %34 in 0 : vector<4x128xf32>, vector<1x128xf32> -> vector<5x128xf32>
    %cst_33 = arith.constant dense<0.000000e+00> : vector<5x128xf32>
    %75 = tpu.matmul %74, %72, %cst_33 {dimension_numbers = #tpu.dot_dimension_numbers<[1], [1], [0], [0], [0, 0, 1, 0], [], []>} : vector<5x128xf32>, vector<128x128xf32>, vector<5x128xf32> -> vector<5x128xf32>
    %76 = vector.extract_strided_slice %75 {offsets = [0, 0], sizes = [4, 128], strides = [1, 1]} : vector<5x128xf32> to vector<4x128xf32>
    %77 = vector.extract_strided_slice %75 {offsets = [4, 0], sizes = [1, 128], strides = [1, 1]} : vector<5x128xf32> to vector<1x128xf32>
    %cst_34 = arith.constant 1.000000e+00 : f32
    %78 = vector.broadcast %cst_34 : f32 to vector<1x128xf32>
    %79 = arith.divf %78, %77 : vector<1x128xf32>
    %80 = vector.broadcast %79 : vector<1x128xf32> to vector<4x128xf32>
    %81 = arith.mulf %76, %80 : vector<4x128xf32>
    %82 = vector.extract_strided_slice %47 {offsets = [0, 8], sizes = [128, 4], strides = [1, 1]} : vector<128x32xf32> to vector<128x4xf32>
    %83 = vector.extract_strided_slice %45 {offsets = [8, 0], sizes = [4, 128], strides = [1, 1]} : vector<32x128xf32> to vector<4x128xf32>
    %cst_35 = arith.constant dense<0.000000e+00> : vector<128x128xf32>
    %84 = tpu.matmul %82, %83, %cst_35 {dimension_numbers = #tpu.dot_dimension_numbers<[1], [0], [0], [1], [0, 0, 1, 1], [], []>} : vector<128x4xf32>, vector<4x128xf32>, vector<128x128xf32> -> vector<128x128xf32>
    %cst_36 = arith.constant dense<0xFF800000> : vector<128xf32>
    %85 = vector.multi_reduction <maximumf>, %84, %cst_36 [1] : vector<128x128xf32> to vector<128xf32>
    %86 = vector.shape_cast %85 : vector<128xf32> to vector<128x1xf32>
    %87 = vector.broadcast %86 : vector<128x1xf32> to vector<128x128xf32>
    %88 = arith.subf %84, %87 : vector<128x128xf32>
    %89 = math.exp %88 : vector<128x128xf32>
    %90 = vector.extract_strided_slice %46 {offsets = [8, 0], sizes = [4, 128], strides = [1, 1]} : vector<32x128xf32> to vector<4x128xf32>
    %91 = tpu.concatenate %90, %34 in 0 : vector<4x128xf32>, vector<1x128xf32> -> vector<5x128xf32>
    %cst_37 = arith.constant dense<0.000000e+00> : vector<5x128xf32>
    %92 = tpu.matmul %91, %89, %cst_37 {dimension_numbers = #tpu.dot_dimension_numbers<[1], [1], [0], [0], [0, 0, 1, 0], [], []>} : vector<5x128xf32>, vector<128x128xf32>, vector<5x128xf32> -> vector<5x128xf32>
    %93 = vector.extract_strided_slice %92 {offsets = [0, 0], sizes = [4, 128], strides = [1, 1]} : vector<5x128xf32> to vector<4x128xf32>
    %94 = vector.extract_strided_slice %92 {offsets = [4, 0], sizes = [1, 128], strides = [1, 1]} : vector<5x128xf32> to vector<1x128xf32>
    %cst_38 = arith.constant 1.000000e+00 : f32
    %95 = vector.broadcast %cst_38 : f32 to vector<1x128xf32>
    %96 = arith.divf %95, %94 : vector<1x128xf32>
    %97 = vector.broadcast %96 : vector<1x128xf32> to vector<4x128xf32>
    %98 = arith.mulf %93, %97 : vector<4x128xf32>
    %99 = vector.extract_strided_slice %47 {offsets = [0, 12], sizes = [128, 4], strides = [1, 1]} : vector<128x32xf32> to vector<128x4xf32>
    %100 = vector.extract_strided_slice %45 {offsets = [12, 0], sizes = [4, 128], strides = [1, 1]} : vector<32x128xf32> to vector<4x128xf32>
    %cst_39 = arith.constant dense<0.000000e+00> : vector<128x128xf32>
    %101 = tpu.matmul %99, %100, %cst_39 {dimension_numbers = #tpu.dot_dimension_numbers<[1], [0], [0], [1], [0, 0, 1, 1], [], []>} : vector<128x4xf32>, vector<4x128xf32>, vector<128x128xf32> -> vector<128x128xf32>
    %cst_40 = arith.constant dense<0xFF800000> : vector<128xf32>
    %102 = vector.multi_reduction <maximumf>, %101, %cst_40 [1] : vector<128x128xf32> to vector<128xf32>
    %103 = vector.shape_cast %102 : vector<128xf32> to vector<128x1xf32>
    %104 = vector.broadcast %103 : vector<128x1xf32> to vector<128x128xf32>
    %105 = arith.subf %101, %104 : vector<128x128xf32>
    %106 = math.exp %105 : vector<128x128xf32>
    %107 = vector.extract_strided_slice %46 {offsets = [12, 0], sizes = [4, 128], strides = [1, 1]} : vector<32x128xf32> to vector<4x128xf32>
    %108 = tpu.concatenate %107, %34 in 0 : vector<4x128xf32>, vector<1x128xf32> -> vector<5x128xf32>
    %cst_41 = arith.constant dense<0.000000e+00> : vector<5x128xf32>
    %109 = tpu.matmul %108, %106, %cst_41 {dimension_numbers = #tpu.dot_dimension_numbers<[1], [1], [0], [0], [0, 0, 1, 0], [], []>} : vector<5x128xf32>, vector<128x128xf32>, vector<5x128xf32> -> vector<5x128xf32>
    %110 = vector.extract_strided_slice %109 {offsets = [0, 0], sizes = [4, 128], strides = [1, 1]} : vector<5x128xf32> to vector<4x128xf32>
    %111 = vector.extract_strided_slice %109 {offsets = [4, 0], sizes = [1, 128], strides = [1, 1]} : vector<5x128xf32> to vector<1x128xf32>
    %cst_42 = arith.constant 1.000000e+00 : f32
    %112 = vector.broadcast %cst_42 : f32 to vector<1x128xf32>
    %113 = arith.divf %112, %111 : vector<1x128xf32>
    %114 = vector.broadcast %113 : vector<1x128xf32> to vector<4x128xf32>
    %115 = arith.mulf %110, %114 : vector<4x128xf32>
    %116 = vector.extract_strided_slice %47 {offsets = [0, 16], sizes = [128, 4], strides = [1, 1]} : vector<128x32xf32> to vector<128x4xf32>
    %117 = vector.extract_strided_slice %45 {offsets = [16, 0], sizes = [4, 128], strides = [1, 1]} : vector<32x128xf32> to vector<4x128xf32>
    %cst_43 = arith.constant dense<0.000000e+00> : vector<128x128xf32>
    %118 = tpu.matmul %116, %117, %cst_43 {dimension_numbers = #tpu.dot_dimension_numbers<[1], [0], [0], [1], [0, 0, 1, 1], [], []>} : vector<128x4xf32>, vector<4x128xf32>, vector<128x128xf32> -> vector<128x128xf32>
    %cst_44 = arith.constant dense<0xFF800000> : vector<128xf32>
    %119 = vector.multi_reduction <maximumf>, %118, %cst_44 [1] : vector<128x128xf32> to vector<128xf32>
    %120 = vector.shape_cast %119 : vector<128xf32> to vector<128x1xf32>
    %121 = vector.broadcast %120 : vector<128x1xf32> to vector<128x128xf32>
    %122 = arith.subf %118, %121 : vector<128x128xf32>
    %123 = math.exp %122 : vector<128x128xf32>
    %124 = vector.extract_strided_slice %46 {offsets = [16, 0], sizes = [4, 128], strides = [1, 1]} : vector<32x128xf32> to vector<4x128xf32>
    %125 = tpu.concatenate %124, %34 in 0 : vector<4x128xf32>, vector<1x128xf32> -> vector<5x128xf32>
    %cst_45 = arith.constant dense<0.000000e+00> : vector<5x128xf32>
    %126 = tpu.matmul %125, %123, %cst_45 {dimension_numbers = #tpu.dot_dimension_numbers<[1], [1], [0], [0], [0, 0, 1, 0], [], []>} : vector<5x128xf32>, vector<128x128xf32>, vector<5x128xf32> -> vector<5x128xf32>
    %127 = vector.extract_strided_slice %126 {offsets = [0, 0], sizes = [4, 128], strides = [1, 1]} : vector<5x128xf32> to vector<4x128xf32>
    %128 = vector.extract_strided_slice %126 {offsets = [4, 0], sizes = [1, 128], strides = [1, 1]} : vector<5x128xf32> to vector<1x128xf32>
    %cst_46 = arith.constant 1.000000e+00 : f32
    %129 = vector.broadcast %cst_46 : f32 to vector<1x128xf32>
    %130 = arith.divf %129, %128 : vector<1x128xf32>
    %131 = vector.broadcast %130 : vector<1x128xf32> to vector<4x128xf32>
    %132 = arith.mulf %127, %131 : vector<4x128xf32>
    %133 = vector.extract_strided_slice %47 {offsets = [0, 20], sizes = [128, 4], strides = [1, 1]} : vector<128x32xf32> to vector<128x4xf32>
    %134 = vector.extract_strided_slice %45 {offsets = [20, 0], sizes = [4, 128], strides = [1, 1]} : vector<32x128xf32> to vector<4x128xf32>
    %cst_47 = arith.constant dense<0.000000e+00> : vector<128x128xf32>
    %135 = tpu.matmul %133, %134, %cst_47 {dimension_numbers = #tpu.dot_dimension_numbers<[1], [0], [0], [1], [0, 0, 1, 1], [], []>} : vector<128x4xf32>, vector<4x128xf32>, vector<128x128xf32> -> vector<128x128xf32>
    %cst_48 = arith.constant dense<0xFF800000> : vector<128xf32>
    %136 = vector.multi_reduction <maximumf>, %135, %cst_48 [1] : vector<128x128xf32> to vector<128xf32>
    %137 = vector.shape_cast %136 : vector<128xf32> to vector<128x1xf32>
    %138 = vector.broadcast %137 : vector<128x1xf32> to vector<128x128xf32>
    %139 = arith.subf %135, %138 : vector<128x128xf32>
    %140 = math.exp %139 : vector<128x128xf32>
    %141 = vector.extract_strided_slice %46 {offsets = [20, 0], sizes = [4, 128], strides = [1, 1]} : vector<32x128xf32> to vector<4x128xf32>
    %142 = tpu.concatenate %141, %34 in 0 : vector<4x128xf32>, vector<1x128xf32> -> vector<5x128xf32>
    %cst_49 = arith.constant dense<0.000000e+00> : vector<5x128xf32>
    %143 = tpu.matmul %142, %140, %cst_49 {dimension_numbers = #tpu.dot_dimension_numbers<[1], [1], [0], [0], [0, 0, 1, 0], [], []>} : vector<5x128xf32>, vector<128x128xf32>, vector<5x128xf32> -> vector<5x128xf32>
    %144 = vector.extract_strided_slice %143 {offsets = [0, 0], sizes = [4, 128], strides = [1, 1]} : vector<5x128xf32> to vector<4x128xf32>
    %145 = vector.extract_strided_slice %143 {offsets = [4, 0], sizes = [1, 128], strides = [1, 1]} : vector<5x128xf32> to vector<1x128xf32>
    %cst_50 = arith.constant 1.000000e+00 : f32
    %146 = vector.broadcast %cst_50 : f32 to vector<1x128xf32>
    %147 = arith.divf %146, %145 : vector<1x128xf32>
    %148 = vector.broadcast %147 : vector<1x128xf32> to vector<4x128xf32>
    %149 = arith.mulf %144, %148 : vector<4x128xf32>
    %150 = vector.extract_strided_slice %47 {offsets = [0, 24], sizes = [128, 4], strides = [1, 1]} : vector<128x32xf32> to vector<128x4xf32>
    %151 = vector.extract_strided_slice %45 {offsets = [24, 0], sizes = [4, 128], strides = [1, 1]} : vector<32x128xf32> to vector<4x128xf32>
    %cst_51 = arith.constant dense<0.000000e+00> : vector<128x128xf32>
    %152 = tpu.matmul %150, %151, %cst_51 {dimension_numbers = #tpu.dot_dimension_numbers<[1], [0], [0], [1], [0, 0, 1, 1], [], []>} : vector<128x4xf32>, vector<4x128xf32>, vector<128x128xf32> -> vector<128x128xf32>
    %cst_52 = arith.constant dense<0xFF800000> : vector<128xf32>
    %153 = vector.multi_reduction <maximumf>, %152, %cst_52 [1] : vector<128x128xf32> to vector<128xf32>
    %154 = vector.shape_cast %153 : vector<128xf32> to vector<128x1xf32>
    %155 = vector.broadcast %154 : vector<128x1xf32> to vector<128x128xf32>
    %156 = arith.subf %152, %155 : vector<128x128xf32>
    %157 = math.exp %156 : vector<128x128xf32>
    %158 = vector.extract_strided_slice %46 {offsets = [24, 0], sizes = [4, 128], strides = [1, 1]} : vector<32x128xf32> to vector<4x128xf32>
    %159 = tpu.concatenate %158, %34 in 0 : vector<4x128xf32>, vector<1x128xf32> -> vector<5x128xf32>
    %cst_53 = arith.constant dense<0.000000e+00> : vector<5x128xf32>
    %160 = tpu.matmul %159, %157, %cst_53 {dimension_numbers = #tpu.dot_dimension_numbers<[1], [1], [0], [0], [0, 0, 1, 0], [], []>} : vector<5x128xf32>, vector<128x128xf32>, vector<5x128xf32> -> vector<5x128xf32>
    %161 = vector.extract_strided_slice %160 {offsets = [0, 0], sizes = [4, 128], strides = [1, 1]} : vector<5x128xf32> to vector<4x128xf32>
    %162 = vector.extract_strided_slice %160 {offsets = [4, 0], sizes = [1, 128], strides = [1, 1]} : vector<5x128xf32> to vector<1x128xf32>
    %cst_54 = arith.constant 1.000000e+00 : f32
    %163 = vector.broadcast %cst_54 : f32 to vector<1x128xf32>
    %164 = arith.divf %163, %162 : vector<1x128xf32>
    %165 = vector.broadcast %164 : vector<1x128xf32> to vector<4x128xf32>
    %166 = arith.mulf %161, %165 : vector<4x128xf32>
    %167 = vector.extract_strided_slice %47 {offsets = [0, 28], sizes = [128, 4], strides = [1, 1]} : vector<128x32xf32> to vector<128x4xf32>
    %168 = vector.extract_strided_slice %45 {offsets = [28, 0], sizes = [4, 128], strides = [1, 1]} : vector<32x128xf32> to vector<4x128xf32>
    %cst_55 = arith.constant dense<0.000000e+00> : vector<128x128xf32>
    %169 = tpu.matmul %167, %168, %cst_55 {dimension_numbers = #tpu.dot_dimension_numbers<[1], [0], [0], [1], [0, 0, 1, 1], [], []>} : vector<128x4xf32>, vector<4x128xf32>, vector<128x128xf32> -> vector<128x128xf32>
    %cst_56 = arith.constant dense<0xFF800000> : vector<128xf32>
    %170 = vector.multi_reduction <maximumf>, %169, %cst_56 [1] : vector<128x128xf32> to vector<128xf32>
    %171 = vector.shape_cast %170 : vector<128xf32> to vector<128x1xf32>
    %172 = vector.broadcast %171 : vector<128x1xf32> to vector<128x128xf32>
    %173 = arith.subf %169, %172 : vector<128x128xf32>
    %174 = math.exp %173 : vector<128x128xf32>
    %175 = vector.extract_strided_slice %46 {offsets = [28, 0], sizes = [4, 128], strides = [1, 1]} : vector<32x128xf32> to vector<4x128xf32>
    %176 = tpu.concatenate %175, %34 in 0 : vector<4x128xf32>, vector<1x128xf32> -> vector<5x128xf32>
    %cst_57 = arith.constant dense<0.000000e+00> : vector<5x128xf32>
    %177 = tpu.matmul %176, %174, %cst_57 {dimension_numbers = #tpu.dot_dimension_numbers<[1], [1], [0], [0], [0, 0, 1, 0], [], []>} : vector<5x128xf32>, vector<128x128xf32>, vector<5x128xf32> -> vector<5x128xf32>
    %178 = vector.extract_strided_slice %177 {offsets = [0, 0], sizes = [4, 128], strides = [1, 1]} : vector<5x128xf32> to vector<4x128xf32>
    %179 = vector.extract_strided_slice %177 {offsets = [4, 0], sizes = [1, 128], strides = [1, 1]} : vector<5x128xf32> to vector<1x128xf32>
    %cst_58 = arith.constant 1.000000e+00 : f32
    %180 = vector.broadcast %cst_58 : f32 to vector<1x128xf32>
    %181 = arith.divf %180, %179 : vector<1x128xf32>
    %182 = vector.broadcast %181 : vector<1x128xf32> to vector<4x128xf32>
    %183 = arith.mulf %178, %182 : vector<4x128xf32>
    %184 = tpu.concatenate %64, %81, %98, %115, %132, %149, %166, %183 in 0 : vector<4x128xf32>, vector<4x128xf32>, vector<4x128xf32>, vector<4x128xf32>, vector<4x128xf32>, vector<4x128xf32>, vector<4x128xf32>, vector<4x128xf32> -> vector<32x128xf32>
    %cst_59 = arith.constant dense<0.000000e+00> : vector<32x128xf32>
    %185 = tpu.matmul %4, %184, %cst_59 {dimension_numbers = #tpu.dot_dimension_numbers<[1], [0], [0], [1], [0, 0, 1, 1], [], []>} : vector<32x32xf32>, vector<32x128xf32>, vector<32x128xf32> -> vector<32x128xf32>
    %186 = vector.broadcast %5 : vector<32x1xf32> to vector<32x128xf32>
    %187 = arith.addf %185, %186 : vector<32x128xf32>
    %188 = arith.addf %187, %36 : vector<32x128xf32>
    %cst_60 = arith.constant dense<0.000000e+00> : vector<32x4xf32>
    %189 = tpu.matmul %188, %20, %cst_60 {dimension_numbers = #tpu.dot_dimension_numbers<[1], [0], [0], [1], [0, 0, 1, 1], [], []>} : vector<32x128xf32>, vector<128x4xf32>, vector<32x4xf32> -> vector<32x4xf32>
    %190 = arith.mulf %188, %188 : vector<32x128xf32>
    %cst_61 = arith.constant dense<0.000000e+00> : vector<32x4xf32>
    %191 = tpu.matmul %190, %20, %cst_61 {dimension_numbers = #tpu.dot_dimension_numbers<[1], [0], [0], [1], [0, 0, 1, 1], [], []>} : vector<32x128xf32>, vector<128x4xf32>, vector<32x4xf32> -> vector<32x4xf32>
    %cst_62 = arith.constant 3.125000e-02 : f32
    %192 = vector.broadcast %cst_62 : f32 to vector<32x4xf32>
    %193 = arith.mulf %189, %192 : vector<32x4xf32>
    %cst_63 = arith.constant 3.125000e-02 : f32
    %194 = vector.broadcast %cst_63 : f32 to vector<32x4xf32>
    %195 = arith.mulf %191, %194 : vector<32x4xf32>
    %196 = arith.mulf %193, %193 : vector<32x4xf32>
    %197 = arith.subf %195, %196 : vector<32x4xf32>
    %cst_64 = arith.constant 9.99999974E-6 : f32
    %198 = vector.broadcast %cst_64 : f32 to vector<32x4xf32>
    %199 = arith.addf %197, %198 : vector<32x4xf32>
    %200 = math.rsqrt %199 : vector<32x4xf32>
    %cst_65 = arith.constant dense<0.000000e+00> : vector<32x128xf32>
    %201 = tpu.matmul %193, %33, %cst_65 {dimension_numbers = #tpu.dot_dimension_numbers<[1], [0], [0], [1], [0, 0, 1, 1], [], []>} : vector<32x4xf32>, vector<4x128xf32>, vector<32x128xf32> -> vector<32x128xf32>
    %cst_66 = arith.constant dense<0.000000e+00> : vector<32x128xf32>
    %202 = tpu.matmul %200, %33, %cst_66 {dimension_numbers = #tpu.dot_dimension_numbers<[1], [0], [0], [1], [0, 0, 1, 1], [], []>} : vector<32x4xf32>, vector<4x128xf32>, vector<32x128xf32> -> vector<32x128xf32>
    %203 = arith.subf %188, %201 : vector<32x128xf32>
    %204 = arith.mulf %203, %202 : vector<32x128xf32>
    %205 = vector.broadcast %6 : vector<1x128xf32> to vector<32x128xf32>
    %206 = arith.mulf %204, %205 : vector<32x128xf32>
    %207 = vector.broadcast %7 : vector<1x128xf32> to vector<32x128xf32>
    %208 = arith.addf %206, %207 : vector<32x128xf32>
    %c0_67 = arith.constant 0 : index
    %c0_68 = arith.constant 0 : index
    %c0_69 = arith.constant 0 : index
    %209 = vector.load %arg11[%c0_67, %c0_68, %c0_69] : memref<1x32x128xf32, #tpu.memory_space<vmem>>, vector<1x32x128xf32>
    %210 = vector.shape_cast %209 : vector<1x32x128xf32> to vector<32x128xf32>
    %211 = vector.shape_cast %208 : vector<32x128xf32> to vector<1x32x128xf32>
    tpu.vector_store %arg11[%c0_67, %c0_68, %c0_69], %211 {strides = array<i32>} : memref<1x32x128xf32, #tpu.memory_space<vmem>>, vector<1x32x128xf32>,
    return
  }
  func.func @transform_0(%arg0: i32) -> (i32, i32, i32) {
    %c0_i32 = arith.constant 0 : i32
    %c0_i32_0 = arith.constant 0 : i32
    %c0_i32_1 = arith.constant 0 : i32
    return %arg0, %c0_i32, %c0_i32_0 : i32, i32, i32
  }
  func.func @transform_1(%arg0: i32) -> (i32, i32, i32) {
    %c0_i32 = arith.constant 0 : i32
    %c0_i32_0 = arith.constant 0 : i32
    %c0_i32_1 = arith.constant 0 : i32
    return %arg0, %c0_i32, %c0_i32_0 : i32, i32, i32
  }
  func.func @transform_2(%arg0: i32) -> (i32, i32) {
    %c0_i32 = arith.constant 0 : i32
    %c0_i32_0 = arith.constant 0 : i32
    %c0_i32_1 = arith.constant 0 : i32
    return %c0_i32, %c0_i32_0 : i32, i32
  }
  func.func @transform_3(%arg0: i32) -> (i32, i32) {
    %c0_i32 = arith.constant 0 : i32
    %c0_i32_0 = arith.constant 0 : i32
    %c0_i32_1 = arith.constant 0 : i32
    return %c0_i32, %c0_i32_0 : i32, i32
  }
  func.func @transform_4(%arg0: i32) -> (i32, i32) {
    %c0_i32 = arith.constant 0 : i32
    %c0_i32_0 = arith.constant 0 : i32
    %c0_i32_1 = arith.constant 0 : i32
    return %c0_i32, %c0_i32_0 : i32, i32
  }
  func.func @transform_5(%arg0: i32) -> (i32, i32) {
    %c0_i32 = arith.constant 0 : i32
    %c0_i32_0 = arith.constant 0 : i32
    %c0_i32_1 = arith.constant 0 : i32
    return %c0_i32, %c0_i32_0 : i32, i32
  }
  func.func @transform_6(%arg0: i32) -> (i32, i32) {
    %c0_i32 = arith.constant 0 : i32
    %c0_i32_0 = arith.constant 0 : i32
    %c0_i32_1 = arith.constant 0 : i32
    return %c0_i32, %c0_i32_0 : i32, i32
  }
  func.func @transform_7(%arg0: i32) -> (i32, i32) {
    %c0_i32 = arith.constant 0 : i32
    %c0_i32_0 = arith.constant 0 : i32
    %c0_i32_1 = arith.constant 0 : i32
    return %c0_i32, %c0_i32_0 : i32, i32
  }
  func.func @transform_8(%arg0: i32) -> (i32, i32) {
    %c0_i32 = arith.constant 0 : i32
    %c0_i32_0 = arith.constant 0 : i32
    %c0_i32_1 = arith.constant 0 : i32
    return %c0_i32, %c0_i32_0 : i32, i32
  }
  func.func @transform_9(%arg0: i32) -> (i32, i32) {
    %c0_i32 = arith.constant 0 : i32
    %c0_i32_0 = arith.constant 0 : i32
    %c0_i32_1 = arith.constant 0 : i32
    return %c0_i32, %c0_i32_0 : i32, i32
  }
  func.func @transform_10(%arg0: i32) -> (i32, i32, i32) {
    %c0_i32 = arith.constant 0 : i32
    %c0_i32_0 = arith.constant 0 : i32
    %c0_i32_1 = arith.constant 0 : i32
    return %arg0, %c0_i32, %c0_i32_0 : i32, i32, i32
  }
}

</mosaic_0001>

<bundles_post_ra>
// kernel: tpu_custom_call.1
= control target key start
LH: loop header
LB: loop body
LE: loop exit
PB: predicated region body
PF: predicated region fallthrough
CT: control target
= control target key end

     0   :  { %15 = vsyncpa [#allocation3], 0  ;;  %s7930_s0 = inlined_call_operand.vmem [shape: f32[2,32,128], index: 0, kind: input, shape index: {}]   ;;  %s7931_s1 = inlined_call_operand.vmem [shape: f32[2,32,128], index: 1, kind: input, shape index: {}]   ;;  %s7932_s2 = inlined_call_operand.vmem [shape: f32[32,32], index: 2, kind: input, shape index: {}]   ;;  %s7933_s3 = inlined_call_operand.vmem [shape: f32[32,1], index: 3, kind: input, shape index: {}]   ;;  %s7934_s4 = inlined_call_operand.vmem [shape: f32[64,32], index: 4, kind: input, shape index: {}]   ;;  %s7935_s5 = inlined_call_operand.vmem [shape: f32[64,1], index: 5, kind: input, shape index: {}]   ;;  %s7936_s6 = inlined_call_operand.vmem [shape: f32[32,32], index: 6, kind: input, shape index: {}]   ;;  %s7937_s7 = inlined_call_operand.vmem [shape: f32[32,1], index: 7, kind: input, shape index: {}]   ;;  %s7938_s8 = inlined_call_operand.vmem [shape: f32[1,128], index: 8, kind: input, shape index: {}]   ;;  %s7939_s9 = inlined_call_operand.vmem [shape: f32[1,128], index: 9, kind: input, shape index: {}]   ;;  %s7940_s10 = inlined_call_operand.hbm [shape: f32[2,32,128], index: 10, kind: output, shape index: {}]  }
   0x1   :  { %17 = vsyncpa [#allocation3 + $0x1], 0  ;;  %s6422_s13 = smov 0   ;;  %s6424_s14 = smov 0  }
   0x2   :  { %s6426_s15 = smov 0   ;;  %s6428_s16 = smov 0  }
   0x3 LB: > { %s6443_s17 = sadd.s32 4294967295, %s6350_s16   ;;  %s4459_s18 = sadd.s32 4294967294, %s6350_s16   ;;  %s6350_s16 = sphi %s6428_s16, %s8000_s16   ;;  %s6346_s15 = sphi %s6426_s15, %s7999_s15   ;;  %s6342_s14 = sphi %s6424_s14, %s7998_s14   ;;  %s6338_s13 = sphi %s6422_s13, %s7997_s13  }
   0x4   : > { %s6447_s19 = sadd.s32 1, %s6350_s16   ;;  %s250_s20 = sadd.s32 1, %s6346_s15 }
   0x5   : > { %s247_s21 = ssub.s32 %s6350_s16, %s6447_s19  ;;  %p260_p0 = scmp.ne.s32.totalorder %s6346_s15, %s6342_s14 }
   0x6   : > { %p248_p1 = scmp.eq.s32.totalorder %s247_s21, 0  ;;  %p261_p2 = scmp.eq.s32.totalorder %s6443_s17, 1 }
   0x7   : > { %p266_p3 = scmp.ne.s32.totalorder %s6342_s14, %s6338_s13  ;;  %p267_p4 = scmp.eq.s32.totalorder %s4459_s18, 1 }
   0x8   : > { %s6458_s22 = scalar_select %p248_p1, %s6346_s15, %s250_s20  }
   0x9   : > { %p6460_p5 = por %p261_p2, %p260_p0  ;;  %p6464_p6 = por %p267_p4, %p266_p3 }
   0xa   : > { %7951 = sst [smem:[#allocation5_spill]] %s6458_s22  ;;  %p4462_p7 = scmp.ge.s32.totalorder %s6350_s16, 1 }
   0xb   : > { %p325_p8 = scmp.lt.s32.totalorder %s6350_s16, 3 }
   0xd   : > { %p326_p9 = pnand %p4462_p7, %p325_p8 }
   0xf   : > { %329 = sbr.rel (%p326_p9) target bundleno = 3188 (0xc74), region = 60 }
  0x16   : > { %p368_p10 = scmp.lt.s32.totalorder %s6443_s17, 1  ;;  %v378_v0 = vld [vmem:[%s7932_s2] sm:$0xff]  ;;  %vm7949_vm0 = vcmask 261120   ;;  %v6352_v1 = vmov 0   ;;  %v384_v3 = vld [vmem:[%s7933_s3 + $0x10] sm:$0xff]  ;;  %v383_v4 = vld [vmem:[%s7933_s3 + $0x8] sm:$0xff] }
  0x17   : > { %5047 = vmatprep.mubr.msk.f32.mxu1 %vm7949_vm0, %v378_v0  ;;  %6002 = vset.pattern.permute.xlu0 %v6352_v1  ;;  %v382_v2 = vld [vmem:[%s7933_s3] sm:$0xff]  ;;  %v385_v5 = vld [vmem:[%s7933_s3 + $0x18] sm:$0xff]  ;;  %v379_v18 = vld [vmem:[%s7932_s2 + $0x8] sm:$0xff]  ;;  %vm7950_vm1 = vcmask 1043456   ;;  %vm7948_vm2 = vcmask 31744   ;;  %s6353_s22 = smov 124  }
  0x18   : > { %s369_s27 = scalar_select %p368_p10, %s6443_s17, 1  ;;  %6003 = vset.pattern.permute.xlu1 %v6352_v1  ;;  %532 = vperm.xlu0 %6002, %v382_v2   ;;  %v394_v14 = vld [vmem:[%s7935_s5] sm:$0xff]  ;;  %v380_v19 = vld [vmem:[%s7932_s2 + $0x10] sm:$0xff]  ;;  %v381_v21 = vld [vmem:[%s7932_s2 + $0x18] sm:$0xff]  ;;  %vm6357_vm3 = vmmov 0  }
  0x19   : > { %542 = vperm.xlu1 %6003, %v384_v3   ;;  %v386_v22 = vld [vmem:[%s7934_s4] sm:$0xff]  ;;  %v387_v23 = vld [vmem:[%s7934_s4 + $0x8] sm:$0xff]  ;;  %v388_v1 = vld [vmem:[%s7934_s4 + $0x10] sm:$0xff]  ;;  %s6355_s18 = smov 116   ;;  %s6361_s25 = smov 100  }
  0x1a   : > { %s4686_s12 = sshll.u32 %s369_s27, 5  ;;  %v389_v2 = vld [vmem:[%s7934_s4 + $0x18] sm:$0xff]  ;;  %v390_v3 = vld [vmem:[%s7934_s4 + $0x20] sm:$0xff]  ;;  %s6362_s30 = smov 104  }
  0x1b   : > { %s6488_s26 = scalar_lea.vmem %s7930_s0, %s4686_s12  ;;  %s377_s29 = scalar_lea.vmem %s7931_s1, %s4686_s12 }
  0x1c   : > { %v522_v6 = vld [vmem:[%s6488_s26] sm:$0xff]  ;;  %v523_v7 = vld [vmem:[%s6488_s26 + $0x8] sm:$0xff]  ;;  %v524_v8 = vld [vmem:[%s6488_s26 + $0x10] sm:$0xff]  ;;  %537 = vperm.xlu0 %6002, %v383_v4   ;;  %s6359_s12 = smov 108   ;;  %s6364_s28 = smov [#allocation2]  }
  0x1d   : > { %v5667_v9 = vpack.c.bf16 %v523_v7, %v522_v6  ;;  %v525_v10 = vld [vmem:[%s6488_s26 + $0x18] sm:$0xff]  ;;  %v526_v12 = vld [vmem:[%s377_s29] sm:$0xff]  ;;  %v527_v13 = vld [vmem:[%s377_s29 + $0x8] sm:$0xff]  ;;  %547 = vperm.xlu1 %6003, %v385_v5  }
  0x1e   : > { %v5671_v11 = vpack.c.bf16 %v525_v10, %v524_v8  ;;  %v5675_v15 = vpack.c.bf16 %v527_v13, %v526_v12  ;;  %v528_v16 = vld [vmem:[%s377_s29 + $0x10] sm:$0xff]  ;;  %v529_v17 = vld [vmem:[%s377_s29 + $0x18] sm:$0xff]  ;;  %v391_v5 = vld [vmem:[%s7934_s4 + $0x28] sm:$0xff]  ;;  %s6356_s29 = smov 120  }
  0x1f   : > { %5668 = vmatprep.subr.bf16.mxu1 %v5667_v9  ;;  %v5679_v20 = vpack.c.bf16 %v529_v17, %v528_v16 }
  0x20   : > { %5670 = vmatpush3.bf16.msra.mxu1 %v5667_v9  ;;  %650 = vperm.xlu0 %6002, %v394_v14  }
  0x21   : > { %5672 = vmatprep.subr.bf16.mxu1 %v5671_v11 }
  0x24   : > { %5674 = vmatpush3.bf16.msra.mxu1 %v5671_v11 }
  0x25   : > { %5676 = vmatprep.subr.bf16.mxu1 %v5675_v15 }
  0x27   : > { %5048 = vmatmul.mubr.msk.f32.vlgmr.msra.gmra.mrb[0].mxu1 %vm7949_vm0, %v379_v18 }
  0x28   : > { %5678 = vmatpush3.bf16.msra.mxu1 %v5675_v15  ;;  %5050 = vmatprep.mubr.msk.f32.mxu1 %vm7949_vm0, %v380_v19 }
  0x29   : > { %5680 = vmatprep.subr.bf16.mxu1 %v5679_v20 }
  0x2b   : > { %5051 = vmatmul.mubr.msk.f32.gmra.mrb[2].mxu1 %vm7949_vm0, %v381_v21 }
  0x2c   : > { %5682 = vmatpush3.bf16.msra.mxu1 %v5679_v20  ;;  %5061 = vmatprep.mubr.msk.f32.mxu1 %vm7949_vm0, %v386_v22 }
  0x2f   : > { %5062 = vmatmul.mubr.msk.f32.vlgmr.msra.gmra.mrb[4].mxu1 %vm7949_vm0, %v387_v23  ;;  %v7944_v23 = vmov 0.0|0.0  }
  0x30   : > { %5064 = vmatprep.mubr.msk.f32.mxu1 %vm7949_vm0, %v388_v1  ;;  %5683 = vmatprep.subr.bf16.mxu1 %v7944_v23 }
  0x33   : > { %5065 = vmatmul.mubr.msk.f32.gmra.mrb[6].mxu1 %vm7949_vm0, %v389_v2 }
  0x34   : > { %5067 = vmatprep.mubr.msk.f32.mxu1 %vm7949_vm0, %v390_v3 }
  0x37   : > { %5068 = vmatmul.mubr.msk.f32.gmra.mrb[8].mxu1 %vm7949_vm0, %v391_v5 }
  0x97   : > { %v533_v24 = vpop.permute.xlu0 %532 }
  0x98   : > { %v543_v30 = vpop.permute.xlu1 %542 }
  0x9b   : > { %v538_v28 = vpop.permute.xlu0 %537 }
  0x9c   : > { %v548_v38 = vpop.permute.xlu1 %547 }
  0x9f   : > { %v651_v35 = vpop.permute.xlu0 %650 }
  0xfa   : > { %v5049_v25 = vpop.f32.mrb[0].mxu1 }
  0xfb   : > { %v629_v26 = vpop.f32.mrb[1].mxu1  ;;  %v635_v32 = vadd.f32 %v5049_v25, %v538_v28 }
  0xfc   : > { %v630_v27 = vadd.f32 %v629_v26, %v533_v24 }
  0xfe   : > { %817 = vxpose.xlu1.b32.start [1/4] (short) %v630_v27, 128  ;;  %v5052_v29 = vpop.f32.mrb[2].mxu1 }
  0xff   : > { %v639_v31 = vpop.f32.mrb[3].mxu1  ;;  %v645_v40 = vadd.f32 %v5052_v29, %v548_v38 }
 0x100   : > { %v640_v33 = vadd.f32 %v639_v31, %v543_v30 }
 0x102   : > { %v6523_v34 = vpop.f32.mrb[4].mxu1  ;;  %818 = vxpose.xlu1.b32.cont [2/4] (short) %v635_v32, 128 }
 0x103   : > { %v778_v36 = vpop.f32.mrb[5].mxu1 }
 0x104   : > { %v779_v37 = vadd.f32 %v778_v36, %v651_v35 }
 0x106   : > { %v1237_v39 = vrot.slane %v779_v37, 4  ;;  %5073 = vmatprep.subr.msk.mxu0 %vm7950_vm1, %v779_v37  ;;  %819 = vxpose.xlu1.b32.cont [3/4] (short) %v640_v33, 128 }
 0x107   : > { %5074 = vmatpush3.msk.msra.mxu0 %vm7950_vm1, %v779_v37 }
 0x108   : > { %5134 = vmatprep.subr.msk.mxu0 %vm7950_vm1, %v1237_v39 }
 0x10a   : > { %820 = vxpose.xlu1.b32.end [4/4] (short) %v645_v40, 128 }
 0x17e   : > { %v6528_v41 = vpop.trf.xlu1 }
 0x17f   : > { %5075 = vmatprep.mubr.msk.f32.mxu0 %vm7948_vm2, %v6528_v41  ;;  %1205 = vrot.lane.b32.xlu0 %v6528_v41, %s6353_s22 }
 0x182   : > { %v6534_v42 = vpop.trf.xlu1 }
 0x183   : > { %5076 = vmatmul.mubr.msk.f32.vlgmr.msra.gmra.mrb[0].mxu0 %vm7948_vm2, %v6534_v42  ;;  %1207 = vrot.lane.b32.xlu0 %v6534_v42, %s6353_s22 }
 0x184   : > { %5135 = vmatpush3.msk.msra.mxu0 %vm7950_vm1, %v1237_v39 }
 0x185   : > { %5707 = vmatprep.subr.bf16.mxu0 %v7944_v23 }
 0x186   : > { %v6541_v43 = vpop.trf.xlu1 }
 0x187   : > { %5078 = vmatprep.mubr.msk.f32.mxu0 %vm7948_vm2, %v6541_v43  ;;  %1209 = vrot.lane.b32.xlu0 %v6541_v43, %s6353_s22 }
 0x18a   : > { %v6547_v44 = vpop.trf.xlu1 }
 0x18b   : > { %5079 = vmatmul.mubr.msk.f32.gmra.mrb[2].mxu0 %vm7948_vm2, %v6547_v44  ;;  %1211 = vrot.lane.b32.xlu0 %v6547_v44, %s6353_s22 }
 0x18e   : > { %v6553_v45 = vpop.trf.xlu1 }
 0x18f   : > { %5081 = vmatprep.mubr.msk.f32.mxu0 %vm7948_vm2, %v6553_v45  ;;  %1213 = vrot.lane.b32.xlu0 %v6553_v45, %s6353_s22 }
 0x192   : > { %v6559_v46 = vpop.trf.xlu1 }
 0x193   : > { %5082 = vmatmul.mubr.msk.f32.gmra.mrb[4].mxu0 %vm7948_vm2, %v6559_v46  ;;  %1215 = vrot.lane.b32.xlu0 %v6559_v46, %s6353_s22 }
 0x196   : > { %v6565_v47 = vpop.trf.xlu1 }
 0x197   : > { %5084 = vmatprep.mubr.msk.f32.mxu0 %vm7948_vm2, %v6565_v47  ;;  %1217 = vrot.lane.b32.xlu0 %v6565_v47, %s6353_s22 }
 0x19a   : > { %v6571_v48 = vpop.trf.xlu1 }
 0x19b   : > { %5085 = vmatmul.mubr.msk.f32.gmra.mrb[6].mxu0 %vm7948_vm2, %v6571_v48  ;;  %1219 = vrot.lane.b32.xlu0 %v6571_v48, %s6353_s22 }
 0x19e   : > { %v6577_v49 = vpop.trf.xlu1 }
 0x19f   : > { %5087 = vmatprep.mubr.msk.f32.mxu0 %vm7948_vm2, %v6577_v49  ;;  %1221 = vrot.lane.b32.xlu0 %v6577_v49, %s6353_s22 }
 0x1a2   : > { %v6583_v50 = vpop.trf.xlu1 }
 0x1a3   : > { %5088 = vmatmul.mubr.msk.f32.gmra.mrb[8].mxu0 %vm7948_vm2, %v6583_v50  ;;  %1223 = vrot.lane.b32.xlu0 %v6583_v50, %s6353_s22 }
 0x1a6   : > { %v6589_v51 = vpop.trf.xlu1 }
 0x1a7   : > { %1225 = vrot.lane.b32.xlu0 %v6589_v51, %s6353_s22  ;;  %5090 = vmatprep.mubr.msk.f32.mxu0 %vm7948_vm2, %v6589_v51 }
 0x1aa   : > { %v6595_v52 = vpop.trf.xlu1 }
 0x1ab   : > { %5091 = vmatmul.mubr.msk.f32.gmra.mrb[10].mxu0 %vm7948_vm2, %v6595_v52  ;;  %1227 = vrot.lane.b32.xlu0 %v6595_v52, %s6353_s22 }
 0x1ae   : > { %v6601_v53 = vpop.trf.xlu1 }
 0x1af   : > { %5093 = vmatprep.mubr.msk.f32.mxu0 %vm7948_vm2, %v6601_v53  ;;  %1229 = vrot.lane.b32.xlu0 %v6601_v53, %s6353_s22 }
 0x1b2   : > { %v6607_v54 = vpop.trf.xlu1 }
 0x1b3   : > { %5094 = vmatmul.mubr.msk.f32.gmra.mrb[12].mxu0 %vm7948_vm2, %v6607_v54  ;;  %1231 = vrot.lane.b32.xlu1 %v6607_v54, %s6353_s22 }
 0x1b6   : > { %v6613_v55 = vpop.trf.xlu1 }
 0x1b7   : > { %1233 = vrot.lane.b32.xlu0 %v6613_v55, %s6353_s22  ;;  %5096 = vmatprep.mubr.msk.f32.mxu0 %vm7948_vm2, %v6613_v55 }
 0x1ba   : > { %v6619_v56 = vpop.trf.xlu1 }
 0x1bb   : > { %1235 = vrot.lane.b32.xlu0 %v6619_v56, %s6353_s22  ;;  %5097 = vmatmul.mubr.msk.f32.gmra.mrb[14].mxu0 %vm7948_vm2, %v6619_v56 }
 0x1f1   : > { %v1206_v57 = vpop.permute.xlu0 %1205 }
 0x1f2   : > { %5136 = vmatprep.mubr.msk.f32.mxu0 %vm7948_vm2, %v1206_v57 }
 0x1f5   : > { %v1208_v58 = vpop.permute.xlu0 %1207 }
 0x1f6   : > { %5137 = vmatmul.mubr.msk.f32.vlgmr.msra.gmra.mrb[16].mxu0 %vm7948_vm2, %v1208_v58 }
 0x1f9   : > { %v1210_v59 = vpop.permute.xlu0 %1209 }
 0x1fa   : > { %5139 = vmatprep.mubr.msk.f32.mxu0 %vm7948_vm2, %v1210_v59 }
 0x1fd   : > { %v1212_v60 = vpop.permute.xlu0 %1211 }
 0x1fe   : > { %5140 = vmatmul.mubr.msk.f32.gmra.mrb[18].mxu0 %vm7948_vm2, %v1212_v60 }
 0x201   : > { %v1214_v61 = vpop.permute.xlu0 %1213 }
 0x202   : > { %5142 = vmatprep.mubr.msk.f32.mxu0 %vm7948_vm2, %v1214_v61 }
 0x205   : > { %v1216_v62 = vpop.permute.xlu0 %1215 }
 0x206   : > { %5143 = vmatmul.mubr.msk.f32.gmra.mrb[20].mxu0 %vm7948_vm2, %v1216_v62 }
 0x209   : > { %v1218_v63 = vpop.permute.xlu0 %1217 }
 0x20a   : > { %5145 = vmatprep.mubr.msk.f32.mxu0 %vm7948_vm2, %v1218_v63 }
 0x20d   : > { %v1220_v0 = vpop.permute.xlu0 %1219 }
 0x20e   : > { %5146 = vmatmul.mubr.msk.f32.gmra.mrb[22].mxu0 %vm7948_vm2, %v1220_v0 }
 0x211   : > { %v1222_v4 = vpop.permute.xlu0 %1221 }
 0x212   : > { %5148 = vmatprep.mubr.msk.f32.mxu0 %vm7948_vm2, %v1222_v4 }
 0x215   : > { %v1224_v6 = vpop.permute.xlu0 %1223 }
 0x216   : > { %5149 = vmatmul.mubr.msk.f32.gmra.mrb[24].mxu0 %vm7948_vm2, %v1224_v6 }
 0x219   : > { %v1226_v7 = vpop.permute.xlu0 %1225 }
 0x21a   : > { %5151 = vmatprep.mubr.msk.f32.mxu0 %vm7948_vm2, %v1226_v7 }
 0x21d   : > { %v1228_v8 = vpop.permute.xlu0 %1227 }
 0x21e   : > { %5152 = vmatmul.mubr.msk.f32.gmra.mrb[26].mxu0 %vm7948_vm2, %v1228_v8 }
 0x221   : > { %v1230_v9 = vpop.permute.xlu0 %1229 }
 0x222   : > { %5154 = vmatprep.mubr.msk.f32.mxu0 %vm7948_vm2, %v1230_v9 }
 0x225   : > { %v1232_v10 = vpop.permute.xlu1 %1231 }
 0x226   : > { %5155 = vmatmul.mubr.msk.f32.gmra.mrb[28].mxu0 %vm7948_vm2, %v1232_v10 }
 0x229   : > { %v1234_v11 = vpop.permute.xlu0 %1233 }
 0x22a   : > { %5157 = vmatprep.mubr.msk.f32.mxu0 %vm7948_vm2, %v1234_v11 }
 0x22d   : > { %v1236_v12 = vpop.permute.xlu0 %1235 }
 0x22e   : > { %5158 = vmatmul.mubr.msk.f32.gmra.mrb[30].mxu0 %vm7948_vm2, %v1236_v12 }
 0x256   : > { %v5077_v13 = vpop.f32.mrb[0].mxu0 }
 0x257   : > { %v968_v14 = vpop.f32.mrb[1].mxu0  ;;  %1049 = vmax.xlane.f32.xlu0 %v5077_v13 }
 0x25b   : > { %1047 = vmax.xlane.f32.xlu0 %v968_v14 }
 0x25e   : > { %v5080_v15 = vpop.f32.mrb[2].mxu0 }
 0x25f   : > { %v6657_v16 = vpop.f32.mrb[3].mxu0  ;;  %1053 = vmax.xlane.f32.xlu0 %v5080_v15 }
 0x263   : > { %1051 = vmax.xlane.f32.xlu0 %v6657_v16 }
 0x266   : > { %v6660_v17 = vpop.f32.mrb[4].mxu0 }
 0x267   : > { %v6662_v18 = vpop.f32.mrb[5].mxu0  ;;  %1057 = vmax.xlane.f32.xlu1 %v6660_v17 }
 0x268   : > { %1055 = vmax.xlane.f32.xlu0 %v6662_v18 }
 0x26e   : > { %v6666_v19 = vpop.f32.mrb[6].mxu0 }
 0x26f   : > { %v6668_v20 = vpop.f32.mrb[7].mxu0  ;;  %1061 = vmax.xlane.f32.xlu0 %v6666_v19 }
 0x273   : > { %1059 = vmax.xlane.f32.xlu0 %v6668_v20 }
 0x276   : > { %v6672_v21 = vpop.f32.mrb[8].mxu0 }
 0x277   : > { %v6674_v22 = vpop.f32.mrb[9].mxu0  ;;  %1065 = vmax.xlane.f32.xlu0 %v6672_v21 }
 0x27b   : > { %1063 = vmax.xlane.f32.xlu0 %v6674_v22 }
 0x27e   : > { %v6680_v24 = vpop.f32.mrb[10].mxu0 }
 0x27f   : > { %v6682_v25 = vpop.f32.mrb[11].mxu0  ;;  %1069 = vmax.xlane.f32.xlu1 %v6680_v24 }
 0x280   : > { %1067 = vmax.xlane.f32.xlu0 %v6682_v25 }
 0x286   : > { %v6686_v26 = vpop.f32.mrb[12].mxu0 }
 0x287   : > { %1073 = vmax.xlane.f32.xlu1 %v6686_v26  ;;  %v6689_v27 = vpop.f32.mrb[13].mxu0 }
 0x28e   : > { %v6691_v28 = vpop.f32.mrb[14].mxu0 }
 0x28f   : > { %v6693_v29 = vpop.f32.mrb[15].mxu0 }
 0x2c9   : > { %v6695_v30 = vpop.f32.mrb[16].mxu0 }
 0x2ca   : > { %v6697_v31 = vpop.f32.mrb[17].mxu0  ;;  %1419 = vmax.xlane.f32.xlu0 %v6695_v30 }
 0x2ce   : > { %1417 = vmax.xlane.f32.xlu0 %v6697_v31 }
 0x2d1   : > { %v6701_v32 = vpop.f32.mrb[18].mxu0 }
 0x2d2   : > { %v6703_v33 = vpop.f32.mrb[19].mxu0  ;;  %1423 = vmax.xlane.f32.xlu0 %v6701_v32 }
 0x2d6   : > { %1421 = vmax.xlane.f32.xlu0 %v6703_v33 }
 0x2d9   : > { %v6707_v35 = vpop.f32.mrb[20].mxu0 }
 0x2da   : > { %v6709_v36 = vpop.f32.mrb[21].mxu0  ;;  %1427 = vmax.xlane.f32.xlu0 %v6707_v35 }
 0x2de   : > { %1425 = vmax.xlane.f32.xlu0 %v6709_v36 }
 0x2e1   : > { %v6713_v37 = vpop.f32.mrb[22].mxu0 }
 0x2e2   : > { %v6715_v38 = vpop.f32.mrb[23].mxu0  ;;  %1431 = vmax.xlane.f32.xlu0 %v6713_v37 }
 0x2e4   : > { %v1050_v39 = vpop.xlane.xlu0 %1049 }
 0x2e5   : > { %v1080_v40 = vsub.f32 %v5077_v13, %v1050_v39 }
 0x2e6   : > { %1429 = vmax.xlane.f32.xlu0 %v6715_v38 }
 0x2e7   : > { %v1097_v57 = vmul.f32 1.442695, %v1080_v40 }
 0x2e8   : > { %v1048_v58 = vpop.xlane.xlu0 %1047 }
 0x2e9   : > { %v1079_v59 = vsub.f32 %v968_v14, %v1048_v58  ;;  %v6719_v60 = vpop.f32.mrb[24].mxu0  ;;  %6004 = vpow2.f32 %v1097_v57 }
 0x2ea   : > { %v6721_v61 = vpop.f32.mrb[25].mxu0  ;;  %1435 = vmax.xlane.f32.xlu0 %v6719_v60 }
 0x2eb   : > { %v1095_v62 = vmul.f32 1.442695, %v1079_v59 }
 0x2ec   : > { %v1054_v63 = vpop.xlane.xlu0 %1053 }
 0x2ed   : > { %6006 = vpow2.f32 %v1095_v62  ;;  %v1082_v0 = vsub.f32 %v5080_v15, %v1054_v63 }
 0x2ee   : > { %1433 = vmax.xlane.f32.xlu0 %v6721_v61 }
 0x2ef   : > { %v1101_v1 = vmul.f32 1.442695, %v1082_v0 }
 0x2f0   : > { %v1052_v2 = vpop.xlane.xlu0 %1051 }
 0x2f1   : > { %v1081_v3 = vsub.f32 %v6657_v16, %v1052_v2  ;;  %v6726_v4 = vpop.f32.mrb[26].mxu0  ;;  %6008 = vpow2.f32 %v1101_v1 }
 0x2f2   : > { %1439 = vmax.xlane.f32.xlu1 %v6726_v4  ;;  %1071 = vmax.xlane.f32.xlu0 %v6689_v27  ;;  %v6730_v5 = vpop.f32.mrb[27].mxu0 }
 0x2f3   : > { %v1099_v6 = vmul.f32 1.442695, %v1081_v3  ;;  %v6005_v10 = vpop.eup %6004 }
 0x2f4   : > { %v1058_v7 = vpop.xlane.xlu1 %1057 }
 0x2f5   : > { %6010 = vpow2.f32 %v1099_v6  ;;  %v1084_v8 = vsub.f32 %v6660_v17, %v1058_v7  ;;  %v1056_v9 = vpop.xlane.xlu0 %1055 }
 0x2f6   : > { %v1083_v11 = vsub.f32 %v6662_v18, %v1056_v9  ;;  %1077 = vmax.xlane.f32.xlu1 %v6691_v28  ;;  %1437 = vmax.xlane.f32.xlu0 %v6730_v5 }
 0x2f7   : > { %v6007_v12 = vpop.eup %6006  ;;  %v1105_v13 = vmul.f32 1.442695, %v1084_v8 }
 0x2f8   : > { %v1103_v14 = vmul.f32 1.442695, %v1083_v11  ;;  %v5684_v15 = vpack.c.bf16 %v6005_v10, %v6007_v12 }
 0x2f9   : > { %6012 = vpow2.f32 %v1105_v13  ;;  %v6736_v16 = vpop.f32.mrb[28].mxu0 }
 0x2fa   : > { %6014 = vpow2.f32 %v1103_v14  ;;  %1075 = vmax.xlane.f32.xlu0 %v6693_v29  ;;  %5685 = vmatpush3.bf16.xpose.msra.mxu1 %v5684_v15  ;;  %v6739_v17 = vpop.f32.mrb[29].mxu0 }
 0x2fb   : > { %1443 = vmax.xlane.f32.xlu1 %v6736_v16  ;;  %5686 = vmatprep.subr.bf16.mxu1 %v7944_v23  ;;  %v6009_v40 = vpop.eup %6008 }
 0x2fc   : > { %v1062_v18 = vpop.xlane.xlu0 %1061 }
 0x2fd   : > { %v1086_v39 = vsub.f32 %v6666_v19, %v1062_v18 }
 0x2fe   : > { %1441 = vmax.xlane.f32.xlu0 %v6739_v17 }
 0x2ff   : > { %v6011_v57 = vpop.eup %6010  ;;  %v1109_v58 = vmul.f32 1.442695, %v1086_v39 }
 0x300   : > { %v1060_v59 = vpop.xlane.xlu0 %1059  ;;  %v5687_v62 = vpack.c.bf16 %v6009_v40, %v6011_v57 }
 0x301   : > { %v1085_v63 = vsub.f32 %v6668_v20, %v1060_v59  ;;  %v6746_v0 = vpop.f32.mrb[30].mxu0  ;;  %6016 = vpow2.f32 %v1109_v58 }
 0x302   : > { %5688 = vmatpush3.bf16.xpose.msra.mxu1 %v5687_v62  ;;  %1447 = vmax.xlane.f32.xlu1 %v6746_v0  ;;  %v6749_v1 = vpop.f32.mrb[31].mxu0 }
 0x303   : > { %v6013_v2 = vpop.eup %6012  ;;  %v1107_v3 = vmul.f32 1.442695, %v1085_v63  ;;  %1445 = vmax.xlane.f32.xlu0 %v6749_v1  ;;  %5689 = vmatprep.subr.bf16.mxu1 %v7944_v23 }
 0x304   : > { %v6015_v19 = vpop.eup %6014  ;;  %v1066_v6 = vpop.xlane.xlu0 %1065 }
 0x305   : > { %6018 = vpow2.f32 %v1107_v3  ;;  %v1088_v7 = vsub.f32 %v6672_v21, %v1066_v6  ;;  %v5690_v20 = vpack.c.bf16 %v6013_v2, %v6015_v19  ;;  %v392_v19 = vld [vmem:[%s7934_s4 + $0x30] sm:$0xff] }
 0x306   : > { %5070 = vmatprep.mubr.msk.f32.mxu1 %vm7949_vm0, %v392_v19 }
 0x307   : > { %v1113_v8 = vmul.f32 1.442695, %v1088_v7  ;;  %v393_v7 = vld [vmem:[%s7934_s4 + $0x38] sm:$0xff] }
 0x308   : > { %v1064_v9 = vpop.xlane.xlu0 %1063  ;;  %5071 = vmatmul.mubr.msk.f32.gmra.mrb[10].mxu1 %vm7949_vm0, %v393_v7 }
 0x309   : > { %v1087_v10 = vsub.f32 %v6674_v22, %v1064_v9  ;;  %6020 = vpow2.f32 %v1113_v8  ;;  %v395_v22 = vld [vmem:[%s7935_s5 + $0x8] sm:$0xff]  ;;  %v7942_v9 = vmov 0.0  }
 0x30a   : > { %5691 = vmatpush3.bf16.xpose.msra.mxu1 %v5690_v20  ;;  %5131 = vmatprep.mubr.msk.f32.mxu1 %vm6357_vm3, %v7942_v9 }
 0x30b   : > { %v1111_v11 = vmul.f32 1.442695, %v1087_v10  ;;  %5692 = vmatprep.subr.bf16.mxu1 %v7944_v23  ;;  %v6017_v15 = vpop.eup %6016  ;;  %5192 = vmatprep.mubr.msk.f32.mxu0 %vm6357_vm3, %v7942_v9 }
 0x30c   : > { %v1070_v12 = vpop.xlane.xlu1 %1069 }
 0x30d   : > { %6022 = vpow2.f32 %v1111_v11  ;;  %v1090_v13 = vsub.f32 %v6680_v24, %v1070_v12  ;;  %v1068_v14 = vpop.xlane.xlu0 %1067  ;;  %v398_v24 = vld [vmem:[%s7935_s5 + $0x20] sm:$0xff] }
 0x30e   : > { %v1089_v18 = vsub.f32 %v6682_v25, %v1068_v14  ;;  %v6765_v25 = vpop.f32.mrb[6].mxu1 }
 0x30f   : > { %v6019_v39 = vpop.eup %6018  ;;  %v1117_v21 = vmul.f32 1.442695, %v1090_v13  ;;  %7954 = vst [vmem:[#allocation6_spill] sm:$0xff] %v6765_v25  ;;  %v6769_v62 = vpop.f32.mrb[7].mxu1 }
 0x310   : > { %v1115_v40 = vmul.f32 1.442695, %v1089_v18  ;;  %v5693_v57 = vpack.c.bf16 %v6017_v15, %v6019_v39  ;;  %v6771_v2 = vpop.f32.mrb[8].mxu1 }
 0x311   : > { %6024 = vpow2.f32 %v1117_v21  ;;  %v6773_v3 = vpop.f32.mrb[9].mxu1 }
 0x312   : > { %6026 = vpow2.f32 %v1115_v40  ;;  %5694 = vmatpush3.bf16.xpose.msra.mxu1 %v5693_v57 }
 0x313   : > { %655 = vperm.xlu1 %6003, %v395_v22   ;;  %5695 = vmatprep.subr.bf16.mxu1 %v7944_v23  ;;  %v6021_v58 = vpop.eup %6020 }
 0x317   : > { %v6023_v59 = vpop.eup %6022  ;;  %1948 = vrot.lane.b32.xlu1 %v6528_v41, %s6355_s18 }
 0x318   : > { %v5696_v63 = vpack.c.bf16 %v6021_v58, %v6023_v59 }
 0x319   : > { %670 = vperm.xlu0 %6002, %v398_v24  }
 0x31a   : > { %5697 = vmatpush3.bf16.xpose.msra.mxu1 %v5696_v63 }
 0x31b   : > { %v6025_v6 = vpop.eup %6024  ;;  %1950 = vrot.lane.b32.xlu1 %v6534_v42, %s6355_s18  ;;  %5698 = vmatprep.subr.bf16.mxu1 %v7944_v23 }
 0x31c   : > { %v6027_v20 = vpop.eup %6026 }
 0x31d   : > { %1578 = vrot.lane.b32.xlu0 %v6528_v41, %s6356_s29  ;;  %v5699_v8 = vpack.c.bf16 %v6025_v6, %v6027_v20 }
 0x31f   : > { %1580 = vrot.lane.b32.xlu1 %v6534_v42, %s6356_s29 }
 0x321   : > { %1952 = vrot.lane.b32.xlu0 %v6541_v43, %s6355_s18 }
 0x322   : > { %5700 = vmatpush3.bf16.xpose.msra.mxu1 %v5699_v8 }
 0x323   : > { %1954 = vrot.lane.b32.xlu1 %v6547_v44, %s6355_s18  ;;  %5701 = vmatprep.subr.bf16.mxu1 %v7944_v23 }
 0x325   : > { %1582 = vrot.lane.b32.xlu0 %v6541_v43, %s6356_s29 }
 0x327   : > { %1584 = vrot.lane.b32.xlu1 %v6547_v44, %s6356_s29 }
 0x329   : > { %1956 = vrot.lane.b32.xlu0 %v6553_v45, %s6355_s18 }
 0x32b   : > { %1958 = vrot.lane.b32.xlu1 %v6559_v46, %s6355_s18 }
 0x32d   : > { %1586 = vrot.lane.b32.xlu0 %v6553_v45, %s6356_s29 }
 0x32f   : > { %1588 = vrot.lane.b32.xlu1 %v6559_v46, %s6356_s29 }
 0x331   : > { %1960 = vrot.lane.b32.xlu0 %v6565_v47, %s6355_s18 }
 0x333   : > { %1962 = vrot.lane.b32.xlu1 %v6571_v48, %s6355_s18 }
 0x335   : > { %1590 = vrot.lane.b32.xlu0 %v6565_v47, %s6356_s29 }
 0x337   : > { %1592 = vrot.lane.b32.xlu1 %v6571_v48, %s6356_s29 }
 0x339   : > { %1964 = vrot.lane.b32.xlu0 %v6577_v49, %s6355_s18 }
 0x33b   : > { %1966 = vrot.lane.b32.xlu1 %v6583_v50, %s6355_s18 }
 0x33d   : > { %1594 = vrot.lane.b32.xlu0 %v6577_v49, %s6356_s29 }
 0x33f   : > { %1596 = vrot.lane.b32.xlu1 %v6583_v50, %s6356_s29 }
 0x341   : > { %1968 = vrot.lane.b32.xlu0 %v6589_v51, %s6355_s18 }
 0x343   : > { %1970 = vrot.lane.b32.xlu1 %v6595_v52, %s6355_s18 }
 0x345   : > { %1598 = vrot.lane.b32.xlu0 %v6589_v51, %s6356_s29 }
 0x347   : > { %1600 = vrot.lane.b32.xlu1 %v6595_v52, %s6356_s29 }
 0x349   : > { %1972 = vrot.lane.b32.xlu0 %v6601_v53, %s6355_s18 }
 0x34b   : > { %1974 = vrot.lane.b32.xlu1 %v6607_v54, %s6355_s18 }
 0x34d   : > { %1602 = vrot.lane.b32.xlu0 %v6601_v53, %s6356_s29 }
 0x34f   : > { %1604 = vrot.lane.b32.xlu1 %v6607_v54, %s6356_s29 }
 0x351   : > { %1976 = vrot.lane.b32.xlu0 %v6613_v55, %s6355_s18 }
 0x353   : > { %1978 = vrot.lane.b32.xlu1 %v6619_v56, %s6355_s18  ;;  %s6360_s18 = smov 112  }
 0x355   : > { %1606 = vrot.lane.b32.xlu0 %v6613_v55, %s6356_s29 }
 0x357   : > { %v1420_v10 = vpop.xlane.xlu0 %1419  ;;  %1608 = vrot.lane.b32.xlu1 %v6619_v56, %s6356_s29 }
 0x358   : > { %v1450_v11 = vsub.f32 %v6695_v30, %v1420_v10 }
 0x35a   : > { %v1467_v12 = vmul.f32 1.442695, %v1450_v11 }
 0x35b   : > { %v1418_v13 = vpop.xlane.xlu0 %1417 }
 0x35c   : > { %v1449_v14 = vsub.f32 %v6697_v31, %v1418_v13  ;;  %6028 = vpow2.f32 %v1467_v12 }
 0x35e   : > { %v1465_v15 = vmul.f32 1.442695, %v1449_v14  ;;  %v1074_v14 = vpop.xlane.xlu1 %1073 }
 0x35f   : > { %v1424_v18 = vpop.xlane.xlu0 %1423 }
 0x360   : > { %6030 = vpow2.f32 %v1465_v15  ;;  %v1452_v39 = vsub.f32 %v6701_v32, %v1424_v18 }
 0x362   : > { %v1471_v21 = vmul.f32 1.442695, %v1452_v39 }
 0x363   : > { %v1422_v40 = vpop.xlane.xlu0 %1421 }
 0x364   : > { %v1451_v57 = vsub.f32 %v6703_v33, %v1422_v40  ;;  %6032 = vpow2.f32 %v1471_v21 }
 0x366   : > { %v1469_v22 = vmul.f32 1.442695, %v1451_v57  ;;  %v6029_v24 = vpop.eup %6028 }
 0x367   : > { %v1428_v58 = vpop.xlane.xlu0 %1427 }
 0x368   : > { %6034 = vpow2.f32 %v1469_v22  ;;  %v1454_v30 = vsub.f32 %v6707_v35, %v1428_v58 }
 0x36a   : > { %v6031_v59 = vpop.eup %6030  ;;  %v1475_v63 = vmul.f32 1.442695, %v1454_v30 }
 0x36b   : > { %v1426_v31 = vpop.xlane.xlu0 %1425  ;;  %v5708_v19 = vpack.c.bf16 %v6029_v24, %v6031_v59 }
 0x36c   : > { %v1453_v6 = vsub.f32 %v6709_v36, %v1426_v31  ;;  %6036 = vpow2.f32 %v1475_v63 }
 0x36d   : > { %5709 = vmatpush3.bf16.xpose.msra.mxu0 %v5708_v19 }
 0x36e   : > { %v1473_v7 = vmul.f32 1.442695, %v1453_v6  ;;  %5710 = vmatprep.subr.bf16.mxu0 %v7944_v23  ;;  %v6033_v20 = vpop.eup %6032 }
 0x36f   : > { %v1432_v32 = vpop.xlane.xlu0 %1431 }
 0x370   : > { %6038 = vpow2.f32 %v1473_v7  ;;  %v1456_v33 = vsub.f32 %v6713_v37, %v1432_v32  ;;  %v1092_v37 = vsub.f32 %v6686_v26, %v1074_v14 }
 0x372   : > { %v6035_v8 = vpop.eup %6034  ;;  %v1479_v10 = vmul.f32 1.442695, %v1456_v33  ;;  %v1121_v58 = vmul.f32 1.442695, %v1092_v37 }
 0x373   : > { %v1430_v35 = vpop.xlane.xlu0 %1429  ;;  %v5711_v11 = vpack.c.bf16 %v6033_v20, %v6035_v8 }
 0x374   : > { %v1455_v12 = vsub.f32 %v6715_v38, %v1430_v35  ;;  %6040 = vpow2.f32 %v1479_v10 }
 0x375   : > { %5712 = vmatpush3.bf16.xpose.msra.mxu0 %v5711_v11 }
 0x376   : > { %v1477_v13 = vmul.f32 1.442695, %v1455_v12  ;;  %5713 = vmatprep.subr.bf16.mxu0 %v7944_v23  ;;  %v6037_v18 = vpop.eup %6036 }
 0x377   : > { %v1436_v36 = vpop.xlane.xlu0 %1435 }
 0x378   : > { %6042 = vpow2.f32 %v1477_v13  ;;  %v1458_v15 = vsub.f32 %v6719_v60, %v1436_v36 }
 0x37a   : > { %v6039_v39 = vpop.eup %6038  ;;  %v1483_v21 = vmul.f32 1.442695, %v1458_v15 }
 0x37b   : > { %v1434_v40 = vpop.xlane.xlu0 %1433  ;;  %v5714_v57 = vpack.c.bf16 %v6037_v18, %v6039_v39 }
 0x37c   : > { %v1457_v22 = vsub.f32 %v6721_v61, %v1434_v40  ;;  %6044 = vpow2.f32 %v1483_v21 }
 0x37d   : > { %5715 = vmatpush3.bf16.xpose.msra.mxu0 %v5714_v57 }
 0x37e   : > { %v1481_v38 = vmul.f32 1.442695, %v1457_v22  ;;  %5716 = vmatprep.subr.bf16.mxu0 %v7944_v23  ;;  %v6041_v63 = vpop.eup %6040 }
 0x37f   : > { %v1072_v30 = vpop.xlane.xlu0 %1071  ;;  %v1440_v24 = vpop.xlane.xlu1 %1439 }
 0x380   : > { %6046 = vpow2.f32 %v1481_v38  ;;  %v1091_v60 = vsub.f32 %v6689_v27, %v1072_v30  ;;  %v1460_v59 = vsub.f32 %v6726_v4, %v1440_v24 }
 0x381   : > { %6048 = vpow2.f32 %v1121_v58 }
 0x382   : > { %v6043_v26 = vpop.eup %6042  ;;  %v1119_v31 = vmul.f32 1.442695, %v1091_v60  ;;  %v1487_v19 = vmul.f32 1.442695, %v1460_v59 }
 0x383   : > { %v1438_v6 = vpop.xlane.xlu0 %1437  ;;  %v1078_v61 = vpop.xlane.xlu1 %1077  ;;  %v5717_v7 = vpack.c.bf16 %v6041_v63, %v6043_v26 }
 0x384   : > { %6050 = vpow2.f32 %v1119_v31  ;;  %v1459_v32 = vsub.f32 %v6730_v5, %v1438_v6  ;;  %v1094_v33 = vsub.f32 %v6691_v28, %v1078_v61 }
 0x385   : > { %5718 = vmatpush3.bf16.xpose.msra.mxu0 %v5717_v7  ;;  %6052 = vpow2.f32 %v1487_v19 }
 0x386   : > { %v1485_v20 = vmul.f32 1.442695, %v1459_v32  ;;  %5719 = vmatprep.subr.bf16.mxu0 %v7944_v23  ;;  %v1125_v27 = vmul.f32 1.442695, %v1094_v33  ;;  %v6045_v35 = vpop.eup %6044 }
 0x387   : > { %v1076_v4 = vpop.xlane.xlu0 %1075 }
 0x388   : > { %6054 = vpow2.f32 %v1485_v20  ;;  %v1093_v8 = vsub.f32 %v6693_v29, %v1076_v4  ;;  %v1444_v10 = vpop.xlane.xlu1 %1443 }
 0x389   : > { %v1462_v11 = vsub.f32 %v6736_v16, %v1444_v10  ;;  %6056 = vpow2.f32 %v1125_v27 }
 0x38a   : > { %v6047_v12 = vpop.eup %6046  ;;  %v1123_v13 = vmul.f32 1.442695, %v1093_v8 }
 0x38b   : > { %v1491_v5 = vmul.f32 1.442695, %v1462_v11  ;;  %v1442_v36 = vpop.xlane.xlu0 %1441  ;;  %v5720_v28 = vpack.c.bf16 %v6045_v35, %v6047_v12  ;;  %v6049_v15 = vpop.eup %6048 }
 0x38c   : > { %6058 = vpow2.f32 %v1123_v13  ;;  %v1461_v14 = vsub.f32 %v6739_v17, %v1442_v36 }
 0x38d   : > { %5721 = vmatpush3.bf16.xpose.msra.mxu0 %v5720_v28  ;;  %6060 = vpow2.f32 %v1491_v5 }
 0x38e   : > { %v6051_v18 = vpop.eup %6050  ;;  %v1489_v39 = vmul.f32 1.442695, %v1461_v14  ;;  %5722 = vmatprep.subr.bf16.mxu0 %v7944_v23 }
 0x38f   : > { %v1448_v29 = vpop.xlane.xlu1 %1447  ;;  %v5702_v37 = vpack.c.bf16 %v6049_v15, %v6051_v18  ;;  %v6053_v40 = vpop.eup %6052 }
 0x390   : > { %6062 = vpow2.f32 %v1489_v39  ;;  %v1464_v16 = vsub.f32 %v6746_v0, %v1448_v29  ;;  %v1446_v21 = vpop.xlane.xlu0 %1445 }
 0x391   : > { %v1463_v57 = vsub.f32 %v6749_v1, %v1446_v21  ;;  %5703 = vmatpush3.bf16.xpose.msra.mxu1 %v5702_v37 }
 0x392   : > { %v6055_v22 = vpop.eup %6054  ;;  %v1495_v38 = vmul.f32 1.442695, %v1464_v16  ;;  %5704 = vmatprep.subr.bf16.mxu1 %v7944_v23 }
 0x393   : > { %v1493_v17 = vmul.f32 1.442695, %v1463_v57  ;;  %v656_v58 = vpop.permute.xlu1 %655  ;;  %v5723_v30 = vpack.c.bf16 %v6053_v40, %v6055_v22  ;;  %v6057_v24 = vpop.eup %6056 }
 0x394   : > { %6064 = vpow2.f32 %v1495_v38  ;;  %v784_v63 = vadd.f32 %v6523_v34, %v656_v58 }
 0x395   : > { %6066 = vpow2.f32 %v1493_v17  ;;  %5724 = vmatpush3.bf16.xpose.msra.mxu0 %v5723_v30 }
 0x396   : > { %v6059_v60 = vpop.eup %6058  ;;  %5725 = vmatprep.subr.bf16.mxu0 %v7944_v23  ;;  %v1980_v8 = vrot.slane %v784_v63, 4 }
 0x397   : > { %v1949_v0 = vpop.permute.xlu1 %1948  ;;  %v5705_v59 = vpack.c.bf16 %v6057_v24, %v6059_v60  ;;  %v6061_v26 = vpop.eup %6060 }
 0x398   : > { %v671_v1 = vpop.permute.xlu0 %670 }
 0x399   : > { %5706 = vmatpush3.bf16.xpose.msra.mxu1 %v5705_v59  ;;  %v799_v19 = vadd.f32 %v6773_v3, %v671_v1 }
 0x39a   : > { %v6063_v31 = vpop.eup %6062  ;;  %5195 = vmatprep.subr.msk.mxu1 %vm7950_vm1, %v784_v63 }
 0x39b   : > { %v1951_v6 = vpop.permute.xlu1 %1950  ;;  %v5726_v61 = vpack.c.bf16 %v6061_v26, %v6063_v31  ;;  %v1127_v20 = vsel %vm7950_vm1, %v799_v19, 1.0  ;;  %v1498_v35 = vrot.slane %v799_v19, 4 }
 0x39c   : > { %v1579_v7 = vpop.permute.xlu0 %1578 }
 0x39d   : > { %5727 = vmatpush3.bf16.xpose.msra.mxu0 %v5726_v61  ;;  %v1500_v5 = vsel %vm7950_vm1, %v1498_v35, 1.0 }
 0x39e   : > { %v6065_v32 = vpop.eup %6064  ;;  %5728 = vmatprep.subr.bf16.mxu0 %v7944_v23 }
 0x39f   : > { %v6067_v33 = vpop.eup %6066  ;;  %v1581_v27 = vpop.permute.xlu1 %1580 }
 0x3a0   : > { %v1953_v34 = vpop.permute.xlu0 %1952  ;;  %5132 = vmatmul.mubr.f32.vlgmr.msra.gmra.mrb[12].mxu1 %v1127_v20  ;;  %v5729_v4 = vpack.c.bf16 %v6065_v32, %v6067_v33  ;;  %v7941_v33 = vlaneseq }
 0x3a1   : > { %5196 = vmatpush3.msk.msra.mxu1 %vm7950_vm1, %v784_v63  ;;  %5197 = vmatprep.mubr.msk.f32.mxu1 %vm7948_vm2, %v1579_v7 }
 0x3a2   : > { %5731 = vmatprep.subr.bf16.mxu1 %v7944_v23 }
 0x3a3   : > { %v1955_v3 = vpop.permute.xlu1 %1954 }
 0x3a4   : > { %v1583_v10 = vpop.permute.xlu0 %1582  ;;  %5198 = vmatmul.mubr.msk.f32.vlgmr.msra.gmra.mrb[14].mxu1 %vm7948_vm2, %v1581_v27 }
 0x3a5   : > { %5730 = vmatpush3.bf16.xpose.msra.mxu0 %v5729_v4  ;;  %5200 = vmatprep.mubr.msk.f32.mxu1 %vm7948_vm2, %v1583_v10 }
 0x3a6   : > { %5256 = vmatprep.subr.msk.mxu0 %vm7950_vm1, %v1980_v8 }
 0x3a7   : > { %v1585_v11 = vpop.permute.xlu1 %1584 }
 0x3a8   : > { %v1957_v12 = vpop.permute.xlu0 %1956  ;;  %5201 = vmatmul.mubr.msk.f32.gmra.mrb[16].mxu1 %vm7948_vm2, %v1585_v11 }
 0x3ab   : > { %v1959_v13 = vpop.permute.xlu1 %1958 }
 0x3ac   : > { %v1587_v36 = vpop.permute.xlu0 %1586  ;;  %5193 = vmatmul.mubr.f32.vlgmr.msra.gmra.mrb[32].mxu0 %v1500_v5 }
 0x3ad   : > { %5203 = vmatprep.mubr.msk.f32.mxu1 %vm7948_vm2, %v1587_v36  ;;  %5257 = vmatpush3.msk.msra.mxu0 %vm7950_vm1, %v1980_v8 }
 0x3ae   : > { %5258 = vmatprep.mubr.msk.f32.mxu0 %vm7948_vm2, %v1949_v0  ;;  %5755 = vmatprep.subr.bf16.mxu0 %v7944_v23 }
 0x3af   : > { %v1589_v28 = vpop.permute.xlu1 %1588 }
 0x3b0   : > { %v1961_v14 = vpop.permute.xlu0 %1960  ;;  %5204 = vmatmul.mubr.msk.f32.gmra.mrb[18].mxu1 %vm7948_vm2, %v1589_v28  ;;  %5259 = vmatmul.mubr.msk.f32.vlgmr.msra.gmra.mrb[34].mxu0 %vm7948_vm2, %v1951_v6 }
 0x3b1   : > { %5261 = vmatprep.mubr.msk.f32.mxu0 %vm7948_vm2, %v1953_v34  ;;  %v6942_v34 = vshrl.u32 %v7941_v33, 7 }
 0x3b3   : > { %v1963_v15 = vpop.permute.xlu1 %1962  ;;  %7957 = vst [vmem:[#allocation9_spill] sm:$0xff] %v6942_v34  ;;  %v6955_v35 = vsub.s32 4, %v6942_v34 }
 0x3b4   : > { %v1591_v18 = vpop.permute.xlu0 %1590  ;;  %5262 = vmatmul.mubr.msk.f32.gmra.mrb[36].mxu0 %vm7948_vm2, %v1955_v3 }
 0x3b5   : > { %5206 = vmatprep.mubr.msk.f32.mxu1 %vm7948_vm2, %v1591_v18  ;;  %5264 = vmatprep.mubr.msk.f32.mxu0 %vm7948_vm2, %v1957_v12 }
 0x3b7   : > { %v1593_v39 = vpop.permute.xlu1 %1592 }
 0x3b8   : > { %v1965_v29 = vpop.permute.xlu0 %1964  ;;  %5207 = vmatmul.mubr.msk.f32.gmra.mrb[20].mxu1 %vm7948_vm2, %v1593_v39  ;;  %5265 = vmatmul.mubr.msk.f32.gmra.mrb[38].mxu0 %vm7948_vm2, %v1959_v13 }
 0x3b9   : > { %5267 = vmatprep.mubr.msk.f32.mxu0 %vm7948_vm2, %v1961_v14 }
 0x3bb   : > { %v1967_v37 = vpop.permute.xlu1 %1966 }
 0x3bc   : > { %v1595_v16 = vpop.permute.xlu0 %1594  ;;  %5268 = vmatmul.mubr.msk.f32.gmra.mrb[40].mxu0 %vm7948_vm2, %v1963_v15 }
 0x3bd   : > { %5209 = vmatprep.mubr.msk.f32.mxu1 %vm7948_vm2, %v1595_v16  ;;  %5270 = vmatprep.mubr.msk.f32.mxu0 %vm7948_vm2, %v1965_v29 }
 0x3bf   : > { %v1597_v21 = vpop.permute.xlu1 %1596 }
 0x3c0   : > { %v1969_v40 = vpop.permute.xlu0 %1968  ;;  %5210 = vmatmul.mubr.msk.f32.gmra.mrb[22].mxu1 %vm7948_vm2, %v1597_v21  ;;  %5271 = vmatmul.mubr.msk.f32.gmra.mrb[42].mxu0 %vm7948_vm2, %v1967_v37 }
 0x3c1   : > { %5273 = vmatprep.mubr.msk.f32.mxu0 %vm7948_vm2, %v1969_v40 }
 0x3c3   : > { %v1971_v57 = vpop.permute.xlu1 %1970 }
 0x3c4   : > { %v1599_v22 = vpop.permute.xlu0 %1598  ;;  %5274 = vmatmul.mubr.msk.f32.gmra.mrb[44].mxu0 %vm7948_vm2, %v1971_v57 }
 0x3c5   : > { %5212 = vmatprep.mubr.msk.f32.mxu1 %vm7948_vm2, %v1599_v22 }
 0x3c7   : > { %v1601_v38 = vpop.permute.xlu1 %1600 }
 0x3c8   : > { %v1973_v17 = vpop.permute.xlu0 %1972  ;;  %5213 = vmatmul.mubr.msk.f32.gmra.mrb[24].mxu1 %vm7948_vm2, %v1601_v38 }
 0x3c9   : > { %5276 = vmatprep.mubr.msk.f32.mxu0 %vm7948_vm2, %v1973_v17 }
 0x3cb   : > { %v1975_v58 = vpop.permute.xlu1 %1974 }
 0x3cc   : > { %v1603_v30 = vpop.permute.xlu0 %1602  ;;  %5277 = vmatmul.mubr.msk.f32.gmra.mrb[46].mxu0 %vm7948_vm2, %v1975_v58 }
 0x3cd   : > { %5215 = vmatprep.mubr.msk.f32.mxu1 %vm7948_vm2, %v1603_v30 }
 0x3cf   : > { %v1605_v24 = vpop.permute.xlu1 %1604 }
 0x3d0   : > { %v1977_v60 = vpop.permute.xlu0 %1976  ;;  %5216 = vmatmul.mubr.msk.f32.gmra.mrb[26].mxu1 %vm7948_vm2, %v1605_v24 }
 0x3d1   : > { %5279 = vmatprep.mubr.msk.f32.mxu0 %vm7948_vm2, %v1977_v60 }
 0x3d3   : > { %v1979_v0 = vpop.permute.xlu1 %1978 }
 0x3d4   : > { %v1607_v59 = vpop.permute.xlu0 %1606  ;;  %5280 = vmatmul.mubr.msk.f32.gmra.mrb[48].mxu0 %vm7948_vm2, %v1979_v0 }
 0x3d5   : > { %5218 = vmatprep.mubr.msk.f32.mxu1 %vm7948_vm2, %v1607_v59  ;;  %5314 = vmatprep.mubr.msk.f32.mxu0 %vm6357_vm3, %v7942_v9 }
 0x3d7   : > { %v1609_v63 = vpop.permute.xlu1 %1608 }
 0x3d8   : > { %5219 = vmatmul.mubr.msk.f32.gmra.mrb[28].mxu1 %vm7948_vm2, %v1609_v63 }
 0x3d9   : > { %5253 = vmatprep.mubr.msk.f32.mxu1 %vm6357_vm3, %v7942_v9 }
 0x3db   : > { %v6925_v1 = vpop.f32.mrb[10].mxu1 }
 0x3dc   : > { %7955 = vst [vmem:[#allocation7_spill] sm:$0xff] %v6925_v1  ;;  %v6927_v26 = vpop.f32.mrb[11].mxu1 }
 0x3dd   : > { %7956 = vst [vmem:[#allocation8_spill] sm:$0xff] %v6927_v26 }
 0x473   : > { %v1194_v31 = vpop.f32.mrb[12].mxu1 }
 0x474   : > { %v5133_v19 = vpop.f32.mrb[13].mxu1  ;;  %6068 = vrcp.f32 %v1194_v31 }
 0x477   : > { %v6929_v6 = vpop.f32.mrb[14].mxu1 }
 0x478   : > { %1792 = vmax.xlane.f32.xlu0 %v6929_v6  ;;  %v6932_v61 = vpop.f32.mrb[15].mxu1 }
 0x47b   : > { %v6934_v7 = vpop.f32.mrb[16].mxu1 }
 0x47c   : > { %1790 = vmax.xlane.f32.xlu0 %v6932_v61  ;;  %1796 = vmax.xlane.f32.xlu1 %v6934_v7  ;;  %v6938_v32 = vpop.f32.mrb[17].mxu1 }
 0x47e   : > { %v6069_v12 = vpop.eup %6068 }
 0x47f   : > { %v1567_v20 = vpop.f32.mrb[32].mxu0  ;;  %v1203_v36 = vrot.slane %v6069_v12, %v6955_v35 }
 0x480   : > { %6070 = vrcp.f32 %v1567_v20  ;;  %v5194_v27 = vpop.f32.mrb[33].mxu0  ;;  %1794 = vmax.xlane.f32.xlu0 %v6938_v32 }
 0x481   : > { %v1204_v37 = vmul.f32 %v1203_v36, %v1194_v31  ;;  %v396_v36 = vld [vmem:[%s7935_s5 + $0x10] sm:$0xff] }
 0x483   : > { %v6944_v4 = vpop.f32.mrb[18].mxu1  ;;  %v6946_v3 = vpop.f32.mrb[34].mxu0 }
 0x484   : > { %v6948_v8 = vpop.f32.mrb[35].mxu0  ;;  %2162 = vmax.xlane.f32.xlu1 %v6946_v3  ;;  %v6951_v10 = vpop.f32.mrb[19].mxu1 }
 0x485   : > { %2160 = vmax.xlane.f32.xlu0 %v6948_v8 }
 0x487   : > { %v6957_v11 = vpop.f32.mrb[36].mxu0 }
 0x488   : > { %v6959_v13 = vpop.f32.mrb[37].mxu0  ;;  %1800 = vmax.xlane.f32.xlu1 %v6944_v4 }
 0x489   : > { %1798 = vmax.xlane.f32.xlu0 %v6951_v10 }
 0x48a   : > { %v6071_v5 = vpop.eup %6070 }
 0x48b   : > { %v1576_v28 = vrot.slane %v6071_v5, %v6955_v35  ;;  %v6965_v14 = vpop.f32.mrb[20].mxu1  ;;  %v6967_v15 = vpop.f32.mrb[38].mxu0 }
 0x48c   : > { %v6969_v18 = vpop.f32.mrb[39].mxu0  ;;  %2166 = vmax.xlane.f32.xlu1 %v6957_v11  ;;  %v6972_v39 = vpop.f32.mrb[21].mxu1 }
 0x48d   : > { %v1577_v29 = vmul.f32 %v1576_v28, %v1567_v20  ;;  %2164 = vmax.xlane.f32.xlu0 %v6959_v13  ;;  %v399_v28 = vld [vmem:[%s7935_s5 + $0x28] sm:$0xff] }
 0x48f   : > { %v3808_v16 = vrot.slane %v1577_v29, 4  ;;  %v6975_v21 = vpop.f32.mrb[40].mxu0 }
 0x490   : > { %v6977_v40 = vpop.f32.mrb[41].mxu0  ;;  %1804 = vmax.xlane.f32.xlu1 %v6965_v14 }
 0x491   : > { %1802 = vmax.xlane.f32.xlu0 %v6972_v39  ;;  %v6982_v57 = vsel %vm7950_vm1, %v1204_v37, %v3808_v16 }
 0x493   : > { %v6984_v22 = vpop.f32.mrb[22].mxu1  ;;  %v6986_v38 = vpop.f32.mrb[42].mxu0 }
 0x494   : > { %2170 = vmax.xlane.f32.xlu1 %v6967_v15  ;;  %v6989_v17 = vpop.f32.mrb[23].mxu1  ;;  %v6991_v58 = vpop.f32.mrb[43].mxu0 }
 0x495   : > { %2168 = vmax.xlane.f32.xlu0 %v6969_v18 }
 0x497   : > { %v6994_v30 = vpop.f32.mrb[44].mxu0 }
 0x498   : > { %1808 = vmax.xlane.f32.xlu1 %v6984_v22  ;;  %v6997_v24 = vpop.f32.mrb[45].mxu0 }
 0x499   : > { %1806 = vmax.xlane.f32.xlu0 %v6989_v17 }
 0x49b   : > { %v7000_v60 = vpop.f32.mrb[24].mxu1 }
 0x49c   : > { %2174 = vmax.xlane.f32.xlu1 %v6975_v21  ;;  %v7003_v0 = vpop.f32.mrb[25].mxu1 }
 0x49d   : > { %2172 = vmax.xlane.f32.xlu0 %v6977_v40 }
 0x49f   : > { %v7006_v59 = vpop.f32.mrb[46].mxu0 }
 0x4a0   : > { %1812 = vmax.xlane.f32.xlu1 %v7000_v60  ;;  %v7009_v63 = vpop.f32.mrb[47].mxu0 }
 0x4a1   : > { %1810 = vmax.xlane.f32.xlu0 %v7003_v0 }
 0x4a3   : > { %v7012_v31 = vpop.f32.mrb[26].mxu1 }
 0x4a4   : > { %2178 = vmax.xlane.f32.xlu1 %v6986_v38  ;;  %v7015_v19 = vpop.f32.mrb[27].mxu1 }
 0x4a5   : > { %2176 = vmax.xlane.f32.xlu0 %v6991_v58 }
 0x4a7   : > { %v7018_v20 = vpop.f32.mrb[48].mxu0 }
 0x4a8   : > { %1816 = vmax.xlane.f32.xlu1 %v7012_v31  ;;  %v7021_v27 = vpop.f32.mrb[49].mxu0 }
 0x4a9   : > { %1814 = vmax.xlane.f32.xlu0 %v7015_v19 }
 0x4ab   : > { %v7024_v12 = vpop.f32.mrb[28].mxu1 }
 0x4ac   : > { %2182 = vmax.xlane.f32.xlu1 %v6994_v30  ;;  %v7027_v5 = vpop.f32.mrb[29].mxu1 }
 0x4ad   : > { %2180 = vmax.xlane.f32.xlu0 %v6997_v24 }
 0x4b0   : > { %1820 = vmax.xlane.f32.xlu1 %v7024_v12 }
 0x4b1   : > { %1818 = vmax.xlane.f32.xlu0 %v7027_v5 }
 0x4b4   : > { %2186 = vmax.xlane.f32.xlu1 %v7006_v59 }
 0x4b5   : > { %2184 = vmax.xlane.f32.xlu0 %v7009_v63 }
 0x4b8   : > { %2190 = vmax.xlane.f32.xlu1 %v7018_v20 }
 0x4b9   : > { %2188 = vmax.xlane.f32.xlu0 %v7021_v27 }
 0x4c9   : > { %660 = vperm.xlu1 %6003, %v396_v36  }
 0x4cd   : > { %2691 = vrot.lane.b32.xlu1 %v6528_v41, %s6359_s12 }
 0x4cf   : > { %675 = vperm.xlu0 %6002, %v399_v28  }
 0x4d1   : > { %2693 = vrot.lane.b32.xlu1 %v6534_v42, %s6359_s12 }
 0x4d3   : > { %2321 = vrot.lane.b32.xlu0 %v6528_v41, %s6360_s18 }
 0x4d5   : > { %2323 = vrot.lane.b32.xlu1 %v6534_v42, %s6360_s18 }
 0x4d7   : > { %2695 = vrot.lane.b32.xlu0 %v6541_v43, %s6359_s12 }
 0x4d9   : > { %2697 = vrot.lane.b32.xlu1 %v6547_v44, %s6359_s12 }
 0x4db   : > { %2325 = vrot.lane.b32.xlu0 %v6541_v43, %s6360_s18 }
 0x4dd   : > { %2327 = vrot.lane.b32.xlu1 %v6547_v44, %s6360_s18 }
 0x4df   : > { %2699 = vrot.lane.b32.xlu0 %v6553_v45, %s6359_s12 }
 0x4e1   : > { %2701 = vrot.lane.b32.xlu1 %v6559_v46, %s6359_s12 }
 0x4e3   : > { %2329 = vrot.lane.b32.xlu0 %v6553_v45, %s6360_s18 }
 0x4e5   : > { %2331 = vrot.lane.b32.xlu1 %v6559_v46, %s6360_s18 }
 0x4e7   : > { %2703 = vrot.lane.b32.xlu0 %v6565_v47, %s6359_s12 }
 0x4e9   : > { %2705 = vrot.lane.b32.xlu1 %v6571_v48, %s6359_s12 }
 0x4eb   : > { %2333 = vrot.lane.b32.xlu0 %v6565_v47, %s6360_s18 }
 0x4ed   : > { %2335 = vrot.lane.b32.xlu1 %v6571_v48, %s6360_s18 }
 0x4ef   : > { %2707 = vrot.lane.b32.xlu0 %v6577_v49, %s6359_s12 }
 0x4f1   : > { %2709 = vrot.lane.b32.xlu1 %v6583_v50, %s6359_s12 }
 0x4f3   : > { %2337 = vrot.lane.b32.xlu0 %v6577_v49, %s6360_s18 }
 0x4f5   : > { %2339 = vrot.lane.b32.xlu1 %v6583_v50, %s6360_s18 }
 0x4f7   : > { %2711 = vrot.lane.b32.xlu0 %v6589_v51, %s6359_s12 }
 0x4f9   : > { %2713 = vrot.lane.b32.xlu1 %v6595_v52, %s6359_s12 }
 0x4fb   : > { %2341 = vrot.lane.b32.xlu0 %v6589_v51, %s6360_s18 }
 0x4fd   : > { %2343 = vrot.lane.b32.xlu1 %v6595_v52, %s6360_s18 }
 0x4ff   : > { %2715 = vrot.lane.b32.xlu0 %v6601_v53, %s6359_s12 }
 0x501   : > { %2717 = vrot.lane.b32.xlu1 %v6607_v54, %s6359_s12 }
 0x503   : > { %2345 = vrot.lane.b32.xlu0 %v6601_v53, %s6360_s18 }
 0x505   : > { %v1793_v29 = vpop.xlane.xlu0 %1792  ;;  %2347 = vrot.lane.b32.xlu1 %v6607_v54, %s6360_s18 }
 0x506   : > { %v1823_v37 = vsub.f32 %v6929_v6, %v1793_v29 }
 0x507   : > { %2719 = vrot.lane.b32.xlu0 %v6613_v55, %s6359_s12 }
 0x508   : > { %v1840_v16 = vmul.f32 1.442695, %v1823_v37 }
 0x509   : > { %v1791_v36 = vpop.xlane.xlu0 %1790  ;;  %2721 = vrot.lane.b32.xlu1 %v6619_v56, %s6359_s12  ;;  %v1797_v28 = vpop.xlane.xlu1 %1796  ;;  %s4688_s12 = sshll.u32 %s6443_s17, 9 }
 0x50a   : > { %v1822_v33 = vsub.f32 %v6932_v61, %v1791_v36  ;;  %v1825_v9 = vsub.f32 %v6934_v7, %v1797_v28  ;;  %6072 = vpow2.f32 %v1840_v16  ;;  %s7885_s21 = scalar_lea.hbm %s7940_s10, %s4688_s12 }
 0x50b   : > { %2349 = vrot.lane.b32.xlu0 %v6613_v55, %s6360_s18 }
 0x50c   : > { %v1838_v23 = vmul.f32 1.442695, %v1822_v33  ;;  %v1844_v34 = vmul.f32 1.442695, %v1825_v9 }
 0x50d   : > { %v1795_v6 = vpop.xlane.xlu0 %1794  ;;  %2351 = vrot.lane.b32.xlu1 %v6619_v56, %s6360_s18 }
 0x50e   : > { %6074 = vpow2.f32 %v1838_v23  ;;  %v1824_v29 = vsub.f32 %v6938_v32, %v1795_v6 }
 0x50f   : > { %6076 = vpow2.f32 %v1844_v34 }
 0x510   : > { %v1842_v37 = vmul.f32 1.442695, %v1824_v29 }
 0x511   : > { %v2163_v1 = vpop.xlane.xlu1 %2162 }
 0x512   : > { %6078 = vpow2.f32 %v1842_v37  ;;  %v2193_v61 = vsub.f32 %v6946_v3, %v2163_v1  ;;  %v2161_v7 = vpop.xlane.xlu0 %2160 }
 0x513   : > { %v2192_v36 = vsub.f32 %v6948_v8, %v2161_v7 }
 0x514   : > { %v2210_v28 = vmul.f32 1.442695, %v2193_v61  ;;  %v6073_v25 = vpop.eup %6072 }
 0x515   : > { %v2208_v33 = vmul.f32 1.442695, %v2192_v36  ;;  %v1801_v16 = vpop.xlane.xlu1 %1800  ;;  %v7958_v36 = vmov 0.0|0.0  }
 0x516   : > { %6080 = vpow2.f32 %v2210_v28  ;;  %v1827_v9 = vsub.f32 %v6944_v4, %v1801_v16  ;;  %v1799_v26 = vpop.xlane.xlu0 %1798 }
 0x517   : > { %6082 = vpow2.f32 %v2208_v33  ;;  %v1826_v23 = vsub.f32 %v6951_v10, %v1799_v26 }
 0x518   : > { %v6075_v32 = vpop.eup %6074  ;;  %v1848_v34 = vmul.f32 1.442695, %v1827_v9 }
 0x519   : > { %v1846_v6 = vmul.f32 1.442695, %v1826_v23  ;;  %v2167_v29 = vpop.xlane.xlu1 %2166  ;;  %v5732_v37 = vpack.c.bf16 %v6073_v25, %v6075_v32  ;;  %v6077_v8 = vpop.eup %6076 }
 0x51a   : > { %6084 = vpow2.f32 %v1848_v34  ;;  %v2195_v1 = vsub.f32 %v6957_v11, %v2167_v29  ;;  %v2165_v3 = vpop.xlane.xlu0 %2164 }
 0x51b   : > { %6086 = vpow2.f32 %v1846_v6  ;;  %v2194_v61 = vsub.f32 %v6959_v13, %v2165_v3  ;;  %5733 = vmatpush3.bf16.xpose.msra.mxu1 %v5732_v37 }
 0x51c   : > { %v6079_v4 = vpop.eup %6078  ;;  %v2214_v7 = vmul.f32 1.442695, %v2195_v1  ;;  %5734 = vmatprep.subr.bf16.mxu1 %v7958_v36 }
 0x51d   : > { %v2212_v28 = vmul.f32 1.442695, %v2194_v61  ;;  %v1805_v26 = vpop.xlane.xlu1 %1804  ;;  %v5735_v10 = vpack.c.bf16 %v6077_v8, %v6079_v4 }
 0x51e   : > { %6088 = vpow2.f32 %v2214_v7  ;;  %v1829_v33 = vsub.f32 %v6965_v14, %v1805_v26  ;;  %v1803_v25 = vpop.xlane.xlu0 %1802 }
 0x51f   : > { %6090 = vpow2.f32 %v2212_v28  ;;  %v1828_v11 = vsub.f32 %v6972_v39, %v1803_v25 }
 0x520   : > { %v6081_v16 = vpop.eup %6080  ;;  %v1852_v9 = vmul.f32 1.442695, %v1829_v33 }
 0x521   : > { %v6083_v23 = vpop.eup %6082  ;;  %v1850_v32 = vmul.f32 1.442695, %v1828_v11  ;;  %v2171_v13 = vpop.xlane.xlu1 %2170 }
 0x522   : > { %6092 = vpow2.f32 %v1852_v9  ;;  %v2197_v34 = vsub.f32 %v6967_v15, %v2171_v13  ;;  %v2169_v6 = vpop.xlane.xlu0 %2168  ;;  %v5756_v29 = vpack.c.bf16 %v6081_v16, %v6083_v23 }
 0x523   : > { %6094 = vpow2.f32 %v1850_v32  ;;  %v2196_v37 = vsub.f32 %v6969_v18, %v2169_v6  ;;  %5736 = vmatpush3.bf16.xpose.msra.mxu1 %v5735_v10 }
 0x524   : > { %v6085_v1 = vpop.eup %6084  ;;  %v2218_v14 = vmul.f32 1.442695, %v2197_v34  ;;  %5757 = vmatpush3.bf16.xpose.msra.mxu0 %v5756_v29  ;;  %5737 = vmatprep.subr.bf16.mxu1 %v7958_v36 }
 0x525   : > { %v6087_v39 = vpop.eup %6086  ;;  %v2216_v3 = vmul.f32 1.442695, %v2196_v37  ;;  %v1809_v8 = vpop.xlane.xlu1 %1808  ;;  %5758 = vmatprep.subr.bf16.mxu0 %v7958_v36 }
 0x526   : > { %6096 = vpow2.f32 %v2218_v14  ;;  %v1831_v61 = vsub.f32 %v6984_v22, %v1809_v8  ;;  %v1807_v15 = vpop.xlane.xlu0 %1806  ;;  %v5738_v4 = vpack.c.bf16 %v6085_v1, %v6087_v39 }
 0x527   : > { %6098 = vpow2.f32 %v2216_v3  ;;  %v1830_v7 = vsub.f32 %v6989_v17, %v1807_v15 }
 0x528   : > { %v6089_v18 = vpop.eup %6088  ;;  %v1856_v28 = vmul.f32 1.442695, %v1831_v61 }
 0x529   : > { %v6091_v26 = vpop.eup %6090  ;;  %v1854_v10 = vmul.f32 1.442695, %v1830_v7  ;;  %v2175_v33 = vpop.xlane.xlu1 %2174 }
 0x52a   : > { %6100 = vpow2.f32 %v1856_v28  ;;  %v2199_v25 = vsub.f32 %v6975_v21, %v2175_v33  ;;  %v2173_v11 = vpop.xlane.xlu0 %2172  ;;  %v5759_v16 = vpack.c.bf16 %v6089_v18, %v6091_v26 }
 0x52b   : > { %6102 = vpow2.f32 %v1854_v10  ;;  %v2198_v9 = vsub.f32 %v6977_v40, %v2173_v11  ;;  %5739 = vmatpush3.bf16.xpose.msra.mxu1 %v5738_v4 }
 0x52c   : > { %v6093_v22 = vpop.eup %6092  ;;  %v2222_v23 = vmul.f32 1.442695, %v2199_v25  ;;  %5760 = vmatpush3.bf16.xpose.msra.mxu0 %v5759_v16  ;;  %5740 = vmatprep.subr.bf16.mxu1 %v7958_v36 }
 0x52d   : > { %v6095_v17 = vpop.eup %6094  ;;  %v2220_v32 = vmul.f32 1.442695, %v2198_v9  ;;  %v1813_v13 = vpop.xlane.xlu1 %1812  ;;  %5761 = vmatprep.subr.bf16.mxu0 %v7958_v36 }
 0x52e   : > { %6104 = vpow2.f32 %v2222_v23  ;;  %v1833_v34 = vsub.f32 %v7000_v60, %v1813_v13  ;;  %v1811_v21 = vpop.xlane.xlu0 %1810  ;;  %v5741_v6 = vpack.c.bf16 %v6093_v22, %v6095_v17 }
 0x52f   : > { %6106 = vpow2.f32 %v2220_v32  ;;  %v1832_v29 = vsub.f32 %v7003_v0, %v1811_v21 }
 0x530   : > { %v6097_v40 = vpop.eup %6096  ;;  %v1860_v37 = vmul.f32 1.442695, %v1833_v34 }
 0x531   : > { %v6099_v1 = vpop.eup %6098  ;;  %v1858_v14 = vmul.f32 1.442695, %v1832_v29  ;;  %v2179_v39 = vpop.xlane.xlu1 %2178 }
 0x532   : > { %6108 = vpow2.f32 %v1860_v37  ;;  %v2201_v3 = vsub.f32 %v6986_v38, %v2179_v39  ;;  %v2177_v8 = vpop.xlane.xlu0 %2176  ;;  %v5762_v61 = vpack.c.bf16 %v6097_v40, %v6099_v1 }
 0x533   : > { %6110 = vpow2.f32 %v1858_v14  ;;  %v2200_v15 = vsub.f32 %v6991_v58, %v2177_v8  ;;  %5742 = vmatpush3.bf16.xpose.msra.mxu1 %v5741_v6 }
 0x534   : > { %v6101_v60 = vpop.eup %6100  ;;  %v2226_v4 = vmul.f32 1.442695, %v2201_v3  ;;  %5763 = vmatpush3.bf16.xpose.msra.mxu0 %v5762_v61  ;;  %5743 = vmatprep.subr.bf16.mxu1 %v7958_v36 }
 0x535   : > { %v6103_v0 = vpop.eup %6102  ;;  %v2224_v7 = vmul.f32 1.442695, %v2200_v15  ;;  %v1817_v18 = vpop.xlane.xlu1 %1816  ;;  %5764 = vmatprep.subr.bf16.mxu0 %v7958_v36 }
 0x536   : > { %6112 = vpow2.f32 %v2226_v4  ;;  %v1835_v28 = vsub.f32 %v7012_v31, %v1817_v18  ;;  %v1815_v38 = vpop.xlane.xlu0 %1814  ;;  %v5744_v26 = vpack.c.bf16 %v6101_v60, %v6103_v0 }
 0x537   : > { %6114 = vpow2.f32 %v2224_v7  ;;  %v1834_v10 = vsub.f32 %v7015_v19, %v1815_v38 }
 0x538   : > { %v6105_v58 = vpop.eup %6104  ;;  %v1864_v33 = vmul.f32 1.442695, %v1835_v28 }
 0x539   : > { %v6107_v25 = vpop.eup %6106  ;;  %v1862_v11 = vmul.f32 1.442695, %v1834_v10  ;;  %v2183_v16 = vpop.xlane.xlu1 %2182 }
 0x53a   : > { %6116 = vpow2.f32 %v1864_v33  ;;  %v2203_v9 = vsub.f32 %v6994_v30, %v2183_v16  ;;  %v2181_v22 = vpop.xlane.xlu0 %2180  ;;  %v5765_v23 = vpack.c.bf16 %v6105_v58, %v6107_v25 }
 0x53b   : > { %6118 = vpow2.f32 %v1862_v11  ;;  %v2202_v17 = vsub.f32 %v6997_v24, %v2181_v22  ;;  %5745 = vmatpush3.bf16.xpose.msra.mxu1 %v5744_v26 }
 0x53c   : > { %v6109_v31 = vpop.eup %6108  ;;  %v2230_v32 = vmul.f32 1.442695, %v2203_v9  ;;  %5766 = vmatpush3.bf16.xpose.msra.mxu0 %v5765_v23  ;;  %5746 = vmatprep.subr.bf16.mxu1 %v7958_v36 }
 0x53d   : > { %v6111_v19 = vpop.eup %6110  ;;  %v2228_v13 = vmul.f32 1.442695, %v2202_v17  ;;  %v1821_v34 = vpop.xlane.xlu1 %1820  ;;  %5767 = vmatprep.subr.bf16.mxu0 %v7958_v36 }
 0x53e   : > { %6120 = vpow2.f32 %v2230_v32  ;;  %v1837_v21 = vsub.f32 %v7024_v12, %v1821_v34  ;;  %v1819_v30 = vpop.xlane.xlu0 %1818  ;;  %v5747_v6 = vpack.c.bf16 %v6109_v31, %v6111_v19 }
 0x53f   : > { %6122 = vpow2.f32 %v2228_v13  ;;  %v1836_v29 = vsub.f32 %v7027_v5, %v1819_v30 }
 0x540   : > { %v6113_v24 = vpop.eup %6112  ;;  %v1868_v40 = vmul.f32 1.442695, %v1837_v21 }
 0x541   : > { %v6115_v37 = vpop.eup %6114  ;;  %v1866_v1 = vmul.f32 1.442695, %v1836_v29  ;;  %v2187_v14 = vpop.xlane.xlu1 %2186 }
 0x542   : > { %6124 = vpow2.f32 %v1868_v40  ;;  %v2205_v39 = vsub.f32 %v7006_v59, %v2187_v14  ;;  %v2185_v3 = vpop.xlane.xlu0 %2184  ;;  %v5768_v8 = vpack.c.bf16 %v6113_v24, %v6115_v37 }
 0x543   : > { %6126 = vpow2.f32 %v1866_v1  ;;  %v2204_v61 = vsub.f32 %v7009_v63, %v2185_v3  ;;  %5748 = vmatpush3.bf16.xpose.msra.mxu1 %v5747_v6 }
 0x544   : > { %v6117_v12 = vpop.eup %6116  ;;  %v2234_v15 = vmul.f32 1.442695, %v2205_v39  ;;  %5769 = vmatpush3.bf16.xpose.msra.mxu0 %v5768_v8  ;;  %5749 = vmatprep.subr.bf16.mxu1 %v7958_v36 }
 0x545   : > { %v6119_v5 = vpop.eup %6118  ;;  %v2232_v60 = vmul.f32 1.442695, %v2204_v61  ;;  %v2191_v4 = vpop.xlane.xlu1 %2190  ;;  %5770 = vmatprep.subr.bf16.mxu0 %v7958_v36 }
 0x546   : > { %6128 = vpow2.f32 %v2234_v15  ;;  %v2207_v0 = vsub.f32 %v7018_v20, %v2191_v4  ;;  %v2189_v59 = vpop.xlane.xlu0 %2188  ;;  %v5750_v7 = vpack.c.bf16 %v6117_v12, %v6119_v5 }
 0x547   : > { %6130 = vpow2.f32 %v2232_v60  ;;  %v2206_v18 = vsub.f32 %v7021_v27, %v2189_v59 }
 0x548   : > { %v6121_v63 = vpop.eup %6120  ;;  %v2238_v28 = vmul.f32 1.442695, %v2207_v0 }
 0x549   : > { %v6123_v38 = vpop.eup %6122  ;;  %v2236_v26 = vmul.f32 1.442695, %v2206_v18  ;;  %v661_v10 = vpop.permute.xlu1 %660 }
 0x54a   : > { %6132 = vpow2.f32 %v2238_v28  ;;  %v5771_v58 = vpack.c.bf16 %v6121_v63, %v6123_v38  ;;  %v789_v23 = vadd.f32 %v6769_v62, %v661_v10 }
 0x54b   : > { %6134 = vpow2.f32 %v2236_v26  ;;  %5751 = vmatpush3.bf16.xpose.msra.mxu1 %v5750_v7 }
 0x54c   : > { %v6125_v33 = vpop.eup %6124  ;;  %5772 = vmatpush3.bf16.xpose.msra.mxu0 %v5771_v58  ;;  %5752 = vmatprep.subr.bf16.mxu1 %v7958_v36  ;;  %v2723_v62 = vrot.slane %v789_v23, 4 }
 0x54d   : > { %v6127_v25 = vpop.eup %6126  ;;  %v2692_v20 = vpop.permute.xlu1 %2691  ;;  %5773 = vmatprep.subr.bf16.mxu0 %v7958_v36 }
 0x54e   : > { %v676_v11 = vpop.permute.xlu0 %675  ;;  %v5753_v16 = vpack.c.bf16 %v6125_v33, %v6127_v25 }
 0x54f   : > { %v804_v13 = vadd.f32 %v6771_v2, %v676_v11 }
 0x550   : > { %v6129_v27 = vpop.eup %6128 }
 0x551   : > { %v6131_v9 = vpop.eup %6130  ;;  %v2694_v22 = vpop.permute.xlu1 %2693  ;;  %v1870_v6 = vsel %vm7950_vm1, %v804_v13, 1.0  ;;  %v2241_v40 = vrot.slane %v804_v13, 4 }
 0x552   : > { %v2322_v17 = vpop.permute.xlu0 %2321  ;;  %v5774_v31 = vpack.c.bf16 %v6129_v27, %v6131_v9 }
 0x553   : > { %5754 = vmatpush3.bf16.xpose.msra.mxu1 %v5753_v16  ;;  %v2243_v39 = vsel %vm7950_vm1, %v2241_v40, 1.0 }
 0x554   : > { %v6133_v32 = vpop.eup %6132  ;;  %5775 = vmatpush3.bf16.xpose.msra.mxu0 %v5774_v31  ;;  %5317 = vmatprep.subr.msk.mxu1 %vm7950_vm1, %v789_v23 }
 0x555   : > { %v6135_v19 = vpop.eup %6134  ;;  %v2324_v34 = vpop.permute.xlu1 %2323  ;;  %5776 = vmatprep.subr.bf16.mxu0 %v7958_v36 }
 0x556   : > { %v2696_v21 = vpop.permute.xlu0 %2695  ;;  %v5777_v30 = vpack.c.bf16 %v6133_v32, %v6135_v19 }
 0x559   : > { %v2698_v29 = vpop.permute.xlu1 %2697 }
 0x55a   : > { %v2326_v24 = vpop.permute.xlu0 %2325  ;;  %5254 = vmatmul.mubr.f32.vlgmr.msra.gmra.mrb[30].mxu1 %v1870_v6 }
 0x55b   : > { %5318 = vmatpush3.msk.msra.mxu1 %vm7950_vm1, %v789_v23  ;;  %5319 = vmatprep.mubr.msk.f32.mxu1 %vm7948_vm2, %v2322_v17 }
 0x55c   : > { %5778 = vmatpush3.bf16.xpose.msra.mxu0 %v5777_v30  ;;  %5779 = vmatprep.subr.bf16.mxu1 %v7958_v36 }
 0x55d   : > { %5378 = vmatprep.subr.msk.mxu0 %vm7950_vm1, %v2723_v62  ;;  %v2328_v2 = vpop.permute.xlu1 %2327 }
 0x55e   : > { %v2700_v37 = vpop.permute.xlu0 %2699  ;;  %5320 = vmatmul.mubr.msk.f32.vlgmr.msra.gmra.mrb[32].mxu1 %vm7948_vm2, %v2324_v34 }
 0x55f   : > { %5322 = vmatprep.mubr.msk.f32.mxu1 %vm7948_vm2, %v2326_v24 }
 0x561   : > { %v2702_v1 = vpop.permute.xlu1 %2701 }
 0x562   : > { %v2330_v14 = vpop.permute.xlu0 %2329  ;;  %5323 = vmatmul.mubr.msk.f32.gmra.mrb[34].mxu1 %vm7948_vm2, %v2328_v2 }
 0x563   : > { %5315 = vmatmul.mubr.f32.vlgmr.msra.gmra.mrb[50].mxu0 %v2243_v39  ;;  %5325 = vmatprep.mubr.msk.f32.mxu1 %vm7948_vm2, %v2330_v14 }
 0x564   : > { %5379 = vmatpush3.msk.msra.mxu0 %vm7950_vm1, %v2723_v62  ;;  %5380 = vmatprep.mubr.msk.f32.mxu0 %vm7948_vm2, %v2692_v20  ;;  %v7959_v20 = vmov 0.0  }
 0x565   : > { %v2332_v3 = vpop.permute.xlu1 %2331  ;;  %5803 = vmatprep.subr.bf16.mxu0 %v7958_v36 }
 0x566   : > { %v2704_v8 = vpop.permute.xlu0 %2703  ;;  %5326 = vmatmul.mubr.msk.f32.gmra.mrb[36].mxu1 %vm7948_vm2, %v2332_v3 }
 0x567   : > { %5381 = vmatmul.mubr.msk.f32.vlgmr.msra.gmra.mrb[52].mxu0 %vm7948_vm2, %v2694_v22 }
 0x568   : > { %5383 = vmatprep.mubr.msk.f32.mxu0 %vm7948_vm2, %v2696_v21 }
 0x569   : > { %v2706_v61 = vpop.permute.xlu1 %2705 }
 0x56a   : > { %v2334_v12 = vpop.permute.xlu0 %2333 }
 0x56b   : > { %5328 = vmatprep.mubr.msk.f32.mxu1 %vm7948_vm2, %v2334_v12  ;;  %5384 = vmatmul.mubr.msk.f32.gmra.mrb[54].mxu0 %vm7948_vm2, %v2698_v29 }
 0x56c   : > { %5386 = vmatprep.mubr.msk.f32.mxu0 %vm7948_vm2, %v2700_v37 }
 0x56d   : > { %v2336_v15 = vpop.permute.xlu1 %2335 }
 0x56e   : > { %v2708_v5 = vpop.permute.xlu0 %2707  ;;  %5329 = vmatmul.mubr.msk.f32.gmra.mrb[38].mxu1 %vm7948_vm2, %v2336_v15 }
 0x56f   : > { %5387 = vmatmul.mubr.msk.f32.gmra.mrb[56].mxu0 %vm7948_vm2, %v2702_v1 }
 0x570   : > { %5389 = vmatprep.mubr.msk.f32.mxu0 %vm7948_vm2, %v2704_v8 }
 0x571   : > { %v2710_v60 = vpop.permute.xlu1 %2709 }
 0x572   : > { %v2338_v4 = vpop.permute.xlu0 %2337 }
 0x573   : > { %5331 = vmatprep.mubr.msk.f32.mxu1 %vm7948_vm2, %v2338_v4  ;;  %5390 = vmatmul.mubr.msk.f32.gmra.mrb[58].mxu0 %vm7948_vm2, %v2706_v61 }
 0x574   : > { %5392 = vmatprep.mubr.msk.f32.mxu0 %vm7948_vm2, %v2708_v5 }
 0x575   : > { %v2340_v0 = vpop.permute.xlu1 %2339 }
 0x576   : > { %v2712_v59 = vpop.permute.xlu0 %2711  ;;  %5332 = vmatmul.mubr.msk.f32.gmra.mrb[40].mxu1 %vm7948_vm2, %v2340_v0 }
 0x577   : > { %5393 = vmatmul.mubr.msk.f32.gmra.mrb[60].mxu0 %vm7948_vm2, %v2710_v60 }
 0x578   : > { %5395 = vmatprep.mubr.msk.f32.mxu0 %vm7948_vm2, %v2712_v59 }
 0x579   : > { %v2714_v7 = vpop.permute.xlu1 %2713 }
 0x57a   : > { %v2342_v18 = vpop.permute.xlu0 %2341 }
 0x57b   : > { %5334 = vmatprep.mubr.msk.f32.mxu1 %vm7948_vm2, %v2342_v18  ;;  %5396 = vmatmul.mubr.msk.f32.gmra.mrb[62].mxu0 %vm7948_vm2, %v2714_v7 }
 0x57d   : > { %v2344_v63 = vpop.permute.xlu1 %2343 }
 0x57e   : > { %v2716_v28 = vpop.permute.xlu0 %2715  ;;  %5335 = vmatmul.mubr.msk.f32.gmra.mrb[42].mxu1 %vm7948_vm2, %v2344_v63 }
 0x57f   : > { %5398 = vmatprep.mubr.msk.f32.mxu0 %vm7948_vm2, %v2716_v28 }
 0x581   : > { %v2718_v38 = vpop.permute.xlu1 %2717 }
 0x582   : > { %v2346_v26 = vpop.permute.xlu0 %2345  ;;  %5399 = vmatmul.mubr.msk.f32.gmra.mrb[64].mxu0 %vm7948_vm2, %v2718_v38 }
 0x583   : > { %5337 = vmatprep.mubr.msk.f32.mxu1 %vm7948_vm2, %v2346_v26 }
 0x585   : > { %v2348_v10 = vpop.permute.xlu1 %2347 }
 0x586   : > { %v2720_v58 = vpop.permute.xlu0 %2719  ;;  %5338 = vmatmul.mubr.msk.f32.gmra.mrb[44].mxu1 %vm7948_vm2, %v2348_v10 }
 0x587   : > { %5401 = vmatprep.mubr.msk.f32.mxu0 %vm7948_vm2, %v2720_v58 }
 0x589   : > { %v2722_v33 = vpop.permute.xlu1 %2721 }
 0x58a   : > { %v2350_v25 = vpop.permute.xlu0 %2349  ;;  %5402 = vmatmul.mubr.msk.f32.gmra.mrb[66].mxu0 %vm7948_vm2, %v2722_v33 }
 0x58b   : > { %5340 = vmatprep.mubr.msk.f32.mxu1 %vm7948_vm2, %v2350_v25  ;;  %5436 = vmatprep.mubr.msk.f32.mxu0 %vm6357_vm3, %v7959_v20 }
 0x58d   : > { %v2352_v11 = vpop.permute.xlu1 %2351 }
 0x58e   : > { %5341 = vmatmul.mubr.msk.f32.gmra.mrb[46].mxu1 %vm7948_vm2, %v2352_v11 }
 0x58f   : > { %5375 = vmatprep.mubr.msk.f32.mxu1 %vm6357_vm3, %v7959_v20 }
 0x62d   : > { %v1937_v16 = vpop.f32.mrb[30].mxu1 }
 0x62e   : > { %v5255_v27 = vpop.f32.mrb[31].mxu1  ;;  %6136 = vrcp.f32 %v1937_v16 }
 0x62f   : > { %v400_v27 = vld [vmem:[%s7935_s5 + $0x30] sm:$0xff] }
 0x631   : > { %v7198_v9 = vpop.f32.mrb[32].mxu1 }
 0x632   : > { %2535 = vmax.xlane.f32.xlu0 %v7198_v9  ;;  %v7201_v22 = vpop.f32.mrb[33].mxu1 }
 0x635   : > { %v7203_v23 = vpop.f32.mrb[34].mxu1 }
 0x636   : > { %v2310_v17 = vpop.f32.mrb[50].mxu0  ;;  %2533 = vmax.xlane.f32.xlu0 %v7201_v22  ;;  %2539 = vmax.xlane.f32.xlu1 %v7203_v23  ;;  %v7207_v31 = vpop.f32.mrb[35].mxu1 }
 0x637   : > { %6138 = vrcp.f32 %v2310_v17  ;;  %v5316_v32 = vpop.f32.mrb[51].mxu0 }
 0x638   : > { %v6137_v6 = vpop.eup %6136 }
 0x639   : > { %v7209_v19 = vpop.f32.mrb[36].mxu1  ;;  %v1946_v2 = vrot.slane %v6137_v6, %v6955_v35 }
 0x63a   : > { %v7211_v13 = vpop.f32.mrb[52].mxu0  ;;  %2537 = vmax.xlane.f32.xlu0 %v7207_v31  ;;  %v7214_v34 = vpop.f32.mrb[37].mxu1 }
 0x63b   : > { %v7216_v21 = vpop.f32.mrb[53].mxu0  ;;  %2905 = vmax.xlane.f32.xlu1 %v7211_v13  ;;  %v1947_v3 = vmul.f32 %v1946_v2, %v1937_v16  ;;  %v397_v16 = vld [vmem:[%s7935_s5 + $0x18] sm:$0xff] }
 0x63e   : > { %v7219_v30 = vpop.f32.mrb[54].mxu0  ;;  %2903 = vmax.xlane.f32.xlu0 %v7216_v21 }
 0x63f   : > { %v7222_v29 = vpop.f32.mrb[55].mxu0  ;;  %2543 = vmax.xlane.f32.xlu1 %v7209_v19 }
 0x641   : > { %v6139_v24 = vpop.eup %6138  ;;  %v7225_v62 = vpop.f32.mrb[38].mxu1 }
 0x642   : > { %v2319_v40 = vrot.slane %v6139_v24, %v6955_v35  ;;  %v7229_v37 = vpop.f32.mrb[56].mxu0  ;;  %2541 = vmax.xlane.f32.xlu0 %v7214_v34  ;;  %v7232_v1 = vpop.f32.mrb[39].mxu1 }
 0x643   : > { %v7234_v14 = vpop.f32.mrb[57].mxu0  ;;  %2909 = vmax.xlane.f32.xlu1 %v7219_v30 }
 0x644   : > { %v2320_v39 = vmul.f32 %v2319_v40, %v2310_v17 }
 0x646   : > { %v3811_v8 = vrot.slane %v2320_v39, 4  ;;  %2907 = vmax.xlane.f32.xlu0 %v7222_v29  ;;  %v7238_v61 = vpop.f32.mrb[58].mxu0 }
 0x647   : > { %v7240_v12 = vpop.f32.mrb[59].mxu0  ;;  %2547 = vmax.xlane.f32.xlu1 %v7225_v62 }
 0x648   : > { %v3820_v15 = vsel %vm7950_vm1, %v1947_v3, %v3811_v8 }
 0x649   : > { %v7244_v5 = vpop.f32.mrb[40].mxu1  ;;  %v7247_v60 = vpack.c.bf16 %v3820_v15, %v6982_v57 }
 0x64a   : > { %2545 = vmax.xlane.f32.xlu0 %v7232_v1  ;;  %v7250_v4 = vpop.f32.mrb[41].mxu1  ;;  %v7252_v0 = vpop.f32.mrb[60].mxu0 }
 0x64b   : > { %2913 = vmax.xlane.f32.xlu1 %v7229_v37  ;;  %v7255_v59 = vpop.f32.mrb[61].mxu0 }
 0x64e   : > { %2911 = vmax.xlane.f32.xlu0 %v7234_v14  ;;  %v7258_v7 = vpop.f32.mrb[62].mxu0 }
 0x64f   : > { %2551 = vmax.xlane.f32.xlu1 %v7244_v5  ;;  %v7261_v18 = vpop.f32.mrb[63].mxu0 }
 0x651   : > { %v7263_v57 = vpop.f32.mrb[42].mxu1 }
 0x652   : > { %2549 = vmax.xlane.f32.xlu0 %v7250_v4  ;;  %v7266_v63 = vpop.f32.mrb[43].mxu1 }
 0x653   : > { %2917 = vmax.xlane.f32.xlu1 %v7238_v61 }
 0x655   : > { %v7269_v28 = vpop.f32.mrb[64].mxu0 }
 0x656   : > { %2915 = vmax.xlane.f32.xlu0 %v7240_v12  ;;  %v7272_v38 = vpop.f32.mrb[65].mxu0 }
 0x657   : > { %2555 = vmax.xlane.f32.xlu1 %v7263_v57 }
 0x659   : > { %v7275_v26 = vpop.f32.mrb[44].mxu1 }
 0x65a   : > { %2553 = vmax.xlane.f32.xlu0 %v7266_v63  ;;  %v7278_v10 = vpop.f32.mrb[45].mxu1 }
 0x65b   : > { %2921 = vmax.xlane.f32.xlu1 %v7252_v0 }
 0x65d   : > { %v7281_v58 = vpop.f32.mrb[66].mxu0 }
 0x65e   : > { %2919 = vmax.xlane.f32.xlu0 %v7255_v59  ;;  %v7284_v33 = vpop.f32.mrb[67].mxu0 }
 0x65f   : > { %2559 = vmax.xlane.f32.xlu1 %v7275_v26 }
 0x661   : > { %v7287_v25 = vpop.f32.mrb[46].mxu1 }
 0x662   : > { %2557 = vmax.xlane.f32.xlu0 %v7278_v10  ;;  %v7290_v11 = vpop.f32.mrb[47].mxu1 }
 0x663   : > { %2925 = vmax.xlane.f32.xlu1 %v7258_v7 }
 0x666   : > { %2923 = vmax.xlane.f32.xlu0 %v7261_v18 }
 0x667   : > { %2563 = vmax.xlane.f32.xlu1 %v7287_v25 }
 0x66a   : > { %2561 = vmax.xlane.f32.xlu0 %v7290_v11 }
 0x66b   : > { %2929 = vmax.xlane.f32.xlu1 %v7269_v28 }
 0x66e   : > { %2927 = vmax.xlane.f32.xlu0 %v7272_v38 }
 0x66f   : > { %2933 = vmax.xlane.f32.xlu1 %v7281_v58 }
 0x672   : > { %2931 = vmax.xlane.f32.xlu0 %v7284_v33 }
 0x680   : > { %665 = vperm.xlu1 %6003, %v397_v16  }
 0x684   : > { %3434 = vrot.lane.b32.xlu1 %v6528_v41, %s6361_s25 }
 0x688   : > { %3436 = vrot.lane.b32.xlu1 %v6534_v42, %s6361_s25  ;;  %680 = vperm.xlu0 %6002, %v400_v27  }
 0x68c   : > { %3066 = vrot.lane.b32.xlu1 %v6534_v42, %s6362_s30  ;;  %3064 = vrot.lane.b32.xlu0 %v6528_v41, %s6362_s30 }
 0x690   : > { %3440 = vrot.lane.b32.xlu1 %v6547_v44, %s6361_s25  ;;  %3438 = vrot.lane.b32.xlu0 %v6541_v43, %s6361_s25 }
 0x694   : > { %3070 = vrot.lane.b32.xlu1 %v6547_v44, %s6362_s30  ;;  %3068 = vrot.lane.b32.xlu0 %v6541_v43, %s6362_s30 }
 0x698   : > { %3444 = vrot.lane.b32.xlu1 %v6559_v46, %s6361_s25  ;;  %3442 = vrot.lane.b32.xlu0 %v6553_v45, %s6361_s25 }
 0x69c   : > { %3074 = vrot.lane.b32.xlu1 %v6559_v46, %s6362_s30  ;;  %3072 = vrot.lane.b32.xlu0 %v6553_v45, %s6362_s30 }
 0x6a0   : > { %3448 = vrot.lane.b32.xlu1 %v6571_v48, %s6361_s25  ;;  %3446 = vrot.lane.b32.xlu0 %v6565_v47, %s6361_s25 }
 0x6a4   : > { %3078 = vrot.lane.b32.xlu1 %v6571_v48, %s6362_s30  ;;  %3076 = vrot.lane.b32.xlu0 %v6565_v47, %s6362_s30 }
 0x6a8   : > { %3452 = vrot.lane.b32.xlu1 %v6583_v50, %s6361_s25  ;;  %3450 = vrot.lane.b32.xlu0 %v6577_v49, %s6361_s25 }
 0x6ac   : > { %3082 = vrot.lane.b32.xlu1 %v6583_v50, %s6362_s30  ;;  %3080 = vrot.lane.b32.xlu0 %v6577_v49, %s6362_s30 }
 0x6b0   : > { %3456 = vrot.lane.b32.xlu1 %v6595_v52, %s6361_s25  ;;  %3454 = vrot.lane.b32.xlu0 %v6589_v51, %s6361_s25 }
 0x6b4   : > { %3086 = vrot.lane.b32.xlu1 %v6595_v52, %s6362_s30  ;;  %3084 = vrot.lane.b32.xlu0 %v6589_v51, %s6362_s30 }
 0x6b8   : > { %3460 = vrot.lane.b32.xlu1 %v6607_v54, %s6361_s25  ;;  %3458 = vrot.lane.b32.xlu0 %v6601_v53, %s6361_s25 }
 0x6bc   : > { %3090 = vrot.lane.b32.xlu1 %v6607_v54, %s6362_s30  ;;  %3088 = vrot.lane.b32.xlu0 %v6601_v53, %s6362_s30 }
 0x6bf   : > { %v2536_v41 = vpop.xlane.xlu0 %2535 }
 0x6c0   : > { %v2566_v42 = vsub.f32 %v7198_v9, %v2536_v41  ;;  %3464 = vrot.lane.b32.xlu1 %v6619_v56, %s6361_s25  ;;  %3462 = vrot.lane.b32.xlu0 %v6613_v55, %s6361_s25 }
 0x6c2   : > { %v2583_v43 = vmul.f32 1.442695, %v2566_v42 }
 0x6c3   : > { %v2534_v44 = vpop.xlane.xlu0 %2533  ;;  %v2540_v45 = vpop.xlane.xlu1 %2539 }
 0x6c4   : > { %v2565_v46 = vsub.f32 %v7201_v22, %v2534_v44  ;;  %v2568_v47 = vsub.f32 %v7203_v23, %v2540_v45  ;;  %3094 = vrot.lane.b32.xlu1 %v6619_v56, %s6362_s30  ;;  %3092 = vrot.lane.b32.xlu0 %v6613_v55, %s6362_s30  ;;  %6140 = vpow2.f32 %v2583_v43 }
 0x6c6   : > { %v2581_v48 = vmul.f32 1.442695, %v2565_v46  ;;  %v2587_v49 = vmul.f32 1.442695, %v2568_v47 }
 0x6c7   : > { %v2538_v50 = vpop.xlane.xlu0 %2537 }
 0x6c8   : > { %6142 = vpow2.f32 %v2581_v48  ;;  %v2567_v51 = vsub.f32 %v7207_v31, %v2538_v50  ;;  %v2906_v52 = vpop.xlane.xlu1 %2905 }
 0x6c9   : > { %v2936_v53 = vsub.f32 %v7211_v13, %v2906_v52  ;;  %6144 = vpow2.f32 %v2587_v49 }
 0x6ca   : > { %v2585_v54 = vmul.f32 1.442695, %v2567_v51 }
 0x6cb   : > { %v2953_v9 = vmul.f32 1.442695, %v2936_v53  ;;  %v2904_v22 = vpop.xlane.xlu0 %2903 }
 0x6cc   : > { %6146 = vpow2.f32 %v2585_v54  ;;  %v2935_v56 = vsub.f32 %v7216_v21, %v2904_v22  ;;  %v2544_v23 = vpop.xlane.xlu1 %2543 }
 0x6cd   : > { %v2570_v55 = vsub.f32 %v7209_v19, %v2544_v23  ;;  %6148 = vpow2.f32 %v2953_v9 }
 0x6ce   : > { %v2951_v17 = vmul.f32 1.442695, %v2935_v56  ;;  %v6141_v2 = vpop.eup %6140 }
 0x6cf   : > { %v2591_v32 = vmul.f32 1.442695, %v2570_v55  ;;  %v2542_v6 = vpop.xlane.xlu0 %2541 }
 0x6d0   : > { %6150 = vpow2.f32 %v2951_v17  ;;  %v2569_v31 = vsub.f32 %v7214_v34, %v2542_v6  ;;  %v2910_v24 = vpop.xlane.xlu1 %2909 }
 0x6d1   : > { %v2938_v13 = vsub.f32 %v7219_v30, %v2910_v24  ;;  %6152 = vpow2.f32 %v2591_v32 }
 0x6d2   : > { %v6143_v40 = vpop.eup %6142  ;;  %v2589_v39 = vmul.f32 1.442695, %v2569_v31 }
 0x6d3   : > { %v2957_v3 = vmul.f32 1.442695, %v2938_v13  ;;  %v2908_v8 = vpop.xlane.xlu0 %2907  ;;  %v5780_v21 = vpack.c.bf16 %v6141_v2, %v6143_v40  ;;  %v6145_v16 = vpop.eup %6144 }
 0x6d4   : > { %6154 = vpow2.f32 %v2589_v39  ;;  %v2937_v19 = vsub.f32 %v7222_v29, %v2908_v8  ;;  %v2548_v15 = vpop.xlane.xlu1 %2547 }
 0x6d5   : > { %v2572_v27 = vsub.f32 %v7225_v62, %v2548_v15  ;;  %5781 = vmatpush3.bf16.xpose.msra.mxu1 %v5780_v21  ;;  %6156 = vpow2.f32 %v2957_v3 }
 0x6d6   : > { %v6147_v41 = vpop.eup %6146  ;;  %v2955_v34 = vmul.f32 1.442695, %v2937_v19  ;;  %5782 = vmatprep.subr.bf16.mxu1 %v7958_v36 }
 0x6d7   : > { %v2595_v30 = vmul.f32 1.442695, %v2572_v27  ;;  %v2546_v42 = vpop.xlane.xlu0 %2545  ;;  %v5783_v43 = vpack.c.bf16 %v6145_v16, %v6147_v41  ;;  %v6149_v46 = vpop.eup %6148 }
 0x6d8   : > { %6158 = vpow2.f32 %v2955_v34  ;;  %v2571_v44 = vsub.f32 %v7232_v1, %v2546_v42  ;;  %v2914_v45 = vpop.xlane.xlu1 %2913 }
 0x6d9   : > { %v2940_v29 = vsub.f32 %v7229_v37, %v2914_v45  ;;  %6160 = vpow2.f32 %v2595_v30 }
 0x6da   : > { %v6151_v47 = vpop.eup %6150  ;;  %v2593_v48 = vmul.f32 1.442695, %v2571_v44 }
 0x6db   : > { %v2961_v62 = vmul.f32 1.442695, %v2940_v29  ;;  %v2912_v49 = vpop.xlane.xlu0 %2911  ;;  %v5804_v50 = vpack.c.bf16 %v6149_v46, %v6151_v47  ;;  %v6153_v53 = vpop.eup %6152 }
 0x6dc   : > { %6162 = vpow2.f32 %v2593_v48  ;;  %v2939_v51 = vsub.f32 %v7234_v14, %v2912_v49  ;;  %v2552_v52 = vpop.xlane.xlu1 %2551 }
 0x6dd   : > { %v2574_v54 = vsub.f32 %v7244_v5, %v2552_v52  ;;  %5784 = vmatpush3.bf16.xpose.msra.mxu1 %v5783_v43  ;;  %5805 = vmatpush3.bf16.xpose.msra.mxu0 %v5804_v50  ;;  %6164 = vpow2.f32 %v2961_v62 }
 0x6de   : > { %v6155_v1 = vpop.eup %6154  ;;  %v2959_v9 = vmul.f32 1.442695, %v2939_v51  ;;  %5785 = vmatprep.subr.bf16.mxu1 %v7958_v36  ;;  %5806 = vmatprep.subr.bf16.mxu0 %v7958_v36 }
 0x6df   : > { %v2599_v37 = vmul.f32 1.442695, %v2574_v54  ;;  %v2550_v22 = vpop.xlane.xlu0 %2549  ;;  %v5786_v56 = vpack.c.bf16 %v6153_v53, %v6155_v1  ;;  %v6157_v55 = vpop.eup %6156 }
 0x6e0   : > { %6166 = vpow2.f32 %v2959_v9  ;;  %v2573_v23 = vsub.f32 %v7250_v4, %v2550_v22  ;;  %v2918_v14 = vpop.xlane.xlu1 %2917 }
 0x6e1   : > { %v2942_v17 = vsub.f32 %v7238_v61, %v2918_v14  ;;  %6168 = vpow2.f32 %v2599_v37 }
 0x6e2   : > { %v6159_v5 = vpop.eup %6158  ;;  %v2597_v32 = vmul.f32 1.442695, %v2573_v23 }
 0x6e3   : > { %v2965_v6 = vmul.f32 1.442695, %v2942_v17  ;;  %v2916_v31 = vpop.xlane.xlu0 %2915  ;;  %v5807_v24 = vpack.c.bf16 %v6157_v55, %v6159_v5  ;;  %v6161_v40 = vpop.eup %6160 }
 0x6e4   : > { %6170 = vpow2.f32 %v2597_v32  ;;  %v2941_v2 = vsub.f32 %v7240_v12, %v2916_v31  ;;  %v2556_v13 = vpop.xlane.xlu1 %2555 }
 0x6e5   : > { %v2576_v39 = vsub.f32 %v7263_v57, %v2556_v13  ;;  %5787 = vmatpush3.bf16.xpose.msra.mxu1 %v5786_v56  ;;  %5808 = vmatpush3.bf16.xpose.msra.mxu0 %v5807_v24  ;;  %6172 = vpow2.f32 %v2965_v6 }
 0x6e6   : > { %v6163_v4 = vpop.eup %6162  ;;  %v2963_v3 = vmul.f32 1.442695, %v2941_v2  ;;  %5788 = vmatprep.subr.bf16.mxu1 %v7958_v36  ;;  %5809 = vmatprep.subr.bf16.mxu0 %v7958_v36 }
 0x6e7   : > { %v2603_v61 = vmul.f32 1.442695, %v2576_v39  ;;  %v2554_v8 = vpop.xlane.xlu0 %2553  ;;  %v5789_v21 = vpack.c.bf16 %v6161_v40, %v6163_v4  ;;  %v6165_v15 = vpop.eup %6164 }
 0x6e8   : > { %6174 = vpow2.f32 %v2963_v3  ;;  %v2575_v19 = vsub.f32 %v7266_v63, %v2554_v8  ;;  %v2922_v12 = vpop.xlane.xlu1 %2921 }
 0x6e9   : > { %v2944_v16 = vsub.f32 %v7252_v0, %v2922_v12  ;;  %6176 = vpow2.f32 %v2603_v61 }
 0x6ea   : > { %v6167_v57 = vpop.eup %6166  ;;  %v2601_v27 = vmul.f32 1.442695, %v2575_v19 }
 0x6eb   : > { %v2969_v41 = vmul.f32 1.442695, %v2944_v16  ;;  %v2920_v34 = vpop.xlane.xlu0 %2919  ;;  %v5810_v30 = vpack.c.bf16 %v6165_v15, %v6167_v57  ;;  %v6169_v44 = vpop.eup %6168 }
 0x6ec   : > { %6178 = vpow2.f32 %v2601_v27  ;;  %v2943_v42 = vsub.f32 %v7255_v59, %v2920_v34  ;;  %v2560_v43 = vpop.xlane.xlu1 %2559 }
 0x6ed   : > { %v2578_v45 = vsub.f32 %v7275_v26, %v2560_v43  ;;  %5790 = vmatpush3.bf16.xpose.msra.mxu1 %v5789_v21  ;;  %5811 = vmatpush3.bf16.xpose.msra.mxu0 %v5810_v30  ;;  %6180 = vpow2.f32 %v2969_v41  ;;  %v7960_v43 = vld [vmem:[#allocation6_spill] sm:$0xff] }
 0x6ee   : > { %v6171_v63 = vpop.eup %6170  ;;  %v2967_v46 = vmul.f32 1.442695, %v2943_v42  ;;  %5791 = vmatprep.subr.bf16.mxu1 %v7958_v36  ;;  %5812 = vmatprep.subr.bf16.mxu0 %v7958_v36 }
 0x6ef   : > { %v2607_v0 = vmul.f32 1.442695, %v2578_v45  ;;  %v2558_v29 = vpop.xlane.xlu0 %2557  ;;  %v5792_v47 = vpack.c.bf16 %v6169_v44, %v6171_v63  ;;  %v6173_v62 = vpop.eup %6172 }
 0x6f0   : > { %6182 = vpow2.f32 %v2967_v46  ;;  %v2577_v48 = vsub.f32 %v7278_v10, %v2558_v29  ;;  %v2926_v59 = vpop.xlane.xlu1 %2925 }
 0x6f1   : > { %v2946_v49 = vsub.f32 %v7258_v7, %v2926_v59  ;;  %6184 = vpow2.f32 %v2607_v0  ;;  %v7961_v0 = vld [vmem:[#allocation8_spill] sm:$0xff] }
 0x6f2   : > { %v6175_v26 = vpop.eup %6174  ;;  %v2605_v50 = vmul.f32 1.442695, %v2577_v48 }
 0x6f3   : > { %v2973_v51 = vmul.f32 1.442695, %v2946_v49  ;;  %v2924_v52 = vpop.xlane.xlu0 %2923  ;;  %v5813_v53 = vpack.c.bf16 %v6173_v62, %v6175_v26  ;;  %v6177_v9 = vpop.eup %6176 }
 0x6f4   : > { %6186 = vpow2.f32 %v2605_v50  ;;  %v2945_v54 = vsub.f32 %v7261_v18, %v2924_v52  ;;  %v2564_v1 = vpop.xlane.xlu1 %2563 }
 0x6f5   : > { %v2580_v37 = vsub.f32 %v7287_v25, %v2564_v1  ;;  %5793 = vmatpush3.bf16.xpose.msra.mxu1 %v5792_v47  ;;  %5814 = vmatpush3.bf16.xpose.msra.mxu0 %v5813_v53  ;;  %6188 = vpow2.f32 %v2973_v51 }
 0x6f6   : > { %v6179_v10 = vpop.eup %6178  ;;  %v2971_v22 = vmul.f32 1.442695, %v2945_v54  ;;  %5794 = vmatprep.subr.bf16.mxu1 %v7958_v36  ;;  %5815 = vmatprep.subr.bf16.mxu0 %v7958_v36 }
 0x6f7   : > { %v2611_v7 = vmul.f32 1.442695, %v2580_v37  ;;  %v2562_v56 = vpop.xlane.xlu0 %2561  ;;  %v5795_v23 = vpack.c.bf16 %v6177_v9, %v6179_v10  ;;  %v6181_v55 = vpop.eup %6180 }
 0x6f8   : > { %6190 = vpow2.f32 %v2971_v22  ;;  %v2579_v14 = vsub.f32 %v7290_v11, %v2562_v56  ;;  %v2930_v18 = vpop.xlane.xlu1 %2929 }
 0x6f9   : > { %v2948_v17 = vsub.f32 %v7269_v28, %v2930_v18  ;;  %6192 = vpow2.f32 %v2611_v7 }
 0x6fa   : > { %v6183_v25 = vpop.eup %6182  ;;  %v2609_v5 = vmul.f32 1.442695, %v2579_v14 }
 0x6fb   : > { %v2977_v32 = vmul.f32 1.442695, %v2948_v17  ;;  %v2928_v6 = vpop.xlane.xlu0 %2927  ;;  %v5816_v31 = vpack.c.bf16 %v6181_v55, %v6183_v25  ;;  %v6185_v13 = vpop.eup %6184 }
 0x6fc   : > { %6194 = vpow2.f32 %v2609_v5  ;;  %v2947_v24 = vsub.f32 %v7272_v38, %v2928_v6  ;;  %v2934_v2 = vpop.xlane.xlu1 %2933 }
 0x6fd   : > { %v2950_v40 = vsub.f32 %v7281_v58, %v2934_v2  ;;  %5796 = vmatpush3.bf16.xpose.msra.mxu1 %v5795_v23  ;;  %5817 = vmatpush3.bf16.xpose.msra.mxu0 %v5816_v31  ;;  %6196 = vpow2.f32 %v2977_v32 }
 0x6fe   : > { %v6187_v11 = vpop.eup %6186  ;;  %v2975_v39 = vmul.f32 1.442695, %v2947_v24  ;;  %5797 = vmatprep.subr.bf16.mxu1 %v7958_v36  ;;  %5818 = vmatprep.subr.bf16.mxu0 %v7958_v36 }
 0x6ff   : > { %v2981_v28 = vmul.f32 1.442695, %v2950_v40  ;;  %v2932_v4 = vpop.xlane.xlu0 %2931  ;;  %v5798_v3 = vpack.c.bf16 %v6185_v13, %v6187_v11  ;;  %v6189_v8 = vpop.eup %6188 }
 0x700   : > { %6198 = vpow2.f32 %v2975_v39  ;;  %v2949_v61 = vsub.f32 %v7284_v33, %v2932_v4  ;;  %v666_v38 = vpop.permute.xlu1 %665 }
 0x701   : > { %6200 = vpow2.f32 %v2981_v28  ;;  %v794_v44 = vadd.f32 %v7960_v43, %v666_v38 }
 0x702   : > { %v6191_v21 = vpop.eup %6190  ;;  %v2979_v19 = vmul.f32 1.442695, %v2949_v61 }
 0x703   : > { %v5819_v58 = vpack.c.bf16 %v6189_v8, %v6191_v21  ;;  %v6193_v15 = vpop.eup %6192  ;;  %v3466_v26 = vrot.slane %v794_v44, 4 }
 0x704   : > { %6202 = vpow2.f32 %v2979_v19  ;;  %v3435_v12 = vpop.permute.xlu1 %3434 }
 0x705   : > { %5799 = vmatpush3.bf16.xpose.msra.mxu1 %v5798_v3  ;;  %5820 = vmatpush3.bf16.xpose.msra.mxu0 %v5819_v58 }
 0x706   : > { %v6195_v16 = vpop.eup %6194  ;;  %5800 = vmatprep.subr.bf16.mxu1 %v7958_v36  ;;  %5821 = vmatprep.subr.bf16.mxu0 %v7958_v36 }
 0x707   : > { %v681_v57 = vpop.permute.xlu0 %680  ;;  %v5801_v27 = vpack.c.bf16 %v6193_v15, %v6195_v16  ;;  %v6197_v33 = vpop.eup %6196 }
 0x708   : > { %v3437_v41 = vpop.permute.xlu1 %3436  ;;  %v809_v29 = vadd.f32 %v7961_v0, %v681_v57 }
 0x70a   : > { %v6199_v34 = vpop.eup %6198  ;;  %v2613_v62 = vsel %vm7950_vm1, %v809_v29, 1.0  ;;  %v2984_v51 = vrot.slane %v809_v29, 4 }
 0x70b   : > { %v3065_v30 = vpop.permute.xlu0 %3064  ;;  %v5822_v42 = vpack.c.bf16 %v6197_v33, %v6199_v34  ;;  %v6201_v63 = vpop.eup %6200 }
 0x70c   : > { %v3067_v45 = vpop.permute.xlu1 %3066  ;;  %v2986_v54 = vsel %vm7950_vm1, %v2984_v51, 1.0 }
 0x70d   : > { %5802 = vmatpush3.bf16.xpose.msra.mxu1 %v5801_v27  ;;  %5823 = vmatpush3.bf16.xpose.msra.mxu0 %v5822_v42 }
 0x70e   : > { %v6203_v46 = vpop.eup %6202  ;;  %5439 = vmatprep.subr.msk.mxu1 %vm7950_vm1, %v794_v44  ;;  %5824 = vmatprep.subr.bf16.mxu0 %v7958_v36 }
 0x70f   : > { %v3439_v47 = vpop.permute.xlu0 %3438  ;;  %v5825_v48 = vpack.c.bf16 %v6201_v63, %v6203_v46 }
 0x710   : > { %v3441_v59 = vpop.permute.xlu1 %3440 }
 0x713   : > { %v3069_v49 = vpop.permute.xlu0 %3068 }
 0x714   : > { %5376 = vmatmul.mubr.f32.vlgmr.msra.gmra.mrb[48].mxu1 %v2613_v62  ;;  %v3071_v50 = vpop.permute.xlu1 %3070 }
 0x715   : > { %5826 = vmatpush3.bf16.xpose.msra.mxu0 %v5825_v48  ;;  %5440 = vmatpush3.msk.msra.mxu1 %vm7950_vm1, %v794_v44 }
 0x716   : > { %5441 = vmatprep.mubr.msk.f32.mxu1 %vm7948_vm2, %v3065_v30  ;;  %5500 = vmatprep.subr.msk.mxu0 %vm7950_vm1, %v3466_v26 }
 0x717   : > { %v3443_v52 = vpop.permute.xlu0 %3442  ;;  %5827 = vmatprep.subr.bf16.mxu1 %v7958_v36 }
 0x718   : > { %5442 = vmatmul.mubr.msk.f32.vlgmr.msra.gmra.mrb[50].mxu1 %vm7948_vm2, %v3067_v45  ;;  %v3445_v53 = vpop.permute.xlu1 %3444 }
 0x719   : > { %5444 = vmatprep.mubr.msk.f32.mxu1 %vm7948_vm2, %v3069_v49 }
 0x71b   : > { %v3073_v1 = vpop.permute.xlu0 %3072 }
 0x71c   : > { %5437 = vmatmul.mubr.f32.vlgmr.msra.gmra.mrb[68].mxu0 %v2986_v54  ;;  %5445 = vmatmul.mubr.msk.f32.gmra.mrb[52].mxu1 %vm7948_vm2, %v3071_v50  ;;  %v3075_v9 = vpop.permute.xlu1 %3074 }
 0x71d   : > { %5447 = vmatprep.mubr.msk.f32.mxu1 %vm7948_vm2, %v3073_v1  ;;  %5501 = vmatpush3.msk.msra.mxu0 %vm7950_vm1, %v3466_v26 }
 0x71e   : > { %5502 = vmatprep.mubr.msk.f32.mxu0 %vm7948_vm2, %v3435_v12  ;;  %5851 = vmatprep.subr.bf16.mxu0 %v7958_v36 }
 0x71f   : > { %v3447_v37 = vpop.permute.xlu0 %3446 }
 0x720   : > { %5448 = vmatmul.mubr.msk.f32.gmra.mrb[54].mxu1 %vm7948_vm2, %v3075_v9  ;;  %5503 = vmatmul.mubr.msk.f32.vlgmr.msra.gmra.mrb[70].mxu0 %vm7948_vm2, %v3437_v41  ;;  %v3449_v10 = vpop.permute.xlu1 %3448 }
 0x721   : > { %5505 = vmatprep.mubr.msk.f32.mxu0 %vm7948_vm2, %v3439_v47 }
 0x723   : > { %v3077_v22 = vpop.permute.xlu0 %3076 }
 0x724   : > { %5450 = vmatprep.mubr.msk.f32.mxu1 %vm7948_vm2, %v3077_v22  ;;  %5506 = vmatmul.mubr.msk.f32.gmra.mrb[72].mxu0 %vm7948_vm2, %v3441_v59  ;;  %v3079_v7 = vpop.permute.xlu1 %3078 }
 0x725   : > { %5451 = vmatmul.mubr.msk.f32.gmra.mrb[56].mxu1 %vm7948_vm2, %v3079_v7  ;;  %5508 = vmatprep.mubr.msk.f32.mxu0 %vm7948_vm2, %v3443_v52 }
 0x727   : > { %v3451_v56 = vpop.permute.xlu0 %3450 }
 0x728   : > { %5509 = vmatmul.mubr.msk.f32.gmra.mrb[74].mxu0 %vm7948_vm2, %v3445_v53  ;;  %v3453_v23 = vpop.permute.xlu1 %3452 }
 0x729   : > { %5511 = vmatprep.mubr.msk.f32.mxu0 %vm7948_vm2, %v3447_v37 }
 0x72b   : > { %v3081_v14 = vpop.permute.xlu0 %3080 }
 0x72c   : > { %5453 = vmatprep.mubr.msk.f32.mxu1 %vm7948_vm2, %v3081_v14  ;;  %5512 = vmatmul.mubr.msk.f32.gmra.mrb[76].mxu0 %vm7948_vm2, %v3449_v10  ;;  %v3083_v18 = vpop.permute.xlu1 %3082  ;;  %v401_v14 = vld [vmem:[%s7935_s5 + $0x38] sm:$0xff] }
 0x72d   : > { %5454 = vmatmul.mubr.msk.f32.gmra.mrb[58].mxu1 %vm7948_vm2, %v3083_v18  ;;  %5514 = vmatprep.mubr.msk.f32.mxu0 %vm7948_vm2, %v3451_v56  ;;  %v406_v56 = vld [vmem:[%s7937_s7] sm:$0xff]  ;;  %v408_v18 = vld [vmem:[%s7937_s7 + $0x10] sm:$0xff] }
 0x72f   : > { %v3455_v55 = vpop.permute.xlu0 %3454 }
 0x730   : > { %5515 = vmatmul.mubr.msk.f32.gmra.mrb[78].mxu0 %vm7948_vm2, %v3453_v23  ;;  %v3457_v17 = vpop.permute.xlu1 %3456  ;;  %v407_v23 = vld [vmem:[%s7937_s7 + $0x8] sm:$0xff] }
 0x731   : > { %5517 = vmatprep.mubr.msk.f32.mxu0 %vm7948_vm2, %v3455_v55  ;;  %v409_v55 = vld [vmem:[%s7937_s7 + $0x18] sm:$0xff] }
 0x733   : > { %v3085_v25 = vpop.permute.xlu0 %3084 }
 0x734   : > { %5456 = vmatprep.mubr.msk.f32.mxu1 %vm7948_vm2, %v3085_v25  ;;  %5518 = vmatmul.mubr.msk.f32.gmra.mrb[80].mxu0 %vm7948_vm2, %v3457_v17  ;;  %v3087_v5 = vpop.permute.xlu1 %3086 }
 0x735   : > { %5457 = vmatmul.mubr.msk.f32.gmra.mrb[60].mxu1 %vm7948_vm2, %v3087_v5 }
 0x737   : > { %v3459_v32 = vpop.permute.xlu0 %3458 }
 0x738   : > { %5520 = vmatprep.mubr.msk.f32.mxu0 %vm7948_vm2, %v3459_v32  ;;  %v3461_v6 = vpop.permute.xlu1 %3460 }
 0x739   : > { %5521 = vmatmul.mubr.msk.f32.gmra.mrb[82].mxu0 %vm7948_vm2, %v3461_v6 }
 0x73b   : > { %v3089_v31 = vpop.permute.xlu0 %3088 }
 0x73c   : > { %5459 = vmatprep.mubr.msk.f32.mxu1 %vm7948_vm2, %v3089_v31  ;;  %v3091_v24 = vpop.permute.xlu1 %3090 }
 0x73d   : > { %5460 = vmatmul.mubr.msk.f32.gmra.mrb[62].mxu1 %vm7948_vm2, %v3091_v24 }
 0x73f   : > { %v3463_v2 = vpop.permute.xlu0 %3462 }
 0x740   : > { %5523 = vmatprep.mubr.msk.f32.mxu0 %vm7948_vm2, %v3463_v2  ;;  %v3465_v13 = vpop.permute.xlu1 %3464 }
 0x741   : > { %5524 = vmatmul.mubr.msk.f32.gmra.mrb[84].mxu0 %vm7948_vm2, %v3465_v13 }
 0x742   : > { %5558 = vmatprep.mubr.msk.f32.mxu0 %vm6357_vm3, %v7959_v20 }
 0x743   : > { %v3093_v40 = vpop.permute.xlu0 %3092 }
 0x744   : > { %5462 = vmatprep.mubr.msk.f32.mxu1 %vm7948_vm2, %v3093_v40  ;;  %v3095_v11 = vpop.permute.xlu1 %3094 }
 0x745   : > { %5463 = vmatmul.mubr.msk.f32.gmra.mrb[64].mxu1 %vm7948_vm2, %v3095_v11 }
 0x746   : > { %5497 = vmatprep.mubr.msk.f32.mxu1 %vm6357_vm3, %v7959_v20 }
 0x7e7   : > { %v2680_v39 = vpop.f32.mrb[48].mxu1 }
 0x7e8   : > { %v5377_v28 = vpop.f32.mrb[49].mxu1  ;;  %6204 = vrcp.f32 %v2680_v39 }
 0x7eb   : > { %v7462_v4 = vpop.f32.mrb[50].mxu1 }
 0x7ec   : > { %v7464_v3 = vpop.f32.mrb[51].mxu1 }
 0x7ed   : > { %3276 = vmax.xlane.f32.xlu0 %v7464_v3 }
 0x7ef   : > { %v3053_v61 = vpop.f32.mrb[68].mxu0  ;;  %v7467_v38 = vpop.f32.mrb[52].mxu1 }
 0x7f0   : > { %6206 = vrcp.f32 %v3053_v61  ;;  %v5438_v8 = vpop.f32.mrb[69].mxu0  ;;  %v7469_v21 = vpop.f32.mrb[53].mxu1 }
 0x7f1   : > { %3278 = vmax.xlane.f32.xlu0 %v7462_v4 }
 0x7f2   : > { %v6205_v57 = vpop.eup %6204 }
 0x7f3   : > { %v7472_v19 = vpop.f32.mrb[54].mxu1  ;;  %v7474_v58 = vpop.f32.mrb[70].mxu0  ;;  %v2689_v30 = vrot.slane %v6205_v57, %v6955_v35 }
 0x7f4   : > { %3648 = vmax.xlane.f32.xlu1 %v7474_v58  ;;  %v7477_v12 = vpop.f32.mrb[55].mxu1  ;;  %v7479_v15 = vpop.f32.mrb[71].mxu0 }
 0x7f5   : > { %3280 = vmax.xlane.f32.xlu0 %v7469_v21  ;;  %v2690_v63 = vmul.f32 %v2689_v30, %v2680_v39 }
 0x7f7   : > { %v7482_v16 = vpop.f32.mrb[72].mxu0 }
 0x7f8   : > { %3652 = vmax.xlane.f32.xlu1 %v7482_v16  ;;  %v7485_v27 = vpop.f32.mrb[56].mxu1  ;;  %v7487_v41 = vpop.f32.mrb[73].mxu0 }
 0x7f9   : > { %3646 = vmax.xlane.f32.xlu0 %v7479_v15  ;;  %v7490_v33 = vpop.f32.mrb[57].mxu1 }
 0x7fa   : > { %v6207_v34 = vpop.eup %6206 }
 0x7fb   : > { %v3062_v42 = vrot.slane %v6207_v34, %v6955_v35  ;;  %v7494_v43 = vpop.f32.mrb[74].mxu0 }
 0x7fc   : > { %3282 = vmax.xlane.f32.xlu1 %v7467_v38  ;;  %v7497_v44 = vpop.f32.mrb[75].mxu0 }
 0x7fd   : > { %v3063_v45 = vmul.f32 %v3062_v42, %v3053_v61  ;;  %3284 = vmax.xlane.f32.xlu0 %v7477_v12 }
 0x7ff   : > { %v3814_v46 = vrot.slane %v3063_v45, 4  ;;  %v7500_v0 = vpop.f32.mrb[76].mxu0 }
 0x800   : > { %3656 = vmax.xlane.f32.xlu1 %v7494_v43  ;;  %v7503_v29 = vpop.f32.mrb[58].mxu1  ;;  %v7505_v47 = vpop.f32.mrb[77].mxu0 }
 0x801   : > { %3650 = vmax.xlane.f32.xlu0 %v7487_v41  ;;  %v7508_v48 = vpop.f32.mrb[59].mxu1  ;;  %v7511_v59 = vsel %vm7950_vm1, %v2690_v63, %v3814_v46 }
 0x803   : > { %v7513_v62 = vpop.f32.mrb[78].mxu0 }
 0x804   : > { %3286 = vmax.xlane.f32.xlu1 %v7472_v19  ;;  %v7516_v49 = vpop.f32.mrb[79].mxu0 }
 0x805   : > { %3288 = vmax.xlane.f32.xlu0 %v7490_v33 }
 0x807   : > { %v7519_v26 = vpop.f32.mrb[80].mxu0 }
 0x808   : > { %3660 = vmax.xlane.f32.xlu1 %v7500_v0  ;;  %v7522_v50 = vpop.f32.mrb[60].mxu1  ;;  %v7524_v51 = vpop.f32.mrb[81].mxu0 }
 0x809   : > { %3654 = vmax.xlane.f32.xlu0 %v7497_v44  ;;  %v7527_v52 = vpop.f32.mrb[61].mxu1 }
 0x80c   : > { %3290 = vmax.xlane.f32.xlu1 %v7485_v27  ;;  %v7530_v53 = vpop.f32.mrb[82].mxu0 }
 0x80d   : > { %3292 = vmax.xlane.f32.xlu0 %v7508_v48  ;;  %v7533_v54 = vpop.f32.mrb[83].mxu0 }
 0x810   : > { %3664 = vmax.xlane.f32.xlu1 %v7513_v62  ;;  %v7536_v1 = vpop.f32.mrb[62].mxu1 }
 0x811   : > { %3658 = vmax.xlane.f32.xlu0 %v7505_v47  ;;  %v7539_v9 = vpop.f32.mrb[63].mxu1 }
 0x814   : > { %3294 = vmax.xlane.f32.xlu1 %v7503_v29  ;;  %v7542_v37 = vpop.f32.mrb[84].mxu0 }
 0x815   : > { %3296 = vmax.xlane.f32.xlu0 %v7527_v52  ;;  %v7545_v10 = vpop.f32.mrb[85].mxu0 }
 0x818   : > { %3668 = vmax.xlane.f32.xlu1 %v7519_v26  ;;  %v7548_v22 = vpop.f32.mrb[64].mxu1 }
 0x819   : > { %3662 = vmax.xlane.f32.xlu0 %v7516_v49  ;;  %v7551_v7 = vpop.f32.mrb[65].mxu1 }
 0x81c   : > { %3298 = vmax.xlane.f32.xlu1 %v7522_v50 }
 0x81d   : > { %3300 = vmax.xlane.f32.xlu0 %v7539_v9 }
 0x820   : > { %3672 = vmax.xlane.f32.xlu1 %v7530_v53 }
 0x821   : > { %3666 = vmax.xlane.f32.xlu0 %v7524_v51 }
 0x824   : > { %3302 = vmax.xlane.f32.xlu1 %v7536_v1 }
 0x825   : > { %3304 = vmax.xlane.f32.xlu0 %v7551_v7 }
 0x828   : > { %3676 = vmax.xlane.f32.xlu1 %v7542_v37 }
 0x829   : > { %3670 = vmax.xlane.f32.xlu0 %v7533_v54 }
 0x82c   : > { %3306 = vmax.xlane.f32.xlu1 %v7548_v22 }
 0x82d   : > { %3674 = vmax.xlane.f32.xlu0 %v7545_v10 }
 0x83d   : > { %3825 = vperm.xlu1 %6003, %v406_v56  }
 0x841   : > { %3830 = vperm.xlu1 %6003, %v407_v23  }
 0x843   : > { %685 = vperm.xlu0 %6002, %v401_v14  }
 0x845   : > { %3835 = vperm.xlu1 %6003, %v408_v18  }
 0x847   : > { %3840 = vperm.xlu0 %6002, %v409_v55  }
 0x87a   : > { %v3277_v17 = vpop.xlane.xlu0 %3276 }
 0x87b   : > { %v3308_v25 = vsub.f32 %v7464_v3, %v3277_v17 }
 0x87d   : > { %v3324_v5 = vmul.f32 1.442695, %v3308_v25 }
 0x87e   : > { %v3279_v32 = vpop.xlane.xlu0 %3278 }
 0x87f   : > { %v3309_v6 = vsub.f32 %v7462_v4, %v3279_v32  ;;  %6208 = vpow2.f32 %v3324_v5 }
 0x881   : > { %v3326_v31 = vmul.f32 1.442695, %v3309_v6  ;;  %v3649_v24 = vpop.xlane.xlu1 %3648 }
 0x882   : > { %v3679_v2 = vsub.f32 %v7474_v58, %v3649_v24  ;;  %v3281_v13 = vpop.xlane.xlu0 %3280 }
 0x883   : > { %6210 = vpow2.f32 %v3326_v31  ;;  %v3310_v40 = vsub.f32 %v7469_v21, %v3281_v13 }
 0x884   : > { %v3696_v39 = vmul.f32 1.442695, %v3679_v2 }
 0x885   : > { %v3653_v11 = vpop.xlane.xlu1 %3652  ;;  %v3328_v8 = vmul.f32 1.442695, %v3310_v40 }
 0x886   : > { %v3647_v28 = vpop.xlane.xlu0 %3646  ;;  %6212 = vpow2.f32 %v3696_v39  ;;  %v3681_v4 = vsub.f32 %v7482_v16, %v3653_v11 }
 0x887   : > { %v3678_v61 = vsub.f32 %v7479_v15, %v3647_v28 }
 0x888   : > { %v3700_v46 = vmul.f32 1.442695, %v3681_v4 }
 0x889   : > { %v3694_v3 = vmul.f32 1.442695, %v3678_v61  ;;  %v3283_v57 = vpop.xlane.xlu1 %3282  ;;  %v6209_v58 = vpop.eup %6208 }
 0x88a   : > { %v3311_v34 = vsub.f32 %v7467_v38, %v3283_v57  ;;  %v3285_v30 = vpop.xlane.xlu0 %3284 }
 0x88b   : > { %6214 = vpow2.f32 %v3694_v3  ;;  %v3312_v21 = vsub.f32 %v7477_v12, %v3285_v30 }
 0x88c   : > { %v3330_v42 = vmul.f32 1.442695, %v3311_v34  ;;  %6216 = vpow2.f32 %v3328_v8 }
 0x88d   : > { %v6211_v45 = vpop.eup %6210  ;;  %v3657_v63 = vpop.xlane.xlu1 %3656  ;;  %v3332_v14 = vmul.f32 1.442695, %v3312_v21 }
 0x88e   : > { %6218 = vpow2.f32 %v3330_v42  ;;  %v3651_v15 = vpop.xlane.xlu0 %3650  ;;  %v5828_v56 = vpack.c.bf16 %v6211_v45, %v6209_v58  ;;  %v3683_v38 = vsub.f32 %v7494_v43, %v3657_v63 }
 0x88f   : > { %v3680_v23 = vsub.f32 %v7487_v41, %v3651_v15  ;;  %6220 = vpow2.f32 %v3700_v46 }
 0x890   : > { %5829 = vmatpush3.bf16.xpose.msra.mxu1 %v5828_v56  ;;  %v6213_v12 = vpop.eup %6212  ;;  %v3704_v6 = vmul.f32 1.442695, %v3683_v38 }
 0x891   : > { %v3698_v16 = vmul.f32 1.442695, %v3680_v23  ;;  %v3287_v18 = vpop.xlane.xlu1 %3286  ;;  %5830 = vmatprep.subr.bf16.mxu1 %v7958_v36 }
 0x892   : > { %v3313_v55 = vsub.f32 %v7472_v19, %v3287_v18  ;;  %v3289_v17 = vpop.xlane.xlu0 %3288 }
 0x893   : > { %6222 = vpow2.f32 %v3698_v16  ;;  %v3314_v32 = vsub.f32 %v7490_v33, %v3289_v17 }
 0x894   : > { %v3334_v25 = vmul.f32 1.442695, %v3313_v55  ;;  %6224 = vpow2.f32 %v3332_v14 }
 0x895   : > { %v6215_v5 = vpop.eup %6214  ;;  %v3661_v41 = vpop.xlane.xlu1 %3660  ;;  %v3336_v43 = vmul.f32 1.442695, %v3314_v32 }
 0x896   : > { %6226 = vpow2.f32 %v3334_v25  ;;  %v3655_v31 = vpop.xlane.xlu0 %3654  ;;  %v5852_v24 = vpack.c.bf16 %v6213_v12, %v6215_v5  ;;  %v6217_v2 = vpop.eup %6216  ;;  %v3685_v28 = vsub.f32 %v7500_v0, %v3661_v41 }
 0x897   : > { %v3682_v13 = vsub.f32 %v7497_v44, %v3655_v31  ;;  %6228 = vpow2.f32 %v3704_v6 }
 0x898   : > { %v6219_v40 = vpop.eup %6218  ;;  %5853 = vmatpush3.bf16.xpose.msra.mxu0 %v5852_v24  ;;  %v3708_v34 = vmul.f32 1.442695, %v3685_v28 }
 0x899   : > { %v3702_v19 = vmul.f32 1.442695, %v3682_v13  ;;  %v3291_v11 = vpop.xlane.xlu1 %3290  ;;  %v5831_v39 = vpack.c.bf16 %v6219_v40, %v6217_v2  ;;  %5854 = vmatprep.subr.bf16.mxu0 %v7958_v36  ;;  %v6221_v8 = vpop.eup %6220 }
 0x89a   : > { %v3315_v33 = vsub.f32 %v7485_v27, %v3291_v11  ;;  %v3293_v61 = vpop.xlane.xlu0 %3292 }
 0x89b   : > { %6230 = vpow2.f32 %v3702_v19  ;;  %5832 = vmatpush3.bf16.xpose.msra.mxu1 %v5831_v39  ;;  %v3316_v57 = vsub.f32 %v7508_v48, %v3293_v61 }
 0x89c   : > { %v3338_v3 = vmul.f32 1.442695, %v3315_v33  ;;  %5833 = vmatprep.subr.bf16.mxu1 %v7958_v36  ;;  %6232 = vpow2.f32 %v3336_v43 }
 0x89d   : > { %v6223_v44 = vpop.eup %6222  ;;  %v3665_v4 = vpop.xlane.xlu1 %3664  ;;  %v3340_v45 = vmul.f32 1.442695, %v3316_v57 }
 0x89e   : > { %6234 = vpow2.f32 %v3338_v3  ;;  %v3659_v30 = vpop.xlane.xlu0 %3658  ;;  %v5855_v58 = vpack.c.bf16 %v6221_v8, %v6223_v44  ;;  %v6225_v42 = vpop.eup %6224  ;;  %v3687_v15 = vsub.f32 %v7513_v62, %v3665_v4 }
 0x89f   : > { %v3684_v0 = vsub.f32 %v7505_v47, %v3659_v30  ;;  %6236 = vpow2.f32 %v3708_v34 }
 0x8a0   : > { %v6227_v27 = vpop.eup %6226  ;;  %5856 = vmatpush3.bf16.xpose.msra.mxu0 %v5855_v58  ;;  %v3712_v38 = vmul.f32 1.442695, %v3687_v15 }
 0x8a1   : > { %v3706_v21 = vmul.f32 1.442695, %v3684_v0  ;;  %v3295_v63 = vpop.xlane.xlu1 %3294  ;;  %v5834_v46 = vpack.c.bf16 %v6227_v27, %v6225_v42  ;;  %5857 = vmatprep.subr.bf16.mxu0 %v7958_v36  ;;  %v6229_v23 = vpop.eup %6228 }
 0x8a2   : > { %v3317_v48 = vsub.f32 %v7503_v29, %v3295_v63  ;;  %v3297_v56 = vpop.xlane.xlu0 %3296 }
 0x8a3   : > { %6238 = vpow2.f32 %v3706_v21  ;;  %5835 = vmatpush3.bf16.xpose.msra.mxu1 %v5834_v46  ;;  %v3318_v16 = vsub.f32 %v7527_v52, %v3297_v56 }
 0x8a4   : > { %v3342_v14 = vmul.f32 1.442695, %v3317_v48  ;;  %5836 = vmatprep.subr.bf16.mxu1 %v7958_v36  ;;  %6240 = vpow2.f32 %v3340_v45 }
 0x8a5   : > { %v6231_v47 = vpop.eup %6230  ;;  %v3669_v18 = vpop.xlane.xlu1 %3668  ;;  %v3344_v25 = vmul.f32 1.442695, %v3318_v16 }
 0x8a6   : > { %6242 = vpow2.f32 %v3342_v14  ;;  %v3663_v55 = vpop.xlane.xlu0 %3662  ;;  %v5858_v17 = vpack.c.bf16 %v6229_v23, %v6231_v47  ;;  %v6233_v12 = vpop.eup %6232  ;;  %v3689_v6 = vsub.f32 %v7519_v26, %v3669_v18 }
 0x8a7   : > { %v3686_v62 = vsub.f32 %v7516_v49, %v3663_v55  ;;  %6244 = vpow2.f32 %v3712_v38 }
 0x8a8   : > { %v6235_v29 = vpop.eup %6234  ;;  %5859 = vmatpush3.bf16.xpose.msra.mxu0 %v5858_v17  ;;  %v3716_v43 = vmul.f32 1.442695, %v3689_v6  ;;  %v7962_v6 = vld [vmem:[#allocation7_spill] sm:$0xff] }
 0x8a9   : > { %v3710_v5 = vmul.f32 1.442695, %v3686_v62  ;;  %v3299_v32 = vpop.xlane.xlu1 %3298  ;;  %v5837_v41 = vpack.c.bf16 %v6235_v29, %v6233_v12  ;;  %5860 = vmatprep.subr.bf16.mxu0 %v7958_v36  ;;  %v6237_v24 = vpop.eup %6236 }
 0x8aa   : > { %v3319_v52 = vsub.f32 %v7522_v50, %v3299_v32  ;;  %v3301_v31 = vpop.xlane.xlu0 %3300 }
 0x8ab   : > { %6246 = vpow2.f32 %v3710_v5  ;;  %5838 = vmatpush3.bf16.xpose.msra.mxu1 %v5837_v41  ;;  %v3320_v13 = vsub.f32 %v7539_v9, %v3301_v31 }
 0x8ac   : > { %v3346_v2 = vmul.f32 1.442695, %v3319_v52  ;;  %5839 = vmatprep.subr.bf16.mxu1 %v7958_v36  ;;  %6248 = vpow2.f32 %v3344_v25 }
 0x8ad   : > { %v6239_v49 = vpop.eup %6238  ;;  %v3673_v40 = vpop.xlane.xlu1 %3672  ;;  %v3348_v28 = vmul.f32 1.442695, %v3320_v13 }
 0x8ae   : > { %6250 = vpow2.f32 %v3346_v2  ;;  %v3667_v19 = vpop.xlane.xlu0 %3666  ;;  %v5861_v11 = vpack.c.bf16 %v6237_v24, %v6239_v49  ;;  %v6241_v39 = vpop.eup %6240  ;;  %v3691_v3 = vsub.f32 %v7530_v53, %v3673_v40  ;;  %v7963_v49 = vlaneseq  ;;  %v7964_v40 = vld [vmem:[#allocation9_spill] sm:$0xff] }
 0x8af   : > { %v3688_v26 = vsub.f32 %v7524_v51, %v3667_v19  ;;  %6252 = vpow2.f32 %v3716_v43  ;;  %v414_v43 = vadd.s32 8, %v7964_v40 }
 0x8b0   : > { %v6243_v50 = vpop.eup %6242  ;;  %5862 = vmatpush3.bf16.xpose.msra.mxu0 %v5861_v11  ;;  %v3720_v58 = vmul.f32 1.442695, %v3691_v3  ;;  %v7634_v13 = vand.u32 127, %v7963_v49  ;;  %v420_v3 = vadd.s32 56, %v7964_v40  ;;  %v6286_v49 = vld [vmem:[%s6488_s26 + $0x18] sm:$0xff] }
 0x8b1   : > { %v3714_v33 = vmul.f32 1.442695, %v3688_v26  ;;  %v3303_v61 = vpop.xlane.xlu1 %3302  ;;  %v5840_v8 = vpack.c.bf16 %v6243_v50, %v6241_v39  ;;  %5863 = vmatprep.subr.bf16.mxu0 %v7958_v36  ;;  %v6245_v57 = vpop.eup %6244  ;;  %v416_v26 = vadd.s32 24, %v7964_v40  ;;  %v417_v50 = vadd.s32 32, %v7964_v40 }
 0x8b2   : > { %v3321_v9 = vsub.f32 %v7536_v1, %v3303_v61  ;;  %v3305_v44 = vpop.xlane.xlu0 %3304  ;;  %v7638_v19 = vmul.u32 32, %v7634_v13  ;;  %v448_v11 = vadd.s32 1, %v7634_v13  ;;  %v419_v61 = vadd.s32 48, %v7964_v40 }
 0x8b3   : > { %6254 = vpow2.f32 %v3714_v33  ;;  %5841 = vmatpush3.bf16.xpose.msra.mxu1 %v5840_v8  ;;  %v3322_v51 = vsub.f32 %v7551_v7, %v3305_v44  ;;  %v6363_v8 = vmov 1.0|1.0   ;;  %v421_v44 = vadd.s32 64, %v7964_v40 }
 0x8b4   : > { %v3350_v4 = vmul.f32 1.442695, %v3321_v9  ;;  %5842 = vmatprep.subr.bf16.mxu1 %v7958_v36  ;;  %6256 = vpow2.f32 %v3348_v28  ;;  %vm432_vm4 = vcmp.ge.s32.totalorder %v7964_v40, %v7638_v19  ;;  %v7644_v39 = vmul.u32 32, %v448_v11 }
 0x8b5   : > { %v6247_v34 = vpop.eup %6246  ;;  %v3677_v30 = vpop.xlane.xlu1 %3676  ;;  %v3352_v21 = vmul.f32 1.442695, %v3322_v51  ;;  %vm433_vm5 = vcmp.ge.s32.totalorder %v414_v43, %v7638_v19  ;;  %v418_v28 = vadd.s32 40, %v7964_v40  ;;  %vm435_vm12 = vcmp.ge.s32.totalorder %v416_v26, %v7638_v19 }
 0x8b6   : > { %6258 = vpow2.f32 %v3350_v4  ;;  %v3693_v42 = vsub.f32 %v7542_v37, %v3677_v30  ;;  %v3671_v0 = vpop.xlane.xlu0 %3670  ;;  %v5864_v53 = vpack.c.bf16 %v6245_v57, %v6247_v34  ;;  %v6249_v27 = vpop.eup %6248  ;;  %vm450_vm6 = vcmp.lt.s32.totalorder %v7964_v40, %v7644_v39 }
 0x8b7   : > { %v3690_v1 = vsub.f32 %v7533_v54, %v3671_v0  ;;  %6260 = vpow2.f32 %v3720_v58  ;;  %vm451_vm7 = vcmp.lt.s32.totalorder %v414_v43, %v7644_v39  ;;  %vm466_vm8 = vmand %vm432_vm4, %vm450_vm6  ;;  %vm453_vm13 = vcmp.lt.s32.totalorder %v416_v26, %v7644_v39 }
 0x8b8   : > { %v6251_v45 = vpop.eup %6250  ;;  %5865 = vmatpush3.bf16.xpose.msra.mxu0 %v5864_v53  ;;  %v3724_v63 = vmul.f32 1.442695, %v3693_v42  ;;  %vm467_vm11 = vmand %vm433_vm5, %vm451_vm7  ;;  %vm436_vm3 = vcmp.ge.s32.totalorder %v417_v50, %v7638_v19  ;;  %vm454_vm4 = vcmp.lt.s32.totalorder %v417_v50, %v7644_v39  ;;  %vm437_vm6 = vcmp.ge.s32.totalorder %v418_v28, %v7638_v19 }
 0x8b9   : > { %v3718_v46 = vmul.f32 1.442695, %v3690_v1  ;;  %v3307_v7 = vpop.xlane.xlu1 %3306  ;;  %v5843_v15 = vpack.c.bf16 %v6251_v45, %v6249_v27  ;;  %5866 = vmatprep.subr.bf16.mxu0 %v7958_v36  ;;  %v6253_v23 = vpop.eup %6252  ;;  %vm7657_vm14 = vmpackc.low %vm467_vm11, %vm466_vm8  ;;  %vm455_vm7 = vcmp.lt.s32.totalorder %v418_v28, %v7644_v39  ;;  %vm456_vm11 = vcmp.lt.s32.totalorder %v419_v61, %v7644_v39 }
 0x8ba   : > { %v3323_v48 = vsub.f32 %v7548_v22, %v3307_v7  ;;  %v3675_v56 = vpop.xlane.xlu0 %3674  ;;  %vm469_vm5 = vmand %vm435_vm12, %vm453_vm13  ;;  %v422_v57 = vadd.s32 72, %v7964_v40  ;;  %vm439_vm13 = vcmp.ge.s32.totalorder %v420_v3, %v7638_v19  ;;  %v423_v51 = vadd.s32 80, %v7964_v40 }
 0x8bb   : > { %6262 = vpow2.f32 %v3718_v46  ;;  %v3692_v37 = vsub.f32 %v7545_v10, %v3675_v56  ;;  %5844 = vmatpush3.bf16.xpose.msra.mxu1 %v5843_v15  ;;  %vm471_vm12 = vmand %vm437_vm6, %vm455_vm7  ;;  %vm458_vm6 = vcmp.lt.s32.totalorder %v421_v44, %v7644_v39  ;;  %v424_v34 = vadd.s32 88, %v7964_v40 }
 0x8bc   : > { %6264 = vpow2.f32 %v3352_v21  ;;  %v3354_v54 = vmul.f32 1.442695, %v3323_v48  ;;  %5845 = vmatprep.subr.bf16.mxu1 %v7958_v36  ;;  %vm441_vm2 = vcmp.ge.s32.totalorder %v422_v57, %v7638_v19  ;;  %v425_v58 = vadd.s32 96, %v7964_v40 }
 0x8bd   : > { %v6255_v14 = vpop.eup %6254  ;;  %6266 = vpow2.f32 %v3724_v63  ;;  %v3722_v47 = vmul.f32 1.442695, %v3692_v37  ;;  %v426_v0 = vadd.s32 104, %v7964_v40  ;;  %v516_v26 = vadd.s32 1, %v7964_v40 }
 0x8be   : > { %6268 = vpow2.f32 %v3354_v54  ;;  %v5867_v16 = vpack.c.bf16 %v6253_v23, %v6255_v14  ;;  %v6257_v18 = vpop.eup %6256  ;;  %v514_v50 = vmul.u32 32, %v7964_v40 }
 0x8bf   : > { %6270 = vpow2.f32 %v3722_v47  ;;  %v403_v47 = vld [vmem:[%s7936_s6 + $0x8] sm:$0xff]  ;;  %v517_v28 = vmul.u32 32, %v516_v26 }
 0x8c0   : > { %v6259_v38 = vpop.eup %6258  ;;  %5868 = vmatpush3.bf16.xpose.msra.mxu0 %v5867_v16  ;;  %v404_v16 = vld [vmem:[%s7936_s6 + $0x10] sm:$0xff] }
 0x8c1   : > { %v5846_v22 = vpack.c.bf16 %v6259_v38, %v6257_v18  ;;  %5869 = vmatprep.subr.bf16.mxu0 %v7958_v36  ;;  %v6261_v10 = vpop.eup %6260  ;;  %v428_v18 = vadd.s32 120, %v7964_v40  ;;  %v3826_v38 = vpop.permute.xlu1 %3825 }
 0x8c2   : > { %v686_v32 = vpop.permute.xlu0 %685 }
 0x8c3   : > { %5847 = vmatpush3.bf16.xpose.msra.mxu1 %v5846_v22  ;;  %v814_v52 = vadd.f32 %v7962_v6, %v686_v32 }
 0x8c4   : > { %5848 = vmatprep.subr.bf16.mxu1 %v7958_v36 }
 0x8c5   : > { %v6263_v55 = vpop.eup %6262  ;;  %v3356_v31 = vsel %vm7950_vm1, %v814_v52, 1.0  ;;  %v3727_v24 = vrot.slane %v814_v52, 4  ;;  %v3831_v22 = vpop.permute.xlu1 %3830 }
 0x8c6   : > { %v6265_v17 = vpop.eup %6264  ;;  %v5870_v12 = vpack.c.bf16 %v6261_v10, %v6263_v55 }
 0x8c7   : > { %v6267_v62 = vpop.eup %6266  ;;  %v3729_v2 = vsel %vm7950_vm1, %v3727_v24, 1.0 }
 0x8c8   : > { %v6269_v29 = vpop.eup %6268  ;;  %5871 = vmatpush3.bf16.xpose.msra.mxu0 %v5870_v12 }
 0x8c9   : > { %v6271_v25 = vpop.eup %6270  ;;  %v5849_v5 = vpack.c.bf16 %v6269_v29, %v6265_v17  ;;  %5872 = vmatprep.subr.bf16.mxu0 %v7958_v36  ;;  %v402_v36 = vld [vmem:[%s7936_s6] sm:$0xff]  ;;  %v3836_v6 = vpop.permute.xlu1 %3835 }
 0x8ca   : > { %v5873_v41 = vpack.c.bf16 %v6267_v62, %v6271_v25  ;;  %v6284_v62 = vld [vmem:[%s6488_s26 + $0x8] sm:$0xff]  ;;  %v3841_v25 = vpop.permute.xlu0 %3840 }
 0x8cb   : > { %5850 = vmatpush3.bf16.xpose.msra.mxu1 %v5849_v5  ;;  %v6285_v5 = vld [vmem:[%s6488_s26] sm:$0xff] }
 0x8cc   : > { %5876 = vmatprep.subr.bf16.mxu1 %v7247_v60 }
 0x8d0   : > { %5874 = vmatpush3.bf16.xpose.msra.mxu0 %v5873_v41 }
 0x8d1   : > { %5916 = vmatprep.subr.msk.bf16.mxu0 %vm7657_vm14, %v6363_v8 }
 0x8d2   : > { %5498 = vmatmul.mubr.f32.vlgmr.msra.gmra.mrb[66].mxu1 %v3356_v31 }
 0x8d3   : > { %5878 = vmatpush3.bf16.msra.mxu1 %v7247_v60  ;;  %5569 = vmatprep.mubr.msk.f32.mxu1 %vm7949_vm0, %v402_v36  ;;  %v415_v60 = vadd.s32 16, %v7964_v40  ;;  %vm460_vm0 = vcmp.lt.s32.totalorder %v423_v51, %v7644_v39 }
 0x8d5   : > { %vm434_vm9 = vcmp.ge.s32.totalorder %v415_v60, %v7638_v19  ;;  %vm452_vm10 = vcmp.lt.s32.totalorder %v415_v60, %v7644_v39 }
 0x8d6   : > { %vm468_vm15 = vmand %vm434_vm9, %vm452_vm10  ;;  %vm438_vm10 = vcmp.ge.s32.totalorder %v419_v61, %v7638_v19 }
 0x8d7   : > { %5559 = vmatmul.mubr.f32.vlgmr.msra.gmra.mrb[86].mxu0 %v3729_v2  ;;  %vm7673_vm8 = vmpackc.low %vm469_vm5, %vm468_vm15  ;;  %vm457_vm15 = vcmp.lt.s32.totalorder %v420_v3, %v7644_v39 }
 0x8d8   : > { %5918 = vmatpush3.bf16.msk.msra.mxu0 %vm7657_vm14, %v6363_v8  ;;  %vm470_vm9 = vmand %vm436_vm3, %vm454_vm4  ;;  %vm440_vm4 = vcmp.ge.s32.totalorder %v421_v44, %v7638_v19 }
 0x8d9   : > { %5920 = vmatprep.subr.msk.bf16.mxu0 %vm7673_vm8, %v6363_v8  ;;  %vm7689_vm5 = vmpackc.low %vm471_vm12, %vm470_vm9  ;;  %vm459_vm9 = vcmp.lt.s32.totalorder %v422_v57, %v7644_v39 }
 0x8da   : > { %vm472_vm3 = vmand %vm438_vm10, %vm456_vm11  ;;  %vm442_vm11 = vcmp.ge.s32.totalorder %v423_v51, %v7638_v19 }
 0x8db   : > { %vm473_vm7 = vmand %vm439_vm13, %vm457_vm15  ;;  %vm443_vm15 = vcmp.ge.s32.totalorder %v424_v34, %v7638_v19 }
 0x8dc   : > { %5922 = vmatpush3.bf16.msk.msra.mxu0 %vm7673_vm8, %v6363_v8  ;;  %vm7702_vm12 = vmpackc.low %vm473_vm7, %vm472_vm3  ;;  %vm461_vm3 = vcmp.lt.s32.totalorder %v424_v34, %v7644_v39 }
 0x8dd   : > { %5924 = vmatprep.subr.msk.bf16.mxu0 %vm7689_vm5, %v6363_v8  ;;  %vm474_vm10 = vmand %vm440_vm4, %vm458_vm6 }
 0x8de   : > { %vm475_vm13 = vmand %vm441_vm2, %vm459_vm9  ;;  %vm444_vm2 = vcmp.ge.s32.totalorder %v425_v58, %v7638_v19  ;;  %vm462_vm9 = vcmp.lt.s32.totalorder %v425_v58, %v7644_v39 }
 0x8df   : > { %vm7717_vm7 = vmpackc.low %vm475_vm13, %vm474_vm10  ;;  %vm445_vm10 = vcmp.ge.s32.totalorder %v426_v0, %v7638_v19  ;;  %vm463_vm13 = vcmp.lt.s32.totalorder %v426_v0, %v7644_v39 }
 0x8e0   : > { %5926 = vmatpush3.bf16.msk.msra.mxu0 %vm7689_vm5, %v6363_v8  ;;  %vm476_vm4 = vmand %vm442_vm11, %vm460_vm0 }
 0x8e1   : > { %5928 = vmatprep.subr.msk.bf16.mxu0 %vm7702_vm12, %v6363_v8  ;;  %vm477_vm6 = vmand %vm443_vm15, %vm461_vm3  ;;  %vm7979_vm3 = vcmask 1043456  }
 0x8e2   : > { %vm7732_vm1 = vmpackc.low %vm477_vm6, %vm476_vm4  ;;  %vm7980_vm4 = vcmask 261120  }
 0x8e3   : > { %vm478_vm0 = vmand %vm444_vm2, %vm462_vm9 }
 0x8e4   : > { %5930 = vmatpush3.bf16.msk.msra.mxu0 %vm7702_vm12, %v6363_v8  ;;  %vm479_vm11 = vmand %vm445_vm10, %vm463_vm13  ;;  %vm515_vm10 = vcmp.ge.s32.totalorder %v7634_v13, %v514_v50  ;;  %vm518_vm13 = vcmp.lt.s32.totalorder %v7634_v13, %v517_v28 }
 0x8e5   : > { %5932 = vmatprep.subr.msk.bf16.mxu0 %vm7717_vm7, %v6363_v8  ;;  %vm7745_vm15 = vmpackc.low %vm479_vm11, %vm478_vm0 }
 0x8e6   : > { %vm7981_vm6 = vmmov %vm7980_vm4 }
 0x8e7   : > { %vm7982_vm2 = vmmov %vm7980_vm4 }
 0x8e8   : > { %5934 = vmatpush3.bf16.msk.msra.mxu0 %vm7717_vm7, %v6363_v8  ;;  %vm519_vm0 = vmand %vm515_vm10, %vm518_vm13 }
 0x8e9   : > { %5936 = vmatprep.subr.msk.bf16.mxu0 %vm7732_vm1, %v6363_v8  ;;  %v4484_v33 = vsel %vm519_vm0, 1.0, %v7959_v20  ;;  %vm7983_vm11 = vmmov %vm7979_vm3 }
 0x8ec   : > { %5938 = vmatpush3.bf16.msk.msra.mxu0 %vm7732_vm1, %v6363_v8 }
 0x8ed   : > { %5940 = vmatprep.subr.msk.bf16.mxu0 %vm7745_vm15, %v6363_v8 }
 0x8f0   : > { %5942 = vmatpush3.bf16.msk.msra.mxu0 %vm7745_vm15, %v6363_v8 }
 0x9a5   : > { %v3423_v1 = vpop.f32.mrb[66].mxu1 }
 0x9a6   : > { %v5499_v45 = vpop.f32.mrb[67].mxu1  ;;  %6272 = vrcp.f32 %v3423_v1 }
 0x9aa   : > { %v3796_v21 = vpop.f32.mrb[86].mxu0 }
 0x9ab   : > { %6274 = vrcp.f32 %v3796_v21  ;;  %v5560_v63 = vpop.f32.mrb[87].mxu0 }
 0x9b0   : > { %v6273_v46 = vpop.eup %6272 }
 0x9b1   : > { %v3432_v15 = vrot.slane %v6273_v46, %v6955_v35 }
 0x9b3   : > { %v3433_v37 = vmul.f32 %v3432_v15, %v3423_v1 }
 0x9b5   : > { %v6275_v7 = vpop.eup %6274 }
 0x9b6   : > { %v3805_v48 = vrot.slane %v6275_v7, %v6955_v35  ;;  %v405_v35 = vld [vmem:[%s7936_s6 + $0x18] sm:$0xff] }
 0x9b8   : > { %v3806_v56 = vmul.f32 %v3805_v48, %v3796_v21 }
 0x9ba   : > { %v3817_v23 = vrot.slane %v3806_v56, 4 }
 0x9bc   : > { %v3822_v54 = vsel %vm7979_vm3, %v3433_v37, %v3817_v23 }
 0x9bd   : > { %v5879_v14 = vpack.c.bf16 %v3822_v54, %v7511_v59  ;;  %v427_v59 = vadd.s32 112, %v7964_v40 }
 0x9bf   : > { %5880 = vmatprep.subr.bf16.mxu1 %v5879_v14 }
 0x9c0   : > { %5882 = vmatpush3.bf16.msra.mxu1 %v5879_v14 }
 0x9c1   : > { %5884 = vmatprep.subr.msk.bf16.mxu1 %vm7657_vm14, %v6363_v8 }
 0x9c3   : > { %5570 = vmatmul.mubr.msk.f32.vlgmr.msra.gmra.mrb[68].mxu1 %vm7980_vm4, %v403_v47  ;;  %vm7985_vm4 = vmmov %vm7979_vm3 }
 0x9c4   : > { %5572 = vmatprep.mubr.msk.f32.mxu1 %vm7981_vm6, %v404_v16  ;;  %5886 = vmatpush3.bf16.msk.msra.mxu1 %vm7657_vm14, %v6363_v8  ;;  %vm446_vm14 = vcmp.ge.s32.totalorder %v427_v59, %v7638_v19  ;;  %vm7986_vm6 = vmmov %vm7979_vm3 }
 0x9c5   : > { %5888 = vmatprep.subr.msk.bf16.mxu1 %vm7673_vm8, %v6363_v8 }
 0x9c7   : > { %5573 = vmatmul.mubr.msk.f32.gmra.mrb[70].mxu1 %vm7982_vm2, %v405_v35  ;;  %vm7987_vm2 = vcmask 31744  }
 0x9c8   : > { %5890 = vmatpush3.bf16.msk.msra.mxu1 %vm7673_vm8, %v6363_v8  ;;  %vm447_vm8 = vcmp.ge.s32.totalorder %v428_v18, %v7638_v19  ;;  %v6287_v19 = vld [vmem:[%s6488_s26 + $0x10] sm:$0xff]  ;;  %vm7995_vm10 = vmmov %vm7987_vm2  ;;  %s365_s26 = sand.u32 1, %s6342_s14  }
 0x9c9   : > { %5892 = vmatprep.subr.msk.bf16.mxu1 %vm7689_vm5, %v6363_v8  ;;  %s4463_s29 = sshll.u32 %s365_s26, 5  ;;  %s7889_s25 = scalar_lea.sflag [#allocation3], %s365_s26 }
 0x9ca   : > { %s367_s11 = scalar_lea.vmem [#allocation2], %s4463_s29  ;;  %s6292_s29 = sshll.u32 %s6364_s28, 4  ;;  %s6293_s29 = int_to_ptr.vmem [resolvable:$false] %s6292_s29 }
 0x9cb   : > { %s4385_s22 = sshll.u32 %s367_s11, 4  ;;  %s6294_s30 = scalar_lea.vmem %s6293_s29, 1024  ;;  %s7880_s22 = int_to_ptr.vmem [resolvable:$true] %s4385_s22 }
 0x9cc   : > { %5894 = vmatpush3.bf16.msk.msra.mxu1 %vm7689_vm5, %v6363_v8  ;;  %vm464_vm5 = vcmp.lt.s32.totalorder %v427_v59, %v7644_v39  ;;  %s6288_s17 = scalar_lea.vmem %s7880_s22, 512  ;;  %p6295_p0 = scmp.lt.s32.totalorder %s7880_s22, %s6293_s29 }
 0x9cd   : > { %5896 = vmatprep.subr.msk.bf16.mxu1 %vm7702_vm12, %v6363_v8  ;;  %p6289_p11 = scmp.ne.s32.totalorder %s7880_s22, %s6288_s17  ;;  %p6296_p1 = scmp.lt.s32.totalorder %s6294_s30, %s6288_s17 }
 0x9cf   : > { %p6290_p12 = pnand %p6289_p11, %p6460_p5  ;;  %p6297_p2 = por %p6296_p1, %p6295_p0 }
 0x9d0   : > { %5898 = vmatpush3.bf16.msk.msra.mxu1 %vm7702_vm12, %v6363_v8  ;;  %vm480_vm12 = vmand %vm446_vm14, %vm464_vm5 }
 0x9d1   : > { %5900 = vmatprep.subr.msk.bf16.mxu1 %vm7717_vm7, %v6363_v8  ;;  %vm7988_vm14 = vmmov %vm7987_vm2  ;;  %p6291_p13 = pneg %p6290_p12 }
 0x9d2   : > { %vm7990_vm5 = vmmov %vm7987_vm2 }
 0x9d3   : > { %p6298_p3 = pnand %p6297_p2, %p6291_p13 }
 0x9d4   : > { %5902 = vmatpush3.bf16.msk.msra.mxu1 %vm7717_vm7, %v6363_v8 }
 0x9d5   : > { %5904 = vmatprep.subr.msk.bf16.mxu1 %vm7732_vm1, %v6363_v8 }
 0x9d8   : > { %5906 = vmatpush3.bf16.msk.msra.mxu1 %vm7732_vm1, %v6363_v8  ;;  %vm465_vm1 = vcmp.lt.s32.totalorder %v428_v18, %v7644_v39 }
 0x9d9   : > { %5908 = vmatprep.subr.msk.bf16.mxu1 %vm7745_vm15, %v6363_v8  ;;  %vm481_vm7 = vmand %vm447_vm8, %vm465_vm1 }
 0x9da   : > { %vm5911_vm9 = vmpackc.low %vm481_vm7, %vm480_vm12 }
 0x9db   : > { %5944 = vmatprep.subr.msk.bf16.mxu0 %vm5911_vm9, %v6363_v8  ;;  %vm7989_vm8 = vmmov %vm7987_vm2 }
 0x9dc   : > { %5910 = vmatpush3.bf16.msk.msra.mxu1 %vm7745_vm15, %v6363_v8  ;;  %5946 = vmatpush3.bf16.msk.msra.mxu0 %vm5911_vm9, %v6363_v8  ;;  %vm7984_vm15 = vmmov %vm7979_vm3 }
 0x9dd   : > { %5912 = vmatprep.subr.msk.bf16.mxu1 %vm5911_vm9, %v6363_v8  ;;  %5651 = vmatprep.subr.msk.mxu0 %vm7983_vm11, %v4484_v33  ;;  %vm7991_vm1 = vmmov %vm7979_vm3 }
 0x9de   : > { %vm7992_vm12 = vmmov %vm7987_vm2 }
 0x9df   : > { %vm7993_vm7 = vmmov %vm7987_vm2 }
 0x9e0   : > { %5914 = vmatpush3.bf16.msk.msra.mxu1 %vm5911_vm9, %v6363_v8  ;;  %vm7994_vm9 = vmmov %vm7987_vm2 }
 0x9e1   : > { %5947 = vmatprep.subr.msk.mxu1 %vm7984_vm15, %v4484_v33 }
 0xa96   : > { %v5571_v10 = vpop.f32.mrb[68].mxu1 }
 0xa97   : > { %v3927_v55 = vadd.f32 %v5571_v10, %v3831_v22  ;;  %v3921_v17 = vpop.f32.mrb[69].mxu1  ;;  %v4679_v10 = vld [vmem:[%s7938_s8] ss:$0 sm:$0xff] }
 0xa98   : > { %v3922_v12 = vadd.f32 %v3921_v17, %v3826_v38 }
 0xa99   : > { %v7824_v29 = vadd.f32 %v6284_v62, %v3927_v55  ;;  %v4680_v62 = vld [vmem:[%s7939_s9] ss:$0 sm:$0xff] }
 0xa9a   : > { %v7827_v32 = vadd.f32 %v6285_v5, %v3922_v12  ;;  %v5574_v41 = vpop.f32.mrb[70].mxu1 }
 0xa9b   : > { %v3937_v52 = vadd.f32 %v5574_v41, %v3841_v25  ;;  %v3931_v31 = vpop.f32.mrb[71].mxu1  ;;  %v4030_v36 = vmul.f32 %v7824_v29, %v7824_v29 }
 0xa9c   : > { %v3932_v24 = vadd.f32 %v3931_v31, %v3836_v6  ;;  %5607 = vmatprep.mubr.f32.mxu1 %v7827_v32  ;;  %v4029_v2 = vmul.f32 %v7827_v32, %v7827_v32 }
 0xa9d   : > { %v7835_v43 = vadd.f32 %v6286_v49, %v3937_v52  ;;  %5608 = vmatmul.mubr.f32.vlgmr.msra.gmra.mrb[72].mxu1 %v7824_v29 }
 0xa9e   : > { %v7839_v11 = vadd.f32 %v6287_v19, %v3932_v24  ;;  %5645 = vmatprep.mubr.f32.mxu0 %v4029_v2  ;;  %5948 = vmatpush3.msk.msra.mxu1 %vm7985_vm4, %v4484_v33 }
 0xa9f   : > { %5646 = vmatmul.mubr.f32.vlgmr.msra.gmra.mrb[88].mxu0 %v4030_v36  ;;  %v4032_v39 = vmul.f32 %v7835_v43, %v7835_v43  ;;  %5659 = vmatprep.subr.msk.mxu1 %vm7986_vm6, %v4484_v33 }
 0xaa0   : > { %5610 = vmatprep.mubr.f32.mxu1 %v7839_v11  ;;  %v4031_v60 = vmul.f32 %v7839_v11, %v7839_v11  ;;  %5652 = vmatpush3.msk.msra.mxu0 %vm7979_vm3, %v4484_v33 }
 0xaa1   : > { %5611 = vmatmul.mubr.f32.gmra.mrb[74].mxu1 %v7835_v43 }
 0xaa2   : > { %5648 = vmatprep.mubr.f32.mxu0 %v4031_v60 }
 0xaa3   : > { %5649 = vmatmul.mubr.f32.gmra.mrb[90].mxu0 %v4032_v39 }
 0xb70   : > { %v5609_v61 = vpop.f32.mrb[72].mxu1 }
 0xb71   : > { %v4119_v40 = vmul.f32 0.03125, %v5609_v61  ;;  %v4010_v8 = vpop.f32.mrb[73].mxu1 }
 0xb72   : > { %v4118_v3 = vmul.f32 0.03125, %v4010_v8  ;;  %v5647_v9 = vpop.f32.mrb[88].mxu0 }
 0xb73   : > { %v4127_v44 = vmul.f32 %v4119_v40, %v4119_v40  ;;  %v4123_v13 = vmul.f32 0.03125, %v5647_v9  ;;  %v4099_v57 = vpop.f32.mrb[89].mxu0 }
 0xb74   : > { %v4126_v4 = vmul.f32 %v4118_v3, %v4118_v3  ;;  %v4122_v20 = vmul.f32 0.03125, %v4099_v57  ;;  %v5612_v51 = vpop.f32.mrb[74].mxu1  ;;  %5653 = vmatprep.mubr.msk.f32.mxu0 %vm7987_vm2, %v4118_v3 }
 0xb75   : > { %v4131_v34 = vsub.f32 %v4123_v13, %v4127_v44  ;;  %v4121_v30 = vmul.f32 0.03125, %v5612_v51  ;;  %v4020_v58 = vpop.f32.mrb[75].mxu1  ;;  %5654 = vmatmul.mubr.msk.f32.vlgmr.msra.gmra.mrb[92].mxu0 %vm7988_vm14, %v4119_v40 }
 0xb76   : > { %v4130_v42 = vsub.f32 %v4122_v20, %v4126_v4  ;;  %v4120_v0 = vmul.f32 0.03125, %v4020_v58  ;;  %v5650_v53 = vpop.f32.mrb[90].mxu0 }
 0xb77   : > { %v4135_v27 = vadd.f32 1e-05, %v4131_v34  ;;  %v4129_v1 = vmul.f32 %v4121_v30, %v4121_v30  ;;  %v4125_v45 = vmul.f32 0.03125, %v5650_v53  ;;  %v4109_v21 = vpop.f32.mrb[91].mxu0 }
 0xb78   : > { %v4134_v63 = vadd.f32 1e-05, %v4130_v42  ;;  %v4128_v46 = vmul.f32 %v4120_v0, %v4120_v0  ;;  %v4124_v7 = vmul.f32 0.03125, %v4109_v21  ;;  %5656 = vmatprep.mubr.msk.f32.mxu1 %vm7989_vm8, %v4120_v0 }
 0xb79   : > { %v4133_v15 = vsub.f32 %v4125_v45, %v4129_v1  ;;  %5657 = vmatmul.mubr.msk.f32.vlgmr.msra.gmra.mrb[76].mxu1 %vm7990_vm5, %v4121_v30 }
 0xb7a   : > { %6276 = vrsqrt.f32 %v4134_v63  ;;  %v4132_v48 = vsub.f32 %v4124_v7, %v4128_v46  ;;  %5660 = vmatpush3.msk.msra.mxu1 %vm7991_vm1, %v4484_v33 }
 0xb7b   : > { %6278 = vrsqrt.f32 %v4135_v27  ;;  %v4137_v56 = vadd.f32 1e-05, %v4133_v15 }
 0xb7c   : > { %v4136_v37 = vadd.f32 1e-05, %v4132_v48 }
 0xb7e   : > { %6280 = vrsqrt.f32 %v4136_v37 }
 0xb7f   : > { %6282 = vrsqrt.f32 %v4137_v56 }
 0xb84   : > { %v6277_v23 = vpop.eup %6276 }
 0xb85   : > { %v6279_v54 = vpop.eup %6278  ;;  %5661 = vmatprep.mubr.msk.f32.mxu1 %vm7992_vm12, %v6277_v23 }
 0xb86   : > { %5662 = vmatmul.mubr.msk.f32.vlgmr.msra.gmra.mrb[78].mxu1 %vm7993_vm7, %v6279_v54 }
 0xb88   : > { %v6281_v14 = vpop.eup %6280 }
 0xb89   : > { %v6283_v47 = vpop.eup %6282  ;;  %5664 = vmatprep.mubr.msk.f32.mxu1 %vm7994_vm9, %v6281_v14 }
 0xb8a   : > { %5665 = vmatmul.mubr.msk.f32.gmra.mrb[80].mxu1 %vm7995_vm10, %v6283_v47 }
 0xc48   : > { %v5655_v16 = vpop.f32.mrb[92].mxu0 }
 0xc49   : > { %v4223_v35 = vpop.f32.mrb[93].mxu0  ;;  %v4340_v38 = vsub.f32 %v7824_v29, %v5655_v16 }
 0xc4a   : > { %v4339_v22 = vsub.f32 %v7827_v32, %v4223_v35 }
 0xc4c   : > { %v5658_v59 = vpop.f32.mrb[76].mxu1 }
 0xc4d   : > { %v4233_v18 = vpop.f32.mrb[77].mxu1  ;;  %v4342_v5 = vsub.f32 %v7835_v43, %v5658_v59 }
 0xc4e   : > { %v4341_v32 = vsub.f32 %v7839_v11, %v4233_v18 }
 0xc59   : > { %v5663_v55 = vpop.f32.mrb[78].mxu1 }
 0xc5a   : > { %v4344_v17 = vmul.f32 %v5663_v55, %v4340_v38  ;;  %v4320_v12 = vpop.f32.mrb[79].mxu1 }
 0xc5b   : > { %v4343_v25 = vmul.f32 %v4339_v22, %v4320_v12 }
 0xc5c   : > { %v4354_v29 = vmul.f32 %v4679_v10, %v4344_v17 }
 0xc5d   : > { %v4353_v41 = vmul.f32 %v4679_v10, %v4343_v25  ;;  %v5666_v6 = vpop.f32.mrb[80].mxu1 }
 0xc5e   : > { %v4364_v52 = vadd.f32 %v4680_v62, %v4354_v29  ;;  %v4346_v31 = vmul.f32 %v5666_v6, %v4342_v5  ;;  %v4330_v24 = vpop.f32.mrb[81].mxu1 }
 0xc5f   : > { %v4363_v2 = vadd.f32 %v4680_v62, %v4353_v41  ;;  %v4345_v36 = vmul.f32 %v4341_v32, %v4330_v24 }
 0xc60   : > { %4368 = vst [vmem:[%s367_s11 + $0x8] sm:$0xff] %v4364_v52  ;;  %v4356_v49 = vmul.f32 %v4679_v10, %v4346_v31 }
 0xc61   : > { %4367 = vst [vmem:[%s367_s11] sm:$0xff] %v4363_v2  ;;  %v4355_v19 = vmul.f32 %v4679_v10, %v4345_v36 }
 0xc62   : > { %v4366_v43 = vadd.f32 %v4680_v62, %v4356_v49 }
 0xc63   : > { %v4365_v11 = vadd.f32 %v4680_v62, %v4355_v19 }
 0xc64   : > { %4370 = vst [vmem:[%s367_s11 + $0x18] sm:$0xff] %v4366_v43 }
 0xc65   : > { %4369 = vst [vmem:[%s367_s11 + $0x10] sm:$0xff] %v4365_v11 }
 0xc66   : > { %6301 = shalt.err (!%p6298_p3)
}
 0xc67   : > { %s6302_s26 = scalar_lea.hbm %s7885_s21, 512  ;;  %s6306_s12 = scalar_lea.hbm %s7940_s10, 1024 }
 0xc68   : > { %p6303_p4 = scmp.ne.s32.totalorder %s7885_s21, %s6302_s26  ;;  %p6307_p9 = scmp.lt.u32.totalorder %s7885_s21, %s7940_s10 }
 0xc69   : > { %p6308_p10 = scmp.lt.u32.totalorder %s6306_s12, %s6302_s26  ;;  %p6310_p12 = scmp.lt.u32.totalorder %s6302_s26, %s7885_s21 }
 0xc6a   : > { %p6304_p7 = pnand %p6303_p4, %p6460_p5 }
 0xc6b   : > { %p6309_p11 = por %p6308_p10, %p6307_p9 }
 0xc6c   : > { %p6305_p8 = pneg %p6304_p7 }
 0xc6d   : > { %p6311_p13 = por %p6310_p12, %p6309_p11 }
 0xc6f   : > { %p6312_p0 = pnand %p6311_p13, %p6305_p8 }
 0xc71   : > { %6315 = shalt.err (!%p6312_p0)
}
 0xc72   : > { %s6365_s17 = smov 128   ;;  %s6366_s28 = smov 8  }
 0xc73   : > { %5949 = dma.vmem_to_hbm [thread:$0]  (%p6460_p5), %s7880_s22, 512, %s7885_s21, %s7889_s25, %s6365_s17, %s6365_s17, %s6366_s28  }
 0xc74 PF: > { %p5955_p1 = scmp.ge.s32.totalorder %s6350_s16, 2  ;;  %s4400_s29 = sand.u32 1, %s6338_s13  }
 0xc75   : > { %s4401_s30 = scalar_lea.sflag [#allocation3], %s4400_s29 }
 0xc76   : > { %p5952_p2 = pnand %p5955_p1, %p6464_p6 }
 0xc78   : > { %6333 = dma.done.wait (!%p5952_p2), %s4401_s30, 512  }
 0xc79   : > { %6335 = vsyncadd (!%p5952_p2), %s4401_s30, 4294966784  ;;  %s7996_s26 = sld [smem:[#allocation5_spill]]  ;;  %p20_p3 = scmp.ge.s32.totalorder %s6447_s19, 4  }
 0xc7a   : > { %s7997_s13 = smov %s6342_s14  ;;  %s7998_s14 = smov %s6346_s15 }
 0xc7b   : > { %s8000_s16 = smov %s6447_s19  ;;  %22 = sbr.rel (!%p20_p3) target bundleno = 3 (0x3), region = 98 }
 0xc7f   : > { %s7999_s15 = smov %s7996_s26 }
 0xc82   :  { %4406 = vsyncpa [#allocation3], 1 }
 0xc83   :  { %4408 = vsyncpa [#allocation3 + $0x1], 1 }

</bundles_post_ra>
